<compile_context>
chip_gen: v5e
topology: v5e:2x2
jax: 0.10.0
libtpu: 0.0.40
codegen_flags: <defaults>
</compile_context>

<pallas_src>
import functools

import jax
import jax.numpy as jnp
from jax.experimental import pallas as pl
from jax.experimental.pallas import tpu as pltpu


_LEAKY_SLOPE = 0.1
_VMEM_LIMIT_BYTES = 32 * 1024 * 1024   # explicit budget; safe on v5e/v6e/v7x
_TILE_BUDGET_BYTES = 16 * 1024 * 1024  # target for the double-buffered tiles
_FOLD_K_MAX = 512                      # fold taps into K when KH*KW*Cin <= this


def _cnn_block_kernel_folded(x_ref, w_ref, s_ref, b_ref, o_ref, patch_ref,
                             *, kh_size, kw_size):
    # x_ref:     (TH+KH-1, Wp, Cin)   compute dtype (bf16)
    # w_ref:     (KH*KW*Cin, TC)      compute dtype
    # s_ref/b_ref: (1, TC)            f32 folded BN scale / bias
    # o_ref:     (TH, Wo, TC)         f32
    # patch_ref: (TH*Wo, KH*KW*Cin)   VMEM scratch (in-kernel im2col tile)
    th, wo, tc = o_ref.shape
    cin = x_ref.shape[-1]
    for kh in range(kh_size):
        for kw in range(kw_size):
            k0 = (kh * kw_size + kw) * cin
            patch_ref[:, k0:k0 + cin] = (
                x_ref[kh:kh + th, kw:kw + wo, :].reshape(th * wo, cin))
    # One deep matmul: K = KH*KW*Cin, f32 accumulation on the MXU.
    acc = jnp.dot(patch_ref[...], w_ref[...],
                  preferred_element_type=jnp.float32)
    y = acc * s_ref[0] + b_ref[0]
    y = jnp.where(y > 0, y, _LEAKY_SLOPE * y)
    o_ref[...] = y.reshape(th, wo, tc).astype(o_ref.dtype)


def _cnn_block_kernel_taps(x_ref, w_ref, s_ref, b_ref, o_ref, acc_ref,
                           *, kh_size, kw_size):
    # x_ref: (TH+KH-1, Wp, Cin); w_ref: (KH*KW, Cin, TC)
    # acc_ref: (TH*Wo, TC) f32 VMEM scratch accumulator.
    th, wo, tc = o_ref.shape
    cin = x_ref.shape[-1]
    acc_ref[...] = jnp.zeros_like(acc_ref)
    for kh in range(kh_size):
        for kw in range(kw_size):
            patch = x_ref[kh:kh + th, kw:kw + wo, :].reshape(th * wo, cin)
            acc_ref[...] += jnp.dot(patch, w_ref[kh * kw_size + kw],
                                    preferred_element_type=jnp.float32)
    y = acc_ref[...] * s_ref[0] + b_ref[0]
    y = jnp.where(y > 0, y, _LEAKY_SLOPE * y)
    o_ref[...] = y.reshape(th, wo, tc).astype(o_ref.dtype)


def _round_up(x, m):
    return (x + m - 1) // m * m


def _choose_tiles(ho, wp, cin, coutp, kh, kw, folded, compute_bytes):
    """Pick (TH, TC) so the double-buffered tiles fit the VMEM budget."""
    tc = 256 if coutp % 256 == 0 else 128            # lane-dense Cout tile
    w_bytes = kh * kw * cin * tc * compute_bytes
    for th in (128, 64, 32, 16, 8, 4, 2, 1):
        if th > ho:
            continue
        x_bytes = (th + kh - 1) * wp * cin * compute_bytes
        o_bytes = th * wp * tc * 4
        scratch = (th * wp * kh * kw * cin * compute_bytes if folded
                   else th * wp * tc * 4)
        total = 2 * (x_bytes + o_bytes + w_bytes) + scratch
        if total <= _TILE_BUDGET_BYTES:
            return th, tc
    return 1, tc


def cnn_block_forward(x_nchw, weight, gamma, beta, running_mean, running_var,
                      *, stride=1, padding=1, eps=1e-5, use_bf16=True,
                      tile_h=None, tile_c=None):
    """Fused Conv2d + BatchNorm(eval) + LeakyReLU(0.1).  NCHW in / NCHW out."""
    if stride != 1:
        raise NotImplementedError("CNNBlock Pallas kernel assumes stride=1")
    n, cin, h, w = x_nchw.shape
    cout, cin_w, kh, kw = weight.shape
    assert cin_w == cin

    compute_dtype = jnp.bfloat16 if use_bf16 else jnp.float32
    cbytes = 2 if use_bf16 else 4

    ho = h + 2 * padding - kh + 1
    wo = w + 2 * padding - kw + 1
    wp = w + 2 * padding

    # --- layout & parameter folding (plain-JAX glue) ---
    x = jnp.transpose(x_nchw, (0, 2, 3, 1)).astype(compute_dtype)    # NHWC
    x = jnp.pad(x, ((0, 0), (padding, padding), (padding, padding), (0, 0)))

    coutp = _round_up(cout, 128)                 # lane-dense output channels

    scale = (gamma / jnp.sqrt(running_var + eps)).astype(jnp.float32)
    bias = (beta - running_mean * scale).astype(jnp.float32)
    scale_p = jnp.pad(scale, (0, coutp - cout)).reshape(1, coutp)
    bias_p = jnp.pad(bias, (0, coutp - cout)).reshape(1, coutp)

    # (Cout,Cin,KH,KW) -> (KH,KW,Cin,Coutp), zero-padded along Cout.
    w_hwio = jnp.transpose(weight, (2, 3, 1, 0)).astype(compute_dtype)
    w_hwio = jnp.pad(w_hwio, ((0, 0), (0, 0), (0, 0), (0, coutp - cout)))

    folded = kh * kw * cin <= _FOLD_K_MAX
    th, tc = _choose_tiles(ho, wp, cin, coutp, kh, kw, folded, cbytes)
    if tile_h is not None:
        th = tile_h
    if tile_c is not None:
        tc = tile_c
    assert coutp % tc == 0 and tc % 128 == 0
    n_t = pl.cdiv(ho, th)
    n_c = coutp // tc
    ho_pad = n_t * th
    thp = th + kh - 1

    # Pad extra zero rows so every H tile has a full input window, then
    # materialize the overlapping H tiles (halo rows duplicated wrapper-side
    # so BlockSpec indexing stays purely Blocked).
    x = jnp.pad(x, ((0, 0), (0, ho_pad + kh - 1 - x.shape[1]), (0, 0), (0, 0)))
    row_idx = (jnp.arange(n_t) * th)[:, None] + jnp.arange(thp)[None, :]
    x_tiles = x[:, row_idx]                       # (N, nT, THp, Wp, Cin)

    if folded:
        w_in = w_hwio.reshape(kh * kw * cin, coutp)
        w_spec = pl.BlockSpec((kh * kw * cin, tc), lambda b, c, t: (0, c))
        kernel = functools.partial(_cnn_block_kernel_folded,
                                   kh_size=kh, kw_size=kw)
        scratch = [pltpu.VMEM((th * wo, kh * kw * cin), compute_dtype)]
    else:
        w_in = w_hwio.reshape(kh * kw, cin, coutp)
        w_spec = pl.BlockSpec((kh * kw, cin, tc), lambda b, c, t: (0, 0, c))
        kernel = functools.partial(_cnn_block_kernel_taps,
                                   kh_size=kh, kw_size=kw)
        scratch = [pltpu.VMEM((th * wo, tc), jnp.float32)]

    out = pl.pallas_call(
        kernel,
        out_shape=jax.ShapeDtypeStruct((n, n_t, th, wo, coutp), jnp.float32),
        grid_spec=pltpu.PrefetchScalarGridSpec(
            num_scalar_prefetch=0,
            # Cout tiles outside H tiles: the weight block (constant per c) is
            # fetched once per Cout tile and stays resident over the H sweep.
            grid=(n, n_c, n_t),
            in_specs=[
                pl.BlockSpec((None, None, thp, wp, cin),
                             lambda b, c, t: (b, t, 0, 0, 0)),
                w_spec,
                pl.BlockSpec((1, tc), lambda b, c, t: (0, c)),
                pl.BlockSpec((1, tc), lambda b, c, t: (0, c)),
            ],
            out_specs=pl.BlockSpec((None, None, th, wo, tc),
                                   lambda b, c, t: (b, t, 0, 0, c)),
            scratch_shapes=scratch,
        ),
        compiler_params=pltpu.CompilerParams(
            # All axes independent -> "parallel" (v7x megacore even at N=1).
            dimension_semantics=("parallel", "parallel", "parallel"),
            vmem_limit_bytes=_VMEM_LIMIT_BYTES),
    )(x_tiles, w_in, scale_p, bias_p)

    out = out.reshape(n, ho_pad, wo, coutp)[:, :ho, :, :cout]
    return jnp.transpose(out, (0, 3, 1, 2))       # NCHW


def _reference_forward(x_nchw, weight, gamma, beta, running_mean, running_var,
                       *, padding=1, eps=1e-5):
    """Plain-JAX reference (lax conv) for correctness checking."""
    y = jax.lax.conv_general_dilated(
        x_nchw, weight, window_strides=(1, 1),
        padding=((padding, padding), (padding, padding)),
        dimension_numbers=("NCHW", "OIHW", "NCHW"))
    scale = (gamma / jnp.sqrt(running_var + eps)).reshape(1, -1, 1, 1)
    bias = (beta - running_mean * gamma / jnp.sqrt(running_var + eps)).reshape(
        1, -1, 1, 1)
    y = y * scale + bias
    return jnp.where(y > 0, y, _LEAKY_SLOPE * y)


if __name__ == "__main__":
    key = jax.random.PRNGKey(0)

    def make_inputs(k, n, cin, h, w, cout, kh=3, kw=3):
        ks = jax.random.split(k, 6)
        x = jax.random.normal(ks[0], (n, cin, h, w), dtype=jnp.float32)
        wgt = jax.random.normal(ks[1], (cout, cin, kh, kw), jnp.float32) * 0.1
        gamma = jax.random.normal(ks[2], (cout,), jnp.float32) * 0.1 + 1.0
        beta = jax.random.normal(ks[3], (cout,), jnp.float32) * 0.1
        rmean = jax.random.normal(ks[4], (cout,), jnp.float32) * 0.1
        rvar = jax.random.uniform(ks[5], (cout,), jnp.float32,
                                  minval=0.5, maxval=1.5)
        return x, wgt, gamma, beta, rmean, rvar

    k1, k2 = jax.random.split(key)

    # Case 1: small Cin -> folded (im2col-K) path.
    x, wgt, g, b, rm, rv = make_inputs(k1, 2, 4, 16, 16, 8)
    out = jax.block_until_ready(cnn_block_forward(x, wgt, g, b, rm, rv))
    # Kernel feeds the MXU bf16 inputs (f32 accumulation); compare against the
    # reference run on the same bf16-rounded inputs.
    x_r = x.astype(jnp.bfloat16).astype(jnp.float32)
    w_r = wgt.astype(jnp.bfloat16).astype(jnp.float32)
    ref = _reference_forward(x_r, w_r, g, b, rm, rv)
    assert out.shape == (2, 8, 16, 16)
    assert jnp.allclose(out, ref, atol=1e-2, rtol=1e-2), "case-1 mismatch"

    # Case 2: larger Cin -> tap path, with forced small tiles so the grid
    # actually tiles H (halos + bottom row padding) and Cout (2 lane tiles).
    x, wgt, g, b, rm, rv = make_inputs(k2, 1, 64, 18, 16, 130)
    out = jax.block_until_ready(
        cnn_block_forward(x, wgt, g, b, rm, rv, tile_h=8, tile_c=128))
    x_r = x.astype(jnp.bfloat16).astype(jnp.float32)
    w_r = wgt.astype(jnp.bfloat16).astype(jnp.float32)
    ref = _reference_forward(x_r, w_r, g, b, rm, rv)
    assert out.shape == (1, 130, 18, 16)
    assert jnp.allclose(out, ref, atol=1e-2, rtol=1e-2), "case-2 mismatch"

    print("KERNEL_OK")
</pallas_src>

<mosaic_0001>
module attributes {stable_mosaic.version = 11 : i64} {
  func.func @_cnn_block_kernel_folded(%arg0: i32, %arg1: i32, %arg2: i32, %arg3: memref<1x1x18x18x4xbf16, #tpu.memory_space<vmem>>, %arg4: memref<36x128xbf16, #tpu.memory_space<vmem>>, %arg5: memref<1x128xf32, #tpu.memory_space<vmem>>, %arg6: memref<1x128xf32, #tpu.memory_space<vmem>>, %arg7: memref<1x1x16x16x128xf32, #tpu.memory_space<vmem>>, %arg8: memref<256x36xbf16, #tpu.memory_space<vmem>>) attributes {dimension_semantics = [#tpu.dimension_semantics<parallel>, #tpu.dimension_semantics<parallel>, #tpu.dimension_semantics<parallel>], iteration_bounds = array<i64: 2, 1, 1>, scalar_prefetch = 0 : i64, scratch_operands = 1 : i64, tpu.core_type = #tpu.core_type<tc>, window_params = [{transform_indices = @transform_0, window_bounds = array<i64: 1, 1, 18, 18, 4>}, {transform_indices = @transform_1, window_bounds = array<i64: 36, 128>}, {transform_indices = @transform_2, window_bounds = array<i64: 1, 128>}, {transform_indices = @transform_3, window_bounds = array<i64: 1, 128>}, {transform_indices = @transform_4, window_bounds = array<i64: 1, 1, 16, 16, 128>}]} {
    %c0 = arith.constant 0 : index
    %c0_0 = arith.constant 0 : index
    %c0_1 = arith.constant 0 : index
    %c0_2 = arith.constant 0 : index
    %c0_3 = arith.constant 0 : index
    %0 = vector.load %arg3[%c0, %c0_0, %c0_1, %c0_2, %c0_3] : memref<1x1x18x18x4xbf16, #tpu.memory_space<vmem>>, vector<1x1x16x16x4xbf16>
    %1 = vector.shape_cast %0 : vector<1x1x16x16x4xbf16> to vector<16x16x4xbf16>
    %2 = vector.shape_cast %1 : vector<16x16x4xbf16> to vector<256x4xbf16>
    %c0_4 = arith.constant 0 : index
    %c0_5 = arith.constant 0 : index
    %3 = vector.load %arg8[%c0_4, %c0_5] : memref<256x36xbf16, #tpu.memory_space<vmem>>, vector<256x4xbf16>
    tpu.vector_store %arg8[%c0_4, %c0_5], %2 {strides = array<i32>} : memref<256x36xbf16, #tpu.memory_space<vmem>>, vector<256x4xbf16>,
    %c0_6 = arith.constant 0 : index
    %c0_7 = arith.constant 0 : index
    %c0_8 = arith.constant 0 : index
    %c1 = arith.constant 1 : index
    %c0_9 = arith.constant 0 : index
    %4 = vector.load %arg3[%c0_6, %c0_7, %c0_8, %c1, %c0_9] : memref<1x1x18x18x4xbf16, #tpu.memory_space<vmem>>, vector<1x1x16x16x4xbf16>
    %5 = vector.shape_cast %4 : vector<1x1x16x16x4xbf16> to vector<16x16x4xbf16>
    %6 = vector.shape_cast %5 : vector<16x16x4xbf16> to vector<256x4xbf16>
    %c0_10 = arith.constant 0 : index
    %c4 = arith.constant 4 : index
    %7 = vector.load %arg8[%c0_10, %c4] : memref<256x36xbf16, #tpu.memory_space<vmem>>, vector<256x4xbf16>
    tpu.vector_store %arg8[%c0_10, %c4], %6 {strides = array<i32>} : memref<256x36xbf16, #tpu.memory_space<vmem>>, vector<256x4xbf16>,
    %c0_11 = arith.constant 0 : index
    %c0_12 = arith.constant 0 : index
    %c0_13 = arith.constant 0 : index
    %c2 = arith.constant 2 : index
    %c0_14 = arith.constant 0 : index
    %8 = vector.load %arg3[%c0_11, %c0_12, %c0_13, %c2, %c0_14] : memref<1x1x18x18x4xbf16, #tpu.memory_space<vmem>>, vector<1x1x16x16x4xbf16>
    %9 = vector.shape_cast %8 : vector<1x1x16x16x4xbf16> to vector<16x16x4xbf16>
    %10 = vector.shape_cast %9 : vector<16x16x4xbf16> to vector<256x4xbf16>
    %c0_15 = arith.constant 0 : index
    %c8 = arith.constant 8 : index
    %11 = vector.load %arg8[%c0_15, %c8] : memref<256x36xbf16, #tpu.memory_space<vmem>>, vector<256x4xbf16>
    tpu.vector_store %arg8[%c0_15, %c8], %10 {strides = array<i32>} : memref<256x36xbf16, #tpu.memory_space<vmem>>, vector<256x4xbf16>,
    %c0_16 = arith.constant 0 : index
    %c0_17 = arith.constant 0 : index
    %c1_18 = arith.constant 1 : index
    %c0_19 = arith.constant 0 : index
    %c0_20 = arith.constant 0 : index
    %12 = vector.load %arg3[%c0_16, %c0_17, %c1_18, %c0_19, %c0_20] : memref<1x1x18x18x4xbf16, #tpu.memory_space<vmem>>, vector<1x1x16x16x4xbf16>
    %13 = vector.shape_cast %12 : vector<1x1x16x16x4xbf16> to vector<16x16x4xbf16>
    %14 = vector.shape_cast %13 : vector<16x16x4xbf16> to vector<256x4xbf16>
    %c0_21 = arith.constant 0 : index
    %c12 = arith.constant 12 : index
    %15 = vector.load %arg8[%c0_21, %c12] : memref<256x36xbf16, #tpu.memory_space<vmem>>, vector<256x4xbf16>
    tpu.vector_store %arg8[%c0_21, %c12], %14 {strides = array<i32>} : memref<256x36xbf16, #tpu.memory_space<vmem>>, vector<256x4xbf16>,
    %c0_22 = arith.constant 0 : index
    %c0_23 = arith.constant 0 : index
    %c1_24 = arith.constant 1 : index
    %c1_25 = arith.constant 1 : index
    %c0_26 = arith.constant 0 : index
    %16 = vector.load %arg3[%c0_22, %c0_23, %c1_24, %c1_25, %c0_26] : memref<1x1x18x18x4xbf16, #tpu.memory_space<vmem>>, vector<1x1x16x16x4xbf16>
    %17 = vector.shape_cast %16 : vector<1x1x16x16x4xbf16> to vector<16x16x4xbf16>
    %18 = vector.shape_cast %17 : vector<16x16x4xbf16> to vector<256x4xbf16>
    %c0_27 = arith.constant 0 : index
    %c16 = arith.constant 16 : index
    %19 = vector.load %arg8[%c0_27, %c16] : memref<256x36xbf16, #tpu.memory_space<vmem>>, vector<256x4xbf16>
    tpu.vector_store %arg8[%c0_27, %c16], %18 {strides = array<i32>} : memref<256x36xbf16, #tpu.memory_space<vmem>>, vector<256x4xbf16>,
    %c0_28 = arith.constant 0 : index
    %c0_29 = arith.constant 0 : index
    %c1_30 = arith.constant 1 : index
    %c2_31 = arith.constant 2 : index
    %c0_32 = arith.constant 0 : index
    %20 = vector.load %arg3[%c0_28, %c0_29, %c1_30, %c2_31, %c0_32] : memref<1x1x18x18x4xbf16, #tpu.memory_space<vmem>>, vector<1x1x16x16x4xbf16>
    %21 = vector.shape_cast %20 : vector<1x1x16x16x4xbf16> to vector<16x16x4xbf16>
    %22 = vector.shape_cast %21 : vector<16x16x4xbf16> to vector<256x4xbf16>
    %c0_33 = arith.constant 0 : index
    %c20 = arith.constant 20 : index
    %23 = vector.load %arg8[%c0_33, %c20] : memref<256x36xbf16, #tpu.memory_space<vmem>>, vector<256x4xbf16>
    tpu.vector_store %arg8[%c0_33, %c20], %22 {strides = array<i32>} : memref<256x36xbf16, #tpu.memory_space<vmem>>, vector<256x4xbf16>,
    %c0_34 = arith.constant 0 : index
    %c0_35 = arith.constant 0 : index
    %c2_36 = arith.constant 2 : index
    %c0_37 = arith.constant 0 : index
    %c0_38 = arith.constant 0 : index
    %24 = vector.load %arg3[%c0_34, %c0_35, %c2_36, %c0_37, %c0_38] : memref<1x1x18x18x4xbf16, #tpu.memory_space<vmem>>, vector<1x1x16x16x4xbf16>
    %25 = vector.shape_cast %24 : vector<1x1x16x16x4xbf16> to vector<16x16x4xbf16>
    %26 = vector.shape_cast %25 : vector<16x16x4xbf16> to vector<256x4xbf16>
    %c0_39 = arith.constant 0 : index
    %c24 = arith.constant 24 : index
    %27 = vector.load %arg8[%c0_39, %c24] : memref<256x36xbf16, #tpu.memory_space<vmem>>, vector<256x4xbf16>
    tpu.vector_store %arg8[%c0_39, %c24], %26 {strides = array<i32>} : memref<256x36xbf16, #tpu.memory_space<vmem>>, vector<256x4xbf16>,
    %c0_40 = arith.constant 0 : index
    %c0_41 = arith.constant 0 : index
    %c2_42 = arith.constant 2 : index
    %c1_43 = arith.constant 1 : index
    %c0_44 = arith.constant 0 : index
    %28 = vector.load %arg3[%c0_40, %c0_41, %c2_42, %c1_43, %c0_44] : memref<1x1x18x18x4xbf16, #tpu.memory_space<vmem>>, vector<1x1x16x16x4xbf16>
    %29 = vector.shape_cast %28 : vector<1x1x16x16x4xbf16> to vector<16x16x4xbf16>
    %30 = vector.shape_cast %29 : vector<16x16x4xbf16> to vector<256x4xbf16>
    %c0_45 = arith.constant 0 : index
    %c28 = arith.constant 28 : index
    %31 = vector.load %arg8[%c0_45, %c28] : memref<256x36xbf16, #tpu.memory_space<vmem>>, vector<256x4xbf16>
    tpu.vector_store %arg8[%c0_45, %c28], %30 {strides = array<i32>} : memref<256x36xbf16, #tpu.memory_space<vmem>>, vector<256x4xbf16>,
    %c0_46 = arith.constant 0 : index
    %c0_47 = arith.constant 0 : index
    %c2_48 = arith.constant 2 : index
    %c2_49 = arith.constant 2 : index
    %c0_50 = arith.constant 0 : index
    %32 = vector.load %arg3[%c0_46, %c0_47, %c2_48, %c2_49, %c0_50] : memref<1x1x18x18x4xbf16, #tpu.memory_space<vmem>>, vector<1x1x16x16x4xbf16>
    %33 = vector.shape_cast %32 : vector<1x1x16x16x4xbf16> to vector<16x16x4xbf16>
    %34 = vector.shape_cast %33 : vector<16x16x4xbf16> to vector<256x4xbf16>
    %c0_51 = arith.constant 0 : index
    %c32 = arith.constant 32 : index
    %35 = vector.load %arg8[%c0_51, %c32] : memref<256x36xbf16, #tpu.memory_space<vmem>>, vector<256x4xbf16>
    tpu.vector_store %arg8[%c0_51, %c32], %34 {strides = array<i32>} : memref<256x36xbf16, #tpu.memory_space<vmem>>, vector<256x4xbf16>,
    %c0_52 = arith.constant 0 : index
    %c0_53 = arith.constant 0 : index
    %36 = vector.load %arg8[%c0_52, %c0_53] : memref<256x36xbf16, #tpu.memory_space<vmem>>, vector<256x36xbf16>
    %c0_54 = arith.constant 0 : index
    %c0_55 = arith.constant 0 : index
    %37 = vector.load %arg4[%c0_54, %c0_55] : memref<36x128xbf16, #tpu.memory_space<vmem>>, vector<36x128xbf16>
    %cst = arith.constant dense<0.000000e+00> : vector<256x128xf32>
    %38 = tpu.matmul %36, %37, %cst {dimension_numbers = #tpu.dot_dimension_numbers<[1], [0], [0], [1], [0, 0, 1, 1], [], []>} : vector<256x36xbf16>, vector<36x128xbf16>, vector<256x128xf32> -> vector<256x128xf32>
    %c0_56 = arith.constant 0 : index
    %c0_57 = arith.constant 0 : index
    %39 = vector.load %arg5[%c0_56, %c0_57] : memref<1x128xf32, #tpu.memory_space<vmem>>, vector<1x128xf32>
    %40 = vector.shape_cast %39 : vector<1x128xf32> to vector<128xf32>
    %41 = vector.shape_cast %40 : vector<128xf32> to vector<1x128xf32>
    %42 = vector.broadcast %41 : vector<1x128xf32> to vector<256x128xf32>
    %43 = arith.mulf %38, %42 : vector<256x128xf32>
    %c0_58 = arith.constant 0 : index
    %c0_59 = arith.constant 0 : index
    %44 = vector.load %arg6[%c0_58, %c0_59] : memref<1x128xf32, #tpu.memory_space<vmem>>, vector<1x128xf32>
    %45 = vector.shape_cast %44 : vector<1x128xf32> to vector<128xf32>
    %46 = vector.shape_cast %45 : vector<128xf32> to vector<1x128xf32>
    %47 = vector.broadcast %46 : vector<1x128xf32> to vector<256x128xf32>
    %48 = arith.addf %43, %47 : vector<256x128xf32>
    %cst_60 = arith.constant 0.000000e+00 : f32
    %49 = vector.broadcast %cst_60 : f32 to vector<256x128xf32>
    %50 = arith.cmpf ogt, %48, %49 : vector<256x128xf32>
    %cst_61 = arith.constant 1.000000e-01 : f32
    %51 = vector.broadcast %cst_61 : f32 to vector<256x128xf32>
    %52 = arith.mulf %51, %48 : vector<256x128xf32>
    %53 = arith.select %50, %48, %52 : vector<256x128xi1>, vector<256x128xf32>
    %54 = vector.shape_cast %53 : vector<256x128xf32> to vector<16x16x128xf32>
    %c0_62 = arith.constant 0 : index
    %c0_63 = arith.constant 0 : index
    %c0_64 = arith.constant 0 : index
    %c0_65 = arith.constant 0 : index
    %c0_66 = arith.constant 0 : index
    %55 = vector.load %arg7[%c0_62, %c0_63, %c0_64, %c0_65, %c0_66] : memref<1x1x16x16x128xf32, #tpu.memory_space<vmem>>, vector<1x1x16x16x128xf32>
    %56 = vector.shape_cast %55 : vector<1x1x16x16x128xf32> to vector<16x16x128xf32>
    %57 = vector.shape_cast %54 : vector<16x16x128xf32> to vector<1x1x16x16x128xf32>
    tpu.vector_store %arg7[%c0_62, %c0_63, %c0_64, %c0_65, %c0_66], %57 {strides = array<i32>} : memref<1x1x16x16x128xf32, #tpu.memory_space<vmem>>, vector<1x1x16x16x128xf32>,
    return
  }
  func.func @transform_0(%arg0: i32, %arg1: i32, %arg2: i32) -> (i32, i32, i32, i32, i32) {
    %c0_i32 = arith.constant 0 : i32
    %c0_i32_0 = arith.constant 0 : i32
    %c0_i32_1 = arith.constant 0 : i32
    %c0_i32_2 = arith.constant 0 : i32
    return %arg0, %arg2, %c0_i32, %c0_i32_0, %c0_i32_1 : i32, i32, i32, i32, i32
  }
  func.func @transform_1(%arg0: i32, %arg1: i32, %arg2: i32) -> (i32, i32) {
    %c0_i32 = arith.constant 0 : i32
    %c0_i32_0 = arith.constant 0 : i32
    return %c0_i32, %arg1 : i32, i32
  }
  func.func @transform_2(%arg0: i32, %arg1: i32, %arg2: i32) -> (i32, i32) {
    %c0_i32 = arith.constant 0 : i32
    %c0_i32_0 = arith.constant 0 : i32
    return %c0_i32, %arg1 : i32, i32
  }
  func.func @transform_3(%arg0: i32, %arg1: i32, %arg2: i32) -> (i32, i32) {
    %c0_i32 = arith.constant 0 : i32
    %c0_i32_0 = arith.constant 0 : i32
    return %c0_i32, %arg1 : i32, i32
  }
  func.func @transform_4(%arg0: i32, %arg1: i32, %arg2: i32) -> (i32, i32, i32, i32, i32) {
    %c0_i32 = arith.constant 0 : i32
    %c0_i32_0 = arith.constant 0 : i32
    %c0_i32_1 = arith.constant 0 : i32
    return %arg0, %arg2, %c0_i32, %c0_i32_0, %arg1 : i32, i32, i32, i32, i32
  }
}

</mosaic_0001>

<bundles_post_ra>
// kernel: tpu_custom_call.1
= control target key start
LH: loop header
LB: loop body
LE: loop exit
PB: predicated region body
PF: predicated region fallthrough
CT: control target
= control target key end

     0   :  { %9 = vsyncpa [#allocation4], 0  ;;  %s6294_s0 = inlined_call_operand.vmem [shape: bf16[2,1,18,18,4], index: 0, kind: input, shape index: {}]   ;;  %s6295_s1 = inlined_call_operand.vmem [shape: bf16[36,128], index: 1, kind: input, shape index: {}]   ;;  %s6296_s2 = inlined_call_operand.vmem [shape: f32[1,128], index: 2, kind: input, shape index: {}]   ;;  %s6297_s3 = inlined_call_operand.vmem [shape: f32[1,128], index: 3, kind: input, shape index: {}]   ;;  %s6298_s4 = inlined_call_operand.hbm [shape: f32[2,1,16,16,128], index: 4, kind: output, shape index: {}]  }
   0x1   :  { %11 = vsyncpa [#allocation4 + $0x1], 0  ;;  %s4666_s15 = smov 0   ;;  %s4668_s16 = smov 0  }
   0x2   :  { %s4670_s17 = smov 0   ;;  %s4672_s18 = smov 0  }
   0x3   :  { %s4674_s19 = smov 0   ;;  %s4676_s20 = smov 0  }
   0x4 LB: > { %s4050_s21 = sadd.s32 4294967295, %s4630_s20   ;;  %s4051_s22 = sadd.s32 4294967294, %s4630_s20   ;;  %s4630_s20 = sphi %s4676_s20, %s17_s20   ;;  %s4626_s19 = sphi %s4674_s19, %s6309_s19   ;;  %s4622_s18 = sphi %s4672_s18, %s6308_s18   ;;  %s4618_s17 = sphi %s4670_s17, %s6307_s17   ;;  %s4614_s16 = sphi %s4668_s16, %s6306_s16   ;;  %s4610_s15 = sphi %s4666_s15, %s6305_s15  }
   0x5   : > { %s36_s23 = sadd.s32 1, %s4626_s19  ;;  %s153_s24 = sadd.s32 1, %s4618_s17 }
   0x6   : > { %p38_p0 = scmp.ge.s32.totalorder %s36_s23, 2  ;;  %p163_p1 = scmp.ne.s32.totalorder %s4618_s17, %s4614_s16 }
   0x7   : > { %p164_p2 = scmp.eq.s32.totalorder %s4050_s21, 1  ;;  %p169_p3 = scmp.ne.s32.totalorder %s4614_s16, %s4610_s15 }
   0x8   : > { %s6311_s23 = smov (%p38_p0, %s36_s23), 0  ;;  %p170_p5 = scmp.eq.s32.totalorder %s4051_s22, 1 }
   0x9   : > { %p4706_p4 = por %p164_p2, %p163_p1  ;;  %s146_s26 = ssub.s32 %s4626_s19, %s6311_s23 }
   0xa   : > { %p4057_p6 = scmp.ge.s32.totalorder %s4630_s20, 1  ;;  %p151_p7 = scmp.eq.s32.totalorder %s146_s26, 0 }
   0xb   : > { %p4713_p8 = por %p170_p5, %p169_p3  ;;  %p219_p9 = scmp.lt.s32.totalorder %s4630_s20, 3 }
   0xc   : > { %s4719_s28 = scalar_select %p151_p7, %s4618_s17, %s153_s24  }
   0xd   : > { %p220_p10 = pnand %p4057_p6, %p219_p9 }
   0xe   : > { %p259_p11 = scmp.lt.s32.totalorder (!%p220_p10), %s4622_s18, 1  ;;  %s4632_s8 = smov (!%p220_p10), 4  }
   0xf   : > { %223 = sbr.rel (%p220_p10) target bundleno = 984 (0x3d8), region = 36  ;;  %s4633_s9 = smov (!%p220_p10), 8  }
  0x10   : > { %s4634_s10 = smov (!%p220_p10), 12   ;;  %s4635_s11 = smov (!%p220_p10), 16  }
  0x11   : > { %s4636_s12 = smov (!%p220_p10), 20   ;;  %s4637_s13 = smov (!%p220_p10), 24  }
  0x12   : > { %s4638_s14 = smov (!%p220_p10), 28   ;;  %s4639_s21 = smov (!%p220_p10), 32  }
  0x14   : > { %s260_s29 = scalar_select %p259_p11, %s4622_s18, 1  ;;  %vm392_vm0 = vsmask.f32 3328  ;;  %vm393_vm1 = vsmask.f32 7440  ;;  %vm1004_vm3 = vcmask 1042432  }
  0x15   : > { %vm4737_vm2 = vmor %vm392_vm0, %vm393_vm1  ;;  %vm1005_vm4 = vcmask 1046532   ;;  %vm311_vm5 = vcmask 27648   ;;  %vm875_vm7 = vcmask 60448   ;;  %vm1215_vm8 = vcmask 93248  }
  0x16   : > { %s4485_s30 = smul.u32 216, %s260_s29  ;;  %vm4912_vm6 = vmor %vm1004_vm3, %vm1005_vm4  ;;  %vm1409_vm9 = vcmask 126048   ;;  %vm1970_vm10 = vcmask 158848   ;;  %vm2307_vm11 = vcmask 191648   ;;  %vm2501_vm12 = vcmask 224448  }
  0x17   : > { %vm3613_vm13 = vcmask 1041408   ;;  %vm3062_vm14 = vcmask 257248   ;;  %vm3399_vm15 = vcmask 290048   ;;  %vm3564_vm0 = vcmask 293888  }
  0x18   : > { %s4726_s7 = scalar_lea.vmem %s6294_s0, %s4485_s30 }
  0x19   : > { %v347_v0 = vld [vmem:[%s4726_s7 + $0xc] sm:$0xf]  ;;  %v348_v1 = vld [vmem:[%s4726_s7 + $0x10] sm:$0xf]  ;;  %v344_v2 = vld [vmem:[%s4726_s7] sm:$0xf] }
  0x1a   : > { %v420_v3 = vshrl.u32 %v347_v0, 16  ;;  %v423_v4 = vshll.u32 %v347_v0, 16  ;;  %v429_v5 = vshll.u32 %v348_v1, 16  ;;  %v433_v6 = vshrl.u32 %v348_v1, 16  ;;  %v345_v7 = vld [vmem:[%s4726_s7 + $0x4] sm:$0xf] }
  0x1b   : > { %v396_v8 = vshrl.u32 %v344_v2, 16  ;;  %v399_v9 = vshll.u32 %v344_v2, 16  ;;  %v405_v10 = vshll.u32 %v345_v7, 16  ;;  %v409_v11 = vshrl.u32 %v345_v7, 16  ;;  %v349_v12 = vld [vmem:[%s4726_s7 + $0x14] sm:$0x1] }
  0x1c   : > { %v422_v13 = vrot.slane %v420_v3, 4  ;;  %v425_v14 = vrot.slane %v423_v4, 5  ;;  %v431_v15 = vrot.slane %v429_v5, 5  ;;  %v435_v16 = vrot.slane %v433_v6, 4  ;;  %v346_v17 = vld [vmem:[%s4726_s7 + $0x8] sm:$0x1] }
  0x1d   : > { %v398_v18 = vrot.slane %v396_v8, 4  ;;  %v401_v19 = vrot.slane %v399_v9, 5  ;;  %v411_v20 = vrot.slane %v409_v11, 4  ;;  %v354_v21 = vld [vmem:[%s4726_s7 + $0x28] sm:$0xf]  ;;  %v439_v24 = vshll.u32 %v349_v12, 16 }
  0x1e   : > { %v426_v22 = vor.u32 %v425_v14, %v422_v13  ;;  %v436_v23 = vor.u32 %v435_v16, %v431_v15  ;;  %v407_v27 = vrot.slane %v405_v10, 5  ;;  %v477_v28 = vshll.u32 %v354_v21, 16  ;;  %v353_v30 = vld [vmem:[%s4726_s7 + $0x24] sm:$0xf]  ;;  %v350_v35 = vld [vmem:[%s4726_s7 + $0x18] sm:$0xf] }
  0x1f   : > { %v402_v26 = vor.u32 %v401_v19, %v398_v18  ;;  %v481_v29 = vshrl.u32 %v354_v21, 16  ;;  %v415_v32 = vshll.u32 %v346_v17, 16  ;;  %v441_v38 = vrot.slane %v439_v24, 5  ;;  %v351_v40 = vld [vmem:[%s4726_s7 + $0x1c] sm:$0xf] }
  0x20   : > { %v427_v31 = vrot.slane %v426_v22, 4  ;;  %v412_v34 = vor.u32 %v411_v20, %v407_v27  ;;  %v437_v37 = vrot.slane %v436_v23, 4  ;;  %v468_v39 = vshrl.u32 %v353_v30, 16  ;;  %v355_v42 = vld [vmem:[%s4726_s7 + $0x2c] sm:$0x1] }
  0x21   : > { %v403_v33 = vrot.slane %v402_v26, 4  ;;  %v4750_v43 = vrot.slane %v477_v28, 5  ;;  %v483_v44 = vrot.slane %v481_v29, 4  ;;  %v471_v45 = vshll.u32 %v353_v30, 16  ;;  %v359_v50 = vld [vmem:[%s4726_s7 + $0x3c] sm:$0xf] }
  0x22   : > { %v432_v36 = vsel %vm4737_vm2, %v427_v31, %v431_v15  ;;  %v417_v46 = vrot.slane %v415_v32, 5  ;;  %v470_v47 = vrot.slane %v468_v39, 4  ;;  %v444_v48 = vshrl.u32 %v350_v35, 16  ;;  %v357_v58 = vld [vmem:[%s4726_s7 + $0x34] sm:$0xf] }
  0x23   : > { %783 = vrot.lane.b32.xlu1 %v432_v36, %s4632_s8  ;;  %v408_v41 = vsel %vm4737_vm2, %v403_v33, %v407_v27  ;;  %v447_v49 = vshll.u32 %v350_v35, 16  ;;  %v413_v51 = vrot.slane %v412_v34, 4  ;;  %v473_v52 = vrot.slane %v471_v45, 5  ;;  %v352_v6 = vld [vmem:[%s4726_s7 + $0x20] sm:$0x1] }
  0x24   : > { %779 = vrot.lane.b32.xlu0 %v408_v41, %s4632_s8  ;;  %v453_v53 = vshll.u32 %v351_v40, 16  ;;  %v457_v54 = vshrl.u32 %v351_v40, 16  ;;  %v487_v55 = vshll.u32 %v355_v42, 16  ;;  %v446_v56 = vrot.slane %v444_v48, 4  ;;  %v360_v15 = vld [vmem:[%s4726_s7 + $0x40] sm:$0xf] }
  0x25   : > { %v449_v57 = vrot.slane %v447_v49, 5  ;;  %v484_v59 = vor.u32 %v483_v44, %v4750_v43  ;;  %v516_v61 = vshrl.u32 %v359_v50, 16  ;;  %v519_v62 = vshll.u32 %v359_v50, 16  ;;  %v358_v16 = vld [vmem:[%s4726_s7 + $0x38] sm:$0x1] }
  0x26   : > { %v459_v60 = vrot.slane %v457_v54, 4  ;;  %v442_v63 = vsel %vm4737_vm2, %v437_v37, %v441_v38  ;;  %v474_v0 = vor.u32 %v473_v52, %v470_v47  ;;  %v455_v2 = vrot.slane %v453_v53, 5  ;;  %v363_v20 = vld [vmem:[%s4726_s7 + $0x4c] sm:$0xf]  ;;  %v356_v21 = vld [vmem:[%s4726_s7 + $0x30] sm:$0xf] }
  0x27   : > { %v450_v1 = vor.u32 %v449_v57, %v446_v56  ;;  %v418_v3 = vsel %vm4737_vm2, %v413_v51, %v417_v46  ;;  %v501_v4 = vshll.u32 %v357_v58, 16  ;;  %v505_v5 = vshrl.u32 %v357_v58, 16  ;;  %v362_v24 = vld [vmem:[%s4726_s7 + $0x48] sm:$0xf]  ;;  %v368_v47 = vld [vmem:[%s4726_s7 + $0x60] sm:$0xf] }
  0x28   : > { %v489_v7 = vrot.slane %v487_v55, 5  ;;  %v485_v9 = vrot.slane %v484_v59, 4  ;;  %v518_v10 = vrot.slane %v516_v61, 4  ;;  %v521_v11 = vrot.slane %v519_v62, 5  ;;  %v364_v49 = vld [vmem:[%s4726_s7 + $0x50] sm:$0x1] }
  0x29   : > { %v451_v8 = vrot.slane %v450_v1, 4  ;;  %v460_v12 = vor.u32 %v459_v60, %v455_v2  ;;  %v475_v13 = vrot.slane %v474_v0, 4  ;;  %v463_v17 = vshll.u32 %v352_v6, 16  ;;  %v366_v53 = vld [vmem:[%s4726_s7 + $0x58] sm:$0xf] }
  0x2a   : > { %v4768_v18 = vrot.slane %v501_v4, 5  ;;  %v507_v19 = vrot.slane %v505_v5, 4  ;;  %v490_v26 = vsel %vm4737_vm2, %v485_v9, %v489_v7  ;;  %v522_v27 = vor.u32 %v521_v11, %v518_v10  ;;  %v361_v58 = vld [vmem:[%s4726_s7 + $0x44] sm:$0x1]  ;;  %v372_v11 = vld [vmem:[%s4726_s7 + $0x70] sm:$0xf] }
  0x2b   : > { %785 = vrot.lane.b32.xlu1 %v442_v63, %s4632_s8  ;;  %v456_v14 = vsel %vm4737_vm2, %v451_v8, %v455_v2  ;;  %v461_v22 = vrot.slane %v460_v12, 4  ;;  %v465_v23 = vrot.slane %v463_v17, 5  ;;  %v525_v28 = vshll.u32 %v360_v15, 16  ;;  %v365_v2 = vld [vmem:[%s4726_s7 + $0x54] sm:$0xf] }
  0x2c   : > { %781 = vrot.lane.b32.xlu0 %v418_v3, %s4632_s8  ;;  %787 = vrot.lane.b32.xlu2 %v456_v14, %s4632_s8  ;;  %v511_v29 = vshll.u32 %v358_v16, 16  ;;  %v480_v30 = vsel %vm4737_vm2, %v475_v13, %v4750_v43  ;;  %v549_v31 = vshll.u32 %v363_v20, 16  ;;  %v553_v32 = vshrl.u32 %v363_v20, 16  ;;  %v369_v6 = vld [vmem:[%s4726_s7 + $0x64] sm:$0xf] }
  0x2d   : > { %v492_v33 = vshrl.u32 %v356_v21, 16  ;;  %v508_v34 = vor.u32 %v507_v19, %v4768_v18  ;;  %v540_v35 = vshrl.u32 %v362_v24, 16  ;;  %v543_v36 = vshll.u32 %v362_v24, 16  ;;  %v371_v20 = vld [vmem:[%s4726_s7 + $0x6c] sm:$0xf] }
  0x2e   : > { %v495_v37 = vshll.u32 %v356_v21, 16  ;;  %v529_v38 = vshrl.u32 %v360_v15, 16  ;;  %v466_v39 = vsel %vm4737_vm2, %v461_v22, %v465_v23  ;;  %v527_v41 = vrot.slane %v525_v28, 5  ;;  %v367_v15 = vld [vmem:[%s4726_s7 + $0x5c] sm:$0x1] }
  0x2f   : > { %v494_v40 = vrot.slane %v492_v33, 4  ;;  %v523_v43 = vrot.slane %v522_v27, 4  ;;  %v513_v44 = vrot.slane %v511_v29, 5  ;;  %v4783_v45 = vrot.slane %v549_v31, 5 }
  0x30   : > { %v497_v42 = vrot.slane %v495_v37, 5  ;;  %v555_v46 = vrot.slane %v553_v32, 4  ;;  %v509_v48 = vrot.slane %v508_v34, 4  ;;  %v542_v50 = vrot.slane %v540_v35, 4 }
  0x31   : > { %v545_v51 = vrot.slane %v543_v36, 5  ;;  %v531_v54 = vrot.slane %v529_v38, 4  ;;  %v588_v56 = vshrl.u32 %v368_v47, 16  ;;  %v591_v57 = vshll.u32 %v368_v47, 16  ;;  %v375_v47 = vld [vmem:[%s4726_s7 + $0x7c] sm:$0xf] }
  0x32   : > { %v498_v52 = vor.u32 %v497_v42, %v494_v40  ;;  %v528_v59 = vsel %vm4737_vm2, %v523_v43, %v527_v41  ;;  %v556_v60 = vor.u32 %v555_v46, %v4783_v45  ;;  %v559_v61 = vshll.u32 %v364_v49, 16  ;;  %v377_v42 = vld [vmem:[%s4726_s7 + $0x84] sm:$0xf]  ;;  %v370_v49 = vld [vmem:[%s4726_s7 + $0x68] sm:$0x1] }
  0x33   : > { %793 = vrot.lane.b32.xlu1 %v490_v26, %s4632_s8  ;;  %v514_v62 = vsel %vm4737_vm2, %v509_v48, %v513_v44  ;;  %v546_v63 = vor.u32 %v545_v51, %v542_v50  ;;  %v573_v0 = vshll.u32 %v366_v53, 16  ;;  %v577_v1 = vshrl.u32 %v366_v53, 16 }
  0x34   : > { %791 = vrot.lane.b32.xlu0 %v480_v30, %s4632_s8  ;;  %789 = vrot.lane.b32.xlu2 %v466_v39, %s4632_s8  ;;  %v499_v55 = vrot.slane %v498_v52, 4  ;;  %v532_v4 = vor.u32 %v531_v54, %v527_v41  ;;  %v535_v5 = vshll.u32 %v361_v58, 16  ;;  %v590_v7 = vrot.slane %v588_v56, 4  ;;  %v373_v41 = vld [vmem:[%s4726_s7 + $0x74] sm:$0x1] }
  0x35   : > { %v593_v8 = vrot.slane %v591_v57, 5  ;;  %v557_v9 = vrot.slane %v556_v60, 4  ;;  %v561_v10 = vrot.slane %v559_v61, 5  ;;  %v564_v12 = vshrl.u32 %v365_v2, 16  ;;  %v374_v54 = vld [vmem:[%s4726_s7 + $0x78] sm:$0xf] }
  0x36   : > { %v504_v3 = vsel %vm4737_vm2, %v499_v55, %v4768_v18  ;;  %v567_v13 = vshll.u32 %v365_v2, 16  ;;  %v547_v14 = vrot.slane %v546_v63, 4  ;;  %v4805_v16 = vrot.slane %v573_v0, 5 }
  0x37   : > { %v579_v17 = vrot.slane %v577_v1, 4  ;;  %v533_v18 = vrot.slane %v532_v4, 4  ;;  %v537_v19 = vrot.slane %v535_v5, 5  ;;  %v566_v21 = vrot.slane %v564_v12, 4  ;;  %v378_v4 = vld [vmem:[%s4726_s7 + $0x88] sm:$0xf] }
  0x38   : > { %v569_v22 = vrot.slane %v567_v13, 5  ;;  %v594_v23 = vor.u32 %v593_v8, %v590_v7  ;;  %v597_v24 = vshll.u32 %v369_v6, 16  ;;  %v621_v26 = vshll.u32 %v372_v11, 16 }
  0x39   : > { %v625_v27 = vshrl.u32 %v372_v11, 16  ;;  %v562_v28 = vsel %vm4737_vm2, %v557_v9, %v561_v10  ;;  %v583_v29 = vshll.u32 %v367_v15, 16  ;;  %v552_v30 = vsel %vm4737_vm2, %v547_v14, %v4783_v45  ;;  %v381_v9 = vld [vmem:[%s4726_s7 + $0x94] sm:$0xf]  ;;  %v376_v11 = vld [vmem:[%s4726_s7 + $0x80] sm:$0x1] }
  0x3a   : > { %v580_v31 = vor.u32 %v579_v17, %v4805_v16  ;;  %v612_v32 = vshrl.u32 %v371_v20, 16  ;;  %v615_v33 = vshll.u32 %v371_v20, 16  ;;  %v601_v34 = vshrl.u32 %v369_v6, 16  ;;  %v380_v14 = vld [vmem:[%s4726_s7 + $0x90] sm:$0xf] }
  0x3b   : > { %799 = vrot.lane.b32.xlu1 %v528_v59, %s4632_s8  ;;  %v538_v35 = vsel %vm4737_vm2, %v533_v18, %v537_v19  ;;  %v570_v36 = vor.u32 %v569_v22, %v566_v21  ;;  %v595_v37 = vrot.slane %v594_v23, 4  ;;  %v599_v38 = vrot.slane %v597_v24, 5 }
  0x3c   : > { %797 = vrot.lane.b32.xlu0 %v514_v62, %s4632_s8  ;;  %795 = vrot.lane.b32.xlu2 %v504_v3, %s4632_s8  ;;  %v4817_v39 = vrot.slane %v621_v26, 5  ;;  %v627_v40 = vrot.slane %v625_v27, 4  ;;  %v581_v43 = vrot.slane %v580_v31, 4  ;;  %v585_v44 = vrot.slane %v583_v29, 5 }
  0x3d   : > { %v614_v45 = vrot.slane %v612_v32, 4  ;;  %v617_v46 = vrot.slane %v615_v33, 5  ;;  %v571_v48 = vrot.slane %v570_v36, 4  ;;  %v603_v50 = vrot.slane %v601_v34, 4 }
  0x3e   : > { %v600_v51 = vsel %vm4737_vm2, %v595_v37, %v599_v38  ;;  %v628_v52 = vor.u32 %v627_v40, %v4817_v39  ;;  %v631_v53 = vshll.u32 %v373_v41, 16  ;;  %v660_v55 = vshrl.u32 %v377_v42, 16  ;;  %v382_v37 = vld [vmem:[%s4726_s7 + $0x98] sm:$0x1]  ;;  %v386_v40 = vld [vmem:[%s4726_s7 + $0xa8] sm:$0xf] }
  0x3f   : > { %v663_v56 = vshll.u32 %v377_v42, 16  ;;  %v645_v57 = vshll.u32 %v375_v47, 16  ;;  %v649_v58 = vshrl.u32 %v375_v47, 16  ;;  %v586_v59 = vsel %vm4737_vm2, %v581_v43, %v585_v44  ;;  %v384_v42 = vld [vmem:[%s4726_s7 + $0xa0] sm:$0xf] }
  0x40   : > { %v618_v60 = vor.u32 %v617_v46, %v614_v45  ;;  %v607_v61 = vshll.u32 %v370_v49, 16  ;;  %v576_v62 = vsel %vm4737_vm2, %v571_v48, %v4805_v16  ;;  %v604_v63 = vor.u32 %v603_v50, %v599_v38  ;;  %v379_v43 = vld [vmem:[%s4726_s7 + $0x8c] sm:$0x1]  ;;  %v383_v47 = vld [vmem:[%s4726_s7 + $0x9c] sm:$0xf] }
  0x41   : > { %v636_v0 = vshrl.u32 %v374_v54, 16  ;;  %v639_v1 = vshll.u32 %v374_v54, 16  ;;  %v629_v2 = vrot.slane %v628_v52, 4  ;;  %v633_v3 = vrot.slane %v631_v53, 5 }
  0x42   : > { %v662_v5 = vrot.slane %v660_v55, 4  ;;  %v665_v6 = vrot.slane %v663_v56, 5  ;;  %v4837_v7 = vrot.slane %v645_v57, 5  ;;  %v651_v8 = vrot.slane %v649_v58, 4 }
  0x43   : > { %805 = vrot.lane.b32.xlu1 %v562_v28, %s4632_s8  ;;  %v619_v10 = vrot.slane %v618_v60, 4  ;;  %v605_v12 = vrot.slane %v604_v63, 4  ;;  %v609_v13 = vrot.slane %v607_v61, 5  ;;  %v638_v15 = vrot.slane %v636_v0, 4 }
  0x44   : > { %803 = vrot.lane.b32.xlu0 %v552_v30, %s4632_s8  ;;  %801 = vrot.lane.b32.xlu2 %v538_v35, %s4632_s8  ;;  %v641_v16 = vrot.slane %v639_v1, 5  ;;  %v669_v17 = vshll.u32 %v378_v4, 16  ;;  %v693_v18 = vshll.u32 %v381_v9, 16  ;;  %v697_v19 = vshrl.u32 %v381_v9, 16  ;;  %v385_v1 = vld [vmem:[%s4726_s7 + $0xa4] sm:$0x1] }
  0x45   : > { %v634_v20 = vsel %vm4737_vm2, %v629_v2, %v633_v3  ;;  %v666_v21 = vor.u32 %v665_v6, %v662_v5  ;;  %v652_v22 = vor.u32 %v651_v8, %v4837_v7  ;;  %v655_v23 = vshll.u32 %v376_v11, 16  ;;  %v390_v5 = vld [vmem:[%s4726_s7 + $0xb8] sm:$0xf]  ;;  %v389_v8 = vld [vmem:[%s4726_s7 + $0xb4] sm:$0xf] }
  0x46   : > { %v624_v24 = vsel %vm4737_vm2, %v619_v10, %v4817_v39  ;;  %v684_v26 = vshrl.u32 %v380_v14, 16  ;;  %v687_v27 = vshll.u32 %v380_v14, 16  ;;  %v673_v28 = vshrl.u32 %v378_v4, 16 }
  0x47   : > { %v610_v29 = vsel %vm4737_vm2, %v605_v12, %v609_v13  ;;  %v642_v30 = vor.u32 %v641_v16, %v638_v15  ;;  %v4852_v31 = vrot.slane %v693_v18, 5  ;;  %v699_v32 = vrot.slane %v697_v19, 4 }
  0x48   : > { %v667_v33 = vrot.slane %v666_v21, 4  ;;  %v671_v34 = vrot.slane %v669_v17, 5  ;;  %v653_v35 = vrot.slane %v652_v22, 4  ;;  %v657_v36 = vrot.slane %v655_v23, 5 }
  0x49   : > { %v686_v38 = vrot.slane %v684_v26, 4  ;;  %v689_v39 = vrot.slane %v687_v27, 5  ;;  %v643_v41 = vrot.slane %v642_v30, 4  ;;  %v675_v44 = vrot.slane %v673_v28, 4 }
  0x4a   : > { %v700_v45 = vor.u32 %v699_v32, %v4852_v31  ;;  %v703_v46 = vshll.u32 %v382_v37, 16  ;;  %v672_v48 = vsel %vm4737_vm2, %v667_v33, %v671_v34  ;;  %v658_v49 = vsel %vm4737_vm2, %v653_v35, %v657_v36  ;;  %v388_v36 = vld [vmem:[%s4726_s7 + $0xb0] sm:$0x1] }
  0x4b   : > { %811 = vrot.lane.b32.xlu1 %v600_v51, %s4632_s8  ;;  %v732_v50 = vshrl.u32 %v386_v40, 16  ;;  %v735_v51 = vshll.u32 %v386_v40, 16  ;;  %v690_v52 = vor.u32 %v689_v39, %v686_v38  ;;  %v717_v53 = vshll.u32 %v384_v42, 16 }
  0x4c   : > { %809 = vrot.lane.b32.xlu0 %v586_v59, %s4632_s8  ;;  %807 = vrot.lane.b32.xlu2 %v576_v62, %s4632_s8  ;;  %v721_v54 = vshrl.u32 %v384_v42, 16  ;;  %v679_v55 = vshll.u32 %v379_v43, 16  ;;  %v648_v56 = vsel %vm4737_vm2, %v643_v41, %v4837_v7  ;;  %v676_v57 = vor.u32 %v675_v44, %v671_v34  ;;  %v387_v62 = vld [vmem:[%s4726_s7 + $0xac] sm:$0xf] }
  0x4d   : > { %v708_v58 = vshrl.u32 %v383_v47, 16  ;;  %v711_v59 = vshll.u32 %v383_v47, 16  ;;  %v701_v60 = vrot.slane %v700_v45, 4  ;;  %v705_v61 = vrot.slane %v703_v46, 5 }
  0x4e   : > { %v734_v63 = vrot.slane %v732_v50, 4  ;;  %v737_v0 = vrot.slane %v735_v51, 5  ;;  %v691_v2 = vrot.slane %v690_v52, 4  ;;  %v719_v3 = vrot.slane %v717_v53, 5  ;;  %v911_v51 = vld [vmem:[%s4726_s7 + $0xc] sm:$0xe] }
  0x4f   : > { %v723_v4 = vrot.slane %v721_v54, 4  ;;  %v677_v6 = vrot.slane %v676_v57, 4  ;;  %v681_v7 = vrot.slane %v679_v55, 5  ;;  %v710_v9 = vrot.slane %v708_v58, 4  ;;  %v912_v53 = vld [vmem:[%s4726_s7 + $0x10] sm:$0xf] }
  0x50   : > { %v713_v10 = vrot.slane %v711_v59, 5  ;;  %v706_v11 = vsel %vm4737_vm2, %v701_v60, %v705_v61  ;;  %v741_v12 = vshll.u32 %v387_v62, 16  ;;  %v738_v13 = vor.u32 %v737_v0, %v734_v63  ;;  %v910_v54 = vld [vmem:[%s4726_s7 + $0x8] sm:$0x1]  ;;  %v908_v61 = vld [vmem:[%s4726_s7] sm:$0xe] }
  0x51   : > { %v727_v14 = vshll.u32 %v385_v1, 16  ;;  %v765_v15 = vshll.u32 %v390_v5, 16  ;;  %v769_v16 = vshrl.u32 %v390_v5, 16  ;;  %v696_v17 = vsel %vm4737_vm2, %v691_v2, %v4852_v31  ;;  %v391_v31 = vld [vmem:[%s4726_s7 + $0xbc] sm:$0x1] }
  0x52   : > { %v724_v18 = vor.u32 %v723_v4, %v719_v3  ;;  %v756_v19 = vshrl.u32 %v389_v8, 16  ;;  %v745_v21 = vshrl.u32 %v387_v62, 16  ;;  %v682_v22 = vsel %vm4737_vm2, %v677_v6, %v681_v7  ;;  %v915_v63 = vld [vmem:[%s4726_s7 + $0x1c] sm:$0xf]  ;;  %v283_v0 = vld [vmem:[%s4726_s7 + $0x18] sm:$0xf] }
  0x53   : > { %817 = vrot.lane.b32.xlu1 %v634_v20, %s4632_s8  ;;  %v759_v20 = vshll.u32 %v389_v8, 16  ;;  %v714_v23 = vor.u32 %v713_v10, %v710_v9  ;;  %v743_v26 = vrot.slane %v741_v12, 5  ;;  %v767_v27 = vrot.slane %v765_v15, 5  ;;  %316 = vst.msk [vmem:[#allocation2 + $0x10] sm:$0xf] %vm311_vm5, %v283_v0 }
  0x54   : > { %815 = vrot.lane.b32.xlu0 %v624_v24, %s4632_s8  ;;  %813 = vrot.lane.b32.xlu2 %v610_v29, %s4632_s8  ;;  %v739_v24 = vrot.slane %v738_v13, 4  ;;  %v771_v28 = vrot.slane %v769_v16, 4  ;;  %v725_v29 = vrot.slane %v724_v18, 4  ;;  %v729_v30 = vrot.slane %v727_v14, 5  ;;  %v281_v2 = vld [vmem:[%s4726_s7 + $0xc] sm:$0xf] }
  0x55   : > { %v758_v32 = vrot.slane %v756_v19, 4  ;;  %v761_v33 = vrot.slane %v759_v20, 5  ;;  %v715_v34 = vrot.slane %v714_v23, 4  ;;  %v747_v35 = vrot.slane %v745_v21, 4  ;;  %314 = vst.msk [vmem:[#allocation2 + $0x8] sm:$0xf] %vm311_vm5, %v281_v2 }
  0x56   : > { %v744_v37 = vsel %vm4737_vm2, %v739_v24, %v743_v26  ;;  %v772_v38 = vor.u32 %v771_v28, %v767_v27  ;;  %v775_v39 = vshll.u32 %v391_v31, 16  ;;  %v730_v40 = vsel %vm4737_vm2, %v725_v29, %v729_v30  ;;  %v916_v6 = vld [vmem:[%s4726_s7 + $0x20] sm:$0x1]  ;;  %v914_v9 = vld [vmem:[%s4726_s7 + $0x18] sm:$0xe] }
  0x57   : > { %v762_v41 = vor.u32 %v761_v33, %v758_v32  ;;  %v720_v42 = vsel %vm4737_vm2, %v715_v34, %v719_v3  ;;  %v748_v43 = vor.u32 %v747_v35, %v743_v26  ;;  %v751_v44 = vshll.u32 %v388_v36, 16  ;;  %v279_v3 = vld [vmem:[%s4726_s7] sm:$0xf]  ;;  %v913_v12 = vld [vmem:[%s4726_s7 + $0x14] sm:$0x1] }
  0x58   : > { %v773_v45 = vrot.slane %v772_v38, 4  ;;  %v777_v46 = vrot.slane %v775_v39, 5  ;;  %v4061_v58 = vrot.slane %v911_v51, 9  ;;  %v1016_v59 = vrot.slane %v912_v53, 5  ;;  %312 = vst.msk [vmem:[#allocation2] sm:$0xf] %vm311_vm5, %v279_v3 }
  0x59   : > { %v763_v47 = vrot.slane %v762_v41, 4  ;;  %v753_v50 = vrot.slane %v751_v44, 5  ;;  %v1012_v60 = vrot.slane %v910_v54, 5  ;;  %v4060_v4 = vrot.slane %v908_v61, 9  ;;  %v918_v15 = vld [vmem:[%s4726_s7 + $0x28] sm:$0xf] }
  0x5a   : > { %v778_v52 = vsel %vm4737_vm2, %v773_v45, %v777_v46  ;;  %v1017_v5 = vsel %vm4912_vm6, %v4061_v58, %v1016_v59  ;;  %v1023_v7 = vrot.slane %v915_v63, 5  ;;  %v4062_v14 = vrot.slane %v914_v9, 9  ;;  %v284_v16 = vld [vmem:[%s4726_s7 + $0x1c] sm:$0xf]  ;;  %v280_v18 = vld [vmem:[%s4726_s7 + $0x4] sm:$0xf] }
  0x5b   : > { %823 = vrot.lane.b32.xlu1 %v672_v48, %s4632_s8  ;;  %v909_v48 = vld [vmem:[%s4726_s7 + $0x4] sm:$0xf]  ;;  %317 = vst.msk [vmem:[#allocation2 + $0x14] sm:$0xf] %vm311_vm5, %v284_v16  ;;  %v1018_v19 = vrot.slane %v1016_v59, 4  ;;  %v1019_v20 = vrot.slane %v913_v12, 5 }
  0x5c   : > { %821 = vrot.lane.b32.xlu0 %v658_v49, %s4632_s8  ;;  %819 = vrot.lane.b32.xlu2 %v648_v56, %s4632_s8  ;;  %v749_v49 = vrot.slane %v748_v43, 4  ;;  %v1009_v55 = vrot.slane %v909_v48, 5  ;;  %v768_v56 = vsel %vm4737_vm2, %v763_v47, %v767_v27  ;;  %v1025_v13 = vrot.slane %v1023_v7, 4  ;;  %313 = vst.msk [vmem:[#allocation2 + $0x4] sm:$0xf] %vm311_vm5, %v280_v18 }
  0x5d   : > { %v921_v23 = vld [vmem:[%s4726_s7 + $0x34] sm:$0xf]  ;;  %v1030_v24 = vrot.slane %v918_v15, 5  ;;  %v1024_v26 = vsel %vm4912_vm6, %v4062_v14, %v1023_v7  ;;  %v919_v27 = vld [vmem:[%s4726_s7 + $0x2c] sm:$0x1]  ;;  %v1020_v28 = vsel %vm4912_vm6, %v1018_v19, %v1019_v20 }
  0x5e   : > { %v754_v57 = vsel %vm4737_vm2, %v749_v49, %v753_v50  ;;  %v1011_v62 = vrot.slane %v1009_v55, 4  ;;  %v1010_v10 = vsel %vm4912_vm6, %v4060_v4, %v1009_v55  ;;  %v1037_v30 = vrot.slane %v921_v23, 5  ;;  %v917_v31 = vld [vmem:[%s4726_s7 + $0x24] sm:$0xe]  ;;  %v924_v34 = vld [vmem:[%s4726_s7 + $0x40] sm:$0xf] }
  0x5f   : > { %v1032_v32 = vrot.slane %v1030_v24, 4  ;;  %v1033_v33 = vrot.slane %v919_v27, 5  ;;  %v287_v35 = vld [vmem:[%s4726_s7 + $0x30] sm:$0xf]  ;;  %v286_v36 = vld [vmem:[%s4726_s7 + $0x28] sm:$0xf] }
  0x60   : > { %v1013_v8 = vsel %vm4912_vm6, %v1011_v62, %v1012_v60  ;;  %320 = vst.msk [vmem:[#allocation2 + $0x20] sm:$0xf] %vm311_vm5, %v287_v35  ;;  %v4063_v38 = vrot.slane %v917_v31, 9  ;;  %v1044_v41 = vrot.slane %v924_v34, 5  ;;  %v925_v43 = vld [vmem:[%s4726_s7 + $0x44] sm:$0x1] }
  0x61   : > { %319 = vst.msk [vmem:[#allocation2 + $0x1c] sm:$0xf] %vm311_vm5, %v286_v36  ;;  %v923_v44 = vld [vmem:[%s4726_s7 + $0x3c] sm:$0xe]  ;;  %v922_v46 = vld [vmem:[%s4726_s7 + $0x38] sm:$0x1] }
  0x62   : > { %v1031_v45 = vsel %vm4912_vm6, %v4063_v38, %v1030_v24  ;;  %v1046_v47 = vrot.slane %v1044_v41, 4  ;;  %v1047_v48 = vrot.slane %v925_v43, 5  ;;  %v4065_v49 = vrot.slane %v923_v44, 9  ;;  %v290_v50 = vld [vmem:[%s4726_s7 + $0x40] sm:$0xf] }
  0x63   : > { %829 = vrot.lane.b32.xlu1 %v706_v11, %s4632_s8  ;;  %v1026_v11 = vrot.slane %v916_v6, 5  ;;  %323 = vst.msk [vmem:[#allocation2 + $0x2c] sm:$0xf] %vm311_vm5, %v290_v50  ;;  %v289_v51 = vld [vmem:[%s4726_s7 + $0x3c] sm:$0xf]  ;;  %v1039_v54 = vrot.slane %v1037_v30, 4 }
  0x64   : > { %827 = vrot.lane.b32.xlu0 %v696_v17, %s4632_s8  ;;  %825 = vrot.lane.b32.xlu2 %v682_v22, %s4632_s8  ;;  %v282_v17 = vld [vmem:[%s4726_s7 + $0x10] sm:$0xf]  ;;  %v927_v53 = vld [vmem:[%s4726_s7 + $0x4c] sm:$0xf]  ;;  %v1040_v55 = vrot.slane %v922_v46, 5  ;;  %v1045_v58 = vsel %vm4912_vm6, %v4065_v49, %v1044_v41 }
  0x65   : > { %315 = vst.msk [vmem:[#allocation2 + $0xc] sm:$0xf] %vm311_vm5, %v282_v17  ;;  %v1027_v21 = vsel %vm4912_vm6, %v1025_v13, %v1026_v11  ;;  %v920_v22 = vld [vmem:[%s4726_s7 + $0x30] sm:$0xe]  ;;  %v929_v59 = vld [vmem:[%s4726_s7 + $0x54] sm:$0xe] }
  0x66   : > { %v4064_v29 = vrot.slane %v920_v22, 9  ;;  %322 = vst.msk [vmem:[#allocation2 + $0x28] sm:$0xf] %vm311_vm5, %v289_v51  ;;  %v930_v60 = vld [vmem:[%s4726_s7 + $0x58] sm:$0xf]  ;;  %v1051_v61 = vrot.slane %v927_v53, 5  ;;  %v1041_v63 = vsel %vm4912_vm6, %v1039_v54, %v1040_v55 }
  0x67   : > { %v928_v62 = vld [vmem:[%s4726_s7 + $0x50] sm:$0x1]  ;;  %v926_v0 = vld [vmem:[%s4726_s7 + $0x48] sm:$0xe]  ;;  %v4067_v2 = vrot.slane %v929_v59, 9  ;;  %v1058_v3 = vrot.slane %v930_v60, 5 }
  0x68   : > { %v293_v4 = vld [vmem:[%s4726_s7 + $0x54] sm:$0xf]  ;;  %v1053_v6 = vrot.slane %v1051_v61, 4  ;;  %v1054_v7 = vrot.slane %v928_v62, 5  ;;  %v292_v11 = vld [vmem:[%s4726_s7 + $0x4c] sm:$0xf] }
  0x69   : > { %326 = vst.msk [vmem:[#allocation2 + $0x38] sm:$0xf] %vm311_vm5, %v293_v4  ;;  %v291_v13 = vld [vmem:[%s4726_s7 + $0x48] sm:$0xf]  ;;  %v1059_v14 = vsel %vm4912_vm6, %v4067_v2, %v1058_v3  ;;  %v932_v18 = vld [vmem:[%s4726_s7 + $0x60] sm:$0xe] }
  0x6a   : > { %v1055_v16 = vsel %vm4912_vm6, %v1053_v6, %v1054_v7  ;;  %v934_v17 = vld [vmem:[%s4726_s7 + $0x68] sm:$0x1]  ;;  %325 = vst.msk [vmem:[#allocation2 + $0x34] sm:$0xf] %vm311_vm5, %v292_v11  ;;  %v931_v20 = vld [vmem:[%s4726_s7 + $0x5c] sm:$0x1] }
  0x6b   : > { %835 = vrot.lane.b32.xlu1 %v744_v37, %s4632_s8  ;;  %v285_v37 = vld [vmem:[%s4726_s7 + $0x24] sm:$0xf]  ;;  %324 = vst.msk [vmem:[#allocation2 + $0x30] sm:$0xf] %vm311_vm5, %v291_v13  ;;  %v1068_v22 = vrot.slane %v934_v17, 5 }
  0x6c   : > { %833 = vrot.lane.b32.xlu0 %v730_v40, %s4632_s8  ;;  %831 = vrot.lane.b32.xlu2 %v720_v42, %s4632_s8  ;;  %318 = vst.msk [vmem:[#allocation2 + $0x18] sm:$0xf] %vm311_vm5, %v285_v37  ;;  %v1038_v40 = vsel %vm4912_vm6, %v4064_v29, %v1037_v30  ;;  %v1034_v42 = vsel %vm4912_vm6, %v1032_v32, %v1033_v33  ;;  %v296_v23 = vld [vmem:[%s4726_s7 + $0x64] sm:$0xf]  ;;  %v936_v27 = vld [vmem:[%s4726_s7 + $0x70] sm:$0xf] }
  0x6d   : > { %329 = vst.msk [vmem:[#allocation2 + $0x44] sm:$0xf] %vm311_vm5, %v296_v23  ;;  %v1060_v29 = vrot.slane %v1058_v3, 4  ;;  %v1061_v30 = vrot.slane %v931_v20, 5  ;;  %v295_v31 = vld [vmem:[%s4726_s7 + $0x60] sm:$0xf] }
  0x6e   : > { %v294_v33 = vld [vmem:[%s4726_s7 + $0x58] sm:$0xf]  ;;  %v939_v37 = vld [vmem:[%s4726_s7 + $0x7c] sm:$0xf]  ;;  %v1072_v38 = vrot.slane %v936_v27, 5 }
  0x6f   : > { %v938_v35 = vld [vmem:[%s4726_s7 + $0x78] sm:$0xe]  ;;  %328 = vst.msk [vmem:[#allocation2 + $0x40] sm:$0xf] %vm311_vm5, %v295_v31  ;;  %v935_v41 = vld [vmem:[%s4726_s7 + $0x6c] sm:$0xe] }
  0x70   : > { %327 = vst.msk [vmem:[#allocation2 + $0x3c] sm:$0xf] %vm311_vm5, %v294_v33  ;;  %v1079_v43 = vrot.slane %v939_v37, 5  ;;  %v299_v44 = vld [vmem:[%s4726_s7 + $0x78] sm:$0xf]  ;;  %v1074_v46 = vrot.slane %v1072_v38, 4 }
  0x71   : > { %332 = vst.msk [vmem:[#allocation2 + $0x50] sm:$0xf] %vm311_vm5, %v299_v44  ;;  %v4069_v50 = vrot.slane %v935_v41, 9  ;;  %v298_v51 = vld [vmem:[%s4726_s7 + $0x70] sm:$0xf] }
  0x72   : > { %v297_v53 = vld [vmem:[%s4726_s7 + $0x6c] sm:$0xf]  ;;  %331 = vst.msk [vmem:[#allocation2 + $0x4c] sm:$0xf] %vm311_vm5, %v298_v51  ;;  %v940_v60 = vld [vmem:[%s4726_s7 + $0x80] sm:$0x1] }
  0x73   : > { %841 = vrot.lane.b32.xlu1 %v778_v52, %s4632_s8  ;;  %v288_v52 = vld [vmem:[%s4726_s7 + $0x34] sm:$0xf]  ;;  %v1073_v59 = vsel %vm4912_vm6, %v4069_v50, %v1072_v38  ;;  %330 = vst.msk [vmem:[#allocation2 + $0x48] sm:$0xf] %vm311_vm5, %v297_v53  ;;  %v1082_v6 = vrot.slane %v940_v60, 5 }
  0x74   : > { %839 = vrot.lane.b32.xlu0 %v768_v56, %s4632_s8  ;;  %837 = vrot.lane.b32.xlu2 %v754_v57, %s4632_s8  ;;  %321 = vst.msk [vmem:[#allocation2 + $0x24] sm:$0xf] %vm311_vm5, %v288_v52  ;;  %v1048_v57 = vsel %vm4912_vm6, %v1046_v47, %v1047_v48  ;;  %v942_v48 = vld [vmem:[%s4726_s7 + $0x88] sm:$0xf]  ;;  %v945_v3 = vld [vmem:[%s4726_s7 + $0x94] sm:$0xf] }
  0x75   : > { %v1086_v55 = vrot.slane %v942_v48, 5  ;;  %v301_v7 = vld [vmem:[%s4726_s7 + $0x84] sm:$0xf]  ;;  %v947_v11 = vld [vmem:[%s4726_s7 + $0x9c] sm:$0xe]  ;;  %s256_s8 = sand.u32 1, %s4614_s16  }
  0x76   : > { %v948_v13 = vld [vmem:[%s4726_s7 + $0xa0] sm:$0xf]  ;;  %334 = vst.msk [vmem:[#allocation2 + $0x58] sm:$0xf] %vm311_vm5, %v301_v7  ;;  %v944_v17 = vld [vmem:[%s4726_s7 + $0x90] sm:$0xe] }
  0x77   : > { %v305_v20 = vld [vmem:[%s4726_s7 + $0x9c] sm:$0xf]  ;;  %v4072_v27 = vrot.slane %v944_v17, 9  ;;  %v949_v37 = vld [vmem:[%s4726_s7 + $0xa4] sm:$0x1]  ;;  %s3907_s29 = scalar_lea.sflag [#allocation4], %s256_s8 }
  0x78   : > { %338 = vst.msk [vmem:[#allocation2 + $0x68] sm:$0xf] %vm311_vm5, %v305_v20  ;;  %v955_v53 = vld [vmem:[%s4726_s7 + $0xbc] sm:$0x1] }
  0x79   : > { %v4079_v7 = vld [vmem:[%s4726_s7 + $0x1c] sm:$0xf] }
  0x7a   : > { %v4084_v20 = vld [vmem:[%s4726_s7 + $0x3c] sm:$0xf] }
  0x7b   : > { %1123 = vrot.lane.b32.xlu1 %v1017_v5, %s4633_s9 }
  0x7c   : > { %1121 = vrot.lane.b32.xlu0 %v1013_v8, %s4633_s9  ;;  %1119 = vrot.lane.b32.xlu2 %v1010_v10, %s4633_s9  ;;  %v933_v8 = vld [vmem:[%s4726_s7 + $0x64] sm:$0xf]  ;;  %v4066_v10 = vrot.slane %v926_v0, 9 }
  0x7d   : > { %v1065_v15 = vrot.slane %v933_v8, 5 }
  0x7e   : > { %v1052_v19 = vsel %vm4912_vm6, %v4066_v10, %v1051_v61  ;;  %v1088_v61 = vrot.slane %v1086_v55, 4 }
  0x83   : > { %1129 = vrot.lane.b32.xlu1 %v1027_v21, %s4633_s9  ;;  %v1067_v21 = vrot.slane %v1065_v15, 4 }
  0x84   : > { %1127 = vrot.lane.b32.xlu0 %v1024_v26, %s4633_s9  ;;  %1125 = vrot.lane.b32.xlu2 %v1020_v28, %s4633_s9  ;;  %v4068_v26 = vrot.slane %v932_v18, 9  ;;  %v4073_v18 = vrot.slane %v947_v11, 9 }
  0x85   : > { %v1069_v34 = vsel %vm4912_vm6, %v1067_v21, %v1068_v22 }
  0x86   : > { %v788_v39 = vpop.permute.xlu2 %787  ;;  %v1066_v36 = vsel %vm4912_vm6, %v4068_v26, %v1065_v15  ;;  %v946_v15 = vld [vmem:[%s4726_s7 + $0x98] sm:$0x1] }
  0x87   : > { %880 = vst.msk [vmem:[#allocation2 + $0x10] sm:$0xf] %vm875_vm7, %v788_v39  ;;  %v937_v39 = vld [vmem:[%s4726_s7 + $0x74] sm:$0x1]  ;;  %v1096_v23 = vrot.slane %v946_v15, 5 }
  0x88   : > { %v1075_v47 = vrot.slane %v937_v39, 5  ;;  %v4080_v15 = vld [vmem:[%s4726_s7 + $0x24] sm:$0xf] }
  0x8b   : > { %1135 = vrot.lane.b32.xlu1 %v1038_v40, %s4633_s9  ;;  %v1062_v40 = vsel %vm4912_vm6, %v1060_v29, %v1061_v30  ;;  %v303_v30 = vld [vmem:[%s4726_s7 + $0x90] sm:$0xf] }
  0x8c   : > { %1133 = vrot.lane.b32.xlu0 %v1034_v42, %s4633_s9  ;;  %1131 = vrot.lane.b32.xlu2 %v1031_v45, %s4633_s9  ;;  %v4070_v42 = vrot.slane %v938_v35, 9  ;;  %v950_v35 = vld [vmem:[%s4726_s7 + $0xa8] sm:$0xe]  ;;  %336 = vst.msk [vmem:[#allocation2 + $0x60] sm:$0xf] %vm311_vm5, %v303_v30 }
  0x8e   : > { %v790_v56 = vpop.permute.xlu2 %789  ;;  %v1080_v54 = vsel %vm4912_vm6, %v4070_v42, %v1079_v43  ;;  %v4074_v42 = vrot.slane %v950_v35, 9 }
  0x8f   : > { %881 = vst.msk [vmem:[#allocation2 + $0x14] sm:$0xf] %vm875_vm7, %v790_v56  ;;  %v1076_v56 = vsel %vm4912_vm6, %v1074_v46, %v1075_v47  ;;  %v1103_v46 = vrot.slane %v949_v37, 5  ;;  %v307_v47 = vld [vmem:[%s4726_s7 + $0xa8] sm:$0xf] }
  0x90   : > { %340 = vst.msk [vmem:[#allocation2 + $0x70] sm:$0xf] %vm311_vm5, %v307_v47 }
  0x93   : > { %1141 = vrot.lane.b32.xlu1 %v1048_v57, %s4633_s9  ;;  %v943_v57 = vld [vmem:[%s4726_s7 + $0x8c] sm:$0x1] }
  0x94   : > { %1139 = vrot.lane.b32.xlu0 %v1045_v58, %s4633_s9  ;;  %1137 = vrot.lane.b32.xlu2 %v1041_v63, %s4633_s9  ;;  %v941_v58 = vld [vmem:[%s4726_s7 + $0x84] sm:$0xe]  ;;  %v1089_v62 = vrot.slane %v943_v57, 5  ;;  %v302_v63 = vld [vmem:[%s4726_s7 + $0x88] sm:$0xf] }
  0x95   : > { %v784_v5 = vpop.permute.xlu1 %783  ;;  %v4071_v2 = vrot.slane %v941_v58, 9  ;;  %335 = vst.msk [vmem:[#allocation2 + $0x5c] sm:$0xf] %vm311_vm5, %v302_v63  ;;  %v1117_v58 = vrot.slane %v955_v53, 5  ;;  %v309_v63 = vld [vmem:[%s4726_s7 + $0xb4] sm:$0xf] }
  0x96   : > { %878 = vst.msk [vmem:[#allocation2 + $0x8] sm:$0xf] %vm875_vm7, %v784_v5  ;;  %v780_v9 = vpop.permute.xlu0 %779  ;;  %v796_v12 = vpop.permute.xlu2 %795  ;;  %v1081_v5 = vrot.slane %v1079_v43, 4  ;;  %v1090_v10 = vsel %vm4912_vm6, %v1088_v61, %v1089_v62  ;;  %v954_v43 = vld [vmem:[%s4726_s7 + $0xb8] sm:$0xf] }
  0x97   : > { %876 = vst.msk [vmem:[#allocation2] sm:$0xf] %vm875_vm7, %v780_v9  ;;  %v300_v9 = vld [vmem:[%s4726_s7 + $0x7c] sm:$0xf]  ;;  %v310_v61 = vld [vmem:[%s4726_s7 + $0xb8] sm:$0xf] }
  0x98   : > { %884 = vst.msk [vmem:[#allocation2 + $0x20] sm:$0xf] %vm875_vm7, %v796_v12  ;;  %v1087_v12 = vsel %vm4912_vm6, %v4071_v2, %v1086_v55  ;;  %v953_v55 = vld [vmem:[%s4726_s7 + $0xb4] sm:$0xe]  ;;  %v4109_v53 = vld [vmem:[%s4726_s7 + $0x10] sm:$0xf] }
  0x99   : > { %333 = vst.msk [vmem:[#allocation2 + $0x54] sm:$0xf] %vm311_vm5, %v300_v9  ;;  %v4075_v60 = vrot.slane %v953_v55, 9  ;;  %v4077_v9 = vld [vmem:[%s4726_s7 + $0x10] sm:$0xf] }
  0x9a   : > { %343 = vst.msk [vmem:[#allocation2 + $0x7c] sm:$0xf] %vm311_vm5, %v310_v61  ;;  %v4102_v61 = vld [vmem:[%s4726_s7 + $0xa8] sm:$0xf] }
  0x9b   : > { %1147 = vrot.lane.b32.xlu1 %v1059_v14, %s4633_s9  ;;  %v1093_v14 = vrot.slane %v945_v3, 5  ;;  %342 = vst.msk [vmem:[#allocation2 + $0x78] sm:$0xf] %vm311_vm5, %v309_v63 }
  0x9c   : > { %1145 = vrot.lane.b32.xlu0 %v1055_v16, %s4633_s9  ;;  %1143 = vrot.lane.b32.xlu2 %v1052_v19, %s4633_s9  ;;  %v1083_v16 = vsel %vm4912_vm6, %v1081_v5, %v1082_v6  ;;  %v1100_v19 = vrot.slane %v948_v13, 5  ;;  %v4082_v13 = vld [vmem:[%s4726_s7 + $0x30] sm:$0xf] }
  0x9d   : > { %v786_v24 = vpop.permute.xlu1 %785  ;;  %v1095_v22 = vrot.slane %v1093_v14, 4 }
  0x9e   : > { %879 = vst.msk [vmem:[#allocation2 + $0xc] sm:$0xf] %vm875_vm7, %v786_v24  ;;  %v782_v28 = vpop.permute.xlu0 %781  ;;  %v802_v32 = vpop.permute.xlu2 %801  ;;  %v951_v24 = vld [vmem:[%s4726_s7 + $0xac] sm:$0xf]  ;;  %v1101_v31 = vsel %vm4912_vm6, %v4073_v18, %v1100_v19 }
  0x9f   : > { %877 = vst.msk [vmem:[#allocation2 + $0x4] sm:$0xf] %vm875_vm7, %v782_v28  ;;  %v304_v28 = vld [vmem:[%s4726_s7 + $0x94] sm:$0xf]  ;;  %v1097_v33 = vsel %vm4912_vm6, %v1095_v22, %v1096_v23 }
  0xa0   : > { %887 = vst.msk [vmem:[#allocation2 + $0x2c] sm:$0xf] %vm875_vm7, %v802_v32  ;;  %v1107_v32 = vrot.slane %v951_v24, 5 }
  0xa1   : > { %337 = vst.msk [vmem:[#allocation2 + $0x64] sm:$0xf] %vm311_vm5, %v304_v28  ;;  %v4086_v28 = vld [vmem:[%s4726_s7 + $0x48] sm:$0xf] }
  0xa2   : > { %v1109_v38 = vrot.slane %v1107_v32, 4  ;;  %v1108_v51 = vsel %vm4912_vm6, %v4074_v42, %v1107_v32  ;;  %v4091_v32 = vld [vmem:[%s4726_s7 + $0x64] sm:$0xf] }
  0xa3   : > { %1153 = vrot.lane.b32.xlu1 %v1069_v34, %s4633_s9  ;;  %v952_v34 = vld [vmem:[%s4726_s7 + $0xb0] sm:$0x1] }
  0xa4   : > { %1151 = vrot.lane.b32.xlu0 %v1066_v36, %s4633_s9  ;;  %1149 = vrot.lane.b32.xlu2 %v1062_v40, %s4633_s9  ;;  %v1094_v36 = vsel %vm4912_vm6, %v4072_v27, %v1093_v14  ;;  %v1110_v39 = vrot.slane %v952_v34, 5  ;;  %v308_v40 = vld [vmem:[%s4726_s7 + $0xac] sm:$0xf]  ;;  %v4081_v14 = vld [vmem:[%s4726_s7 + $0x28] sm:$0xf] }
  0xa5   : > { %v794_v45 = vpop.permute.xlu1 %793  ;;  %341 = vst.msk [vmem:[#allocation2 + $0x74] sm:$0xf] %vm311_vm5, %v308_v40  ;;  %v4087_v27 = vld [vmem:[%s4726_s7 + $0x4c] sm:$0xf]  ;;  %v4089_v34 = vld [vmem:[%s4726_s7 + $0x58] sm:$0xf] }
  0xa6   : > { %883 = vst.msk [vmem:[#allocation2 + $0x1c] sm:$0xf] %vm875_vm7, %v794_v45  ;;  %v792_v49 = vpop.permute.xlu0 %791  ;;  %v808_v52 = vpop.permute.xlu2 %807  ;;  %v1102_v45 = vrot.slane %v1100_v19, 4  ;;  %v1111_v50 = vsel %vm4912_vm6, %v1109_v38, %v1110_v39  ;;  %v4085_v19 = vld [vmem:[%s4726_s7 + $0x40] sm:$0xf] }
  0xa7   : > { %882 = vst.msk [vmem:[#allocation2 + $0x18] sm:$0xf] %vm875_vm7, %v792_v49  ;;  %v306_v49 = vld [vmem:[%s4726_s7 + $0xa0] sm:$0xf]  ;;  %v4094_v38 = vld [vmem:[%s4726_s7 + $0x78] sm:$0xf] }
  0xa8   : > { %890 = vst.msk [vmem:[#allocation2 + $0x38] sm:$0xf] %vm875_vm7, %v808_v52  ;;  %v1114_v52 = vrot.slane %v954_v43, 5  ;;  %v4093_v39 = vld [vmem:[%s4726_s7 + $0x70] sm:$0xf] }
  0xa9   : > { %339 = vst.msk [vmem:[#allocation2 + $0x6c] sm:$0xf] %vm311_vm5, %v306_v49  ;;  %v4092_v40 = vld [vmem:[%s4726_s7 + $0x6c] sm:$0xf] }
  0xaa   : > { %v1116_v57 = vrot.slane %v1114_v52, 4  ;;  %v1115_v3 = vsel %vm4912_vm6, %v4075_v60, %v1114_v52  ;;  %v4098_v52 = vld [vmem:[%s4726_s7 + $0x90] sm:$0xf]  ;;  %v4103_v60 = vld [vmem:[%s4726_s7 + $0xac] sm:$0xf] }
  0xab   : > { %1159 = vrot.lane.b32.xlu1 %v1080_v54, %s4633_s9  ;;  %v1104_v54 = vsel %vm4912_vm6, %v1102_v45, %v1103_v46  ;;  %v4096_v45 = vld [vmem:[%s4726_s7 + $0x84] sm:$0xf]  ;;  %v4095_v46 = vld [vmem:[%s4726_s7 + $0x7c] sm:$0xf] }
  0xac   : > { %1157 = vrot.lane.b32.xlu0 %v1076_v56, %s4633_s9  ;;  %1155 = vrot.lane.b32.xlu2 %v1073_v59, %s4633_s9  ;;  %v1118_v2 = vsel %vm4912_vm6, %v1116_v57, %v1117_v58  ;;  %v1500_v58 = vshll.u32 %v4109_v53, 16 }
  0xad   : > { %v800_v0 = vpop.permute.xlu1 %799 }
  0xae   : > { %886 = vst.msk [vmem:[#allocation2 + $0x28] sm:$0xf] %vm875_vm7, %v800_v0  ;;  %v798_v4 = vpop.permute.xlu0 %797  ;;  %v814_v8 = vpop.permute.xlu2 %813  ;;  %v4076_v0 = vld [vmem:[%s4726_s7 + $0xc] sm:$0xf] }
  0xaf   : > { %885 = vst.msk [vmem:[#allocation2 + $0x24] sm:$0xf] %vm875_vm7, %v798_v4 }
  0xb0   : > { %893 = vst.msk [vmem:[#allocation2 + $0x44] sm:$0xf] %vm875_vm7, %v814_v8  ;;  %v4078_v8 = vld [vmem:[%s4726_s7 + $0x18] sm:$0xf] }
  0xb3   : > { %1165 = vrot.lane.b32.xlu1 %v1090_v10, %s4633_s9 }
  0xb4   : > { %1163 = vrot.lane.b32.xlu0 %v1087_v12, %s4633_s9  ;;  %1161 = vrot.lane.b32.xlu2 %v1083_v16, %s4633_s9 }
  0xb5   : > { %v806_v21 = vpop.permute.xlu1 %805 }
  0xb6   : > { %889 = vst.msk [vmem:[#allocation2 + $0x34] sm:$0xf] %vm875_vm7, %v806_v21  ;;  %v804_v26 = vpop.permute.xlu0 %803  ;;  %v820_v29 = vpop.permute.xlu2 %819  ;;  %v4083_v21 = vld [vmem:[%s4726_s7 + $0x34] sm:$0xf] }
  0xb7   : > { %888 = vst.msk [vmem:[#allocation2 + $0x30] sm:$0xf] %vm875_vm7, %v804_v26  ;;  %v4088_v26 = vld [vmem:[%s4726_s7 + $0x54] sm:$0xf] }
  0xb8   : > { %896 = vst.msk [vmem:[#allocation2 + $0x50] sm:$0xf] %vm875_vm7, %v820_v29 }
  0xbb   : > { %1171 = vrot.lane.b32.xlu1 %v1101_v31, %s4633_s9 }
  0xbc   : > { %1169 = vrot.lane.b32.xlu0 %v1097_v33, %s4633_s9  ;;  %1167 = vrot.lane.b32.xlu2 %v1094_v36, %s4633_s9  ;;  %v4090_v33 = vld [vmem:[%s4726_s7 + $0x60] sm:$0xf] }
  0xbd   : > { %v812_v41 = vpop.permute.xlu1 %811 }
  0xbe   : > { %892 = vst.msk [vmem:[#allocation2 + $0x40] sm:$0xf] %vm875_vm7, %v812_v41  ;;  %v810_v44 = vpop.permute.xlu0 %809  ;;  %v826_v48 = vpop.permute.xlu2 %825 }
  0xbf   : > { %891 = vst.msk [vmem:[#allocation2 + $0x3c] sm:$0xf] %vm875_vm7, %v810_v44  ;;  %v4097_v44 = vld [vmem:[%s4726_s7 + $0x88] sm:$0xf] }
  0xc0   : > { %899 = vst.msk [vmem:[#allocation2 + $0x5c] sm:$0xf] %vm875_vm7, %v826_v48 }
  0xc3   : > { %1177 = vrot.lane.b32.xlu1 %v1111_v50, %s4633_s9  ;;  %v4100_v50 = vld [vmem:[%s4726_s7 + $0x9c] sm:$0xf] }
  0xc4   : > { %1175 = vrot.lane.b32.xlu0 %v1108_v51, %s4633_s9  ;;  %1173 = vrot.lane.b32.xlu2 %v1104_v54, %s4633_s9  ;;  %v4099_v51 = vld [vmem:[%s4726_s7 + $0x94] sm:$0xf] }
  0xc5   : > { %v818_v56 = vpop.permute.xlu1 %817 }
  0xc6   : > { %895 = vst.msk [vmem:[#allocation2 + $0x4c] sm:$0xf] %vm875_vm7, %v818_v56  ;;  %v816_v59 = vpop.permute.xlu0 %815  ;;  %v832_v62 = vpop.permute.xlu2 %831  ;;  %v4108_v56 = vld [vmem:[%s4726_s7 + $0xc] sm:$0xf] }
  0xc7   : > { %894 = vst.msk [vmem:[#allocation2 + $0x48] sm:$0xf] %vm875_vm7, %v816_v59  ;;  %v1504_v59 = vshrl.u32 %v4109_v53, 16  ;;  %v1494_v63 = vshll.u32 %v4108_v56, 16  ;;  %v4107_v53 = vld [vmem:[%s4726_s7 + $0xc4] sm:$0xf] }
  0xc8   : > { %902 = vst.msk [vmem:[#allocation2 + $0x68] sm:$0xf] %vm875_vm7, %v832_v62  ;;  %v1491_v62 = vshrl.u32 %v4108_v56, 16 }
  0xcb   : > { %1313 = vrot.lane.b32.xlu1 %v4076_v0, %s4634_s10  ;;  %v4101_v0 = vld [vmem:[%s4726_s7 + $0xa0] sm:$0xf] }
  0xcc   : > { %1181 = vrot.lane.b32.xlu0 %v1118_v2, %s4633_s9  ;;  %1179 = vrot.lane.b32.xlu2 %v1115_v3, %s4633_s9  ;;  %v5224_v2 = vrot.slane %v1500_v58, 5  ;;  %v1506_v3 = vrot.slane %v1504_v59, 4 }
  0xcd   : > { %v824_v4 = vpop.permute.xlu1 %823 }
  0xce   : > { %898 = vst.msk [vmem:[#allocation2 + $0x58] sm:$0xf] %vm875_vm7, %v824_v4  ;;  %v822_v5 = vpop.permute.xlu0 %821  ;;  %v838_v6 = vpop.permute.xlu2 %837  ;;  %v4110_v4 = vld [vmem:[%s4726_s7 + $0x14] sm:$0x1] }
  0xcf   : > { %897 = vst.msk [vmem:[#allocation2 + $0x54] sm:$0xf] %vm875_vm7, %v822_v5 }
  0xd0   : > { %905 = vst.msk [vmem:[#allocation2 + $0x74] sm:$0xf] %vm875_vm7, %v838_v6  ;;  %v1493_v6 = vrot.slane %v1491_v62, 4  ;;  %v4123_v62 = vld [vmem:[%s4726_s7 + $0x48] sm:$0xf] }
  0xd3   : > { %1319 = vrot.lane.b32.xlu1 %v4079_v7, %s4634_s10  ;;  %v1496_v7 = vrot.slane %v1494_v63, 5 }
  0xd4   : > { %1317 = vrot.lane.b32.xlu0 %v4078_v8, %s4634_s10  ;;  %1315 = vrot.lane.b32.xlu2 %v4077_v9, %s4634_s10  ;;  %v4114_v8 = vld [vmem:[%s4726_s7 + $0x24] sm:$0xf] }
  0xd5   : > { %v830_v10 = vpop.permute.xlu1 %829 }
  0xd6   : > { %901 = vst.msk [vmem:[#allocation2 + $0x64] sm:$0xf] %vm875_vm7, %v830_v10  ;;  %v828_v11 = vpop.permute.xlu0 %827  ;;  %v1120_v12 = vpop.permute.xlu2 %1119  ;;  %v4112_v10 = vld [vmem:[%s4726_s7 + $0x1c] sm:$0xf] }
  0xd7   : > { %900 = vst.msk [vmem:[#allocation2 + $0x60] sm:$0xf] %vm875_vm7, %v828_v11  ;;  %v1507_v11 = vor.u32 %v1506_v3, %v5224_v2  ;;  %v4121_v3 = vld [vmem:[%s4726_s7 + $0x40] sm:$0xf] }
  0xd8   : > { %1216 = vst.msk [vmem:[#allocation2] sm:$0xf] %vm1215_vm8, %v1120_v12  ;;  %v1510_v12 = vshll.u32 %v4110_v4, 16 }
  0xdb   : > { %1325 = vrot.lane.b32.xlu1 %v4082_v13, %s4634_s10 }
  0xdc   : > { %1323 = vrot.lane.b32.xlu0 %v4081_v14, %s4634_s10  ;;  %1321 = vrot.lane.b32.xlu2 %v4080_v15, %s4634_s10  ;;  %v4111_v14 = vld [vmem:[%s4726_s7 + $0x18] sm:$0xf]  ;;  %v4106_v15 = vld [vmem:[%s4726_s7 + $0xc0] sm:$0xf] }
  0xdd   : > { %v836_v16 = vpop.permute.xlu1 %835 }
  0xde   : > { %904 = vst.msk [vmem:[#allocation2 + $0x70] sm:$0xf] %vm875_vm7, %v836_v16  ;;  %v834_v17 = vpop.permute.xlu0 %833  ;;  %v1126_v18 = vpop.permute.xlu2 %1125  ;;  %v1539_v16 = vshrl.u32 %v4114_v8, 16 }
  0xdf   : > { %903 = vst.msk [vmem:[#allocation2 + $0x6c] sm:$0xf] %vm875_vm7, %v834_v17  ;;  %v1542_v17 = vshll.u32 %v4114_v8, 16 }
  0xe0   : > { %1219 = vst.msk [vmem:[#allocation2 + $0xc] sm:$0xf] %vm1215_vm8, %v1126_v18  ;;  %v4105_v18 = vld [vmem:[%s4726_s7 + $0xb8] sm:$0xf] }
  0xe3   : > { %1331 = vrot.lane.b32.xlu1 %v4085_v19, %s4634_s10  ;;  %v1497_v19 = vor.u32 %v1496_v7, %v1493_v6  ;;  %v4120_v7 = vld [vmem:[%s4726_s7 + $0x3c] sm:$0xf] }
  0xe4   : > { %1329 = vrot.lane.b32.xlu0 %v4084_v20, %s4634_s10  ;;  %1327 = vrot.lane.b32.xlu2 %v4083_v21, %s4634_s10  ;;  %v1524_v20 = vshll.u32 %v4112_v10, 16  ;;  %v1528_v21 = vshrl.u32 %v4112_v10, 16 }
  0xe5   : > { %v842_v22 = vpop.permute.xlu1 %841 }
  0xe6   : > { %907 = vst.msk [vmem:[#allocation2 + $0x7c] sm:$0xf] %vm875_vm7, %v842_v22  ;;  %v840_v23 = vpop.permute.xlu0 %839  ;;  %v1132_v24 = vpop.permute.xlu2 %1131  ;;  %v4104_v22 = vld [vmem:[%s4726_s7 + $0xb4] sm:$0xf] }
  0xe7   : > { %906 = vst.msk [vmem:[#allocation2 + $0x78] sm:$0xf] %vm875_vm7, %v840_v23  ;;  %v1515_v23 = vshrl.u32 %v4111_v14, 16 }
  0xe8   : > { %1222 = vst.msk [vmem:[#allocation2 + $0x18] sm:$0xf] %vm1215_vm8, %v1132_v24  ;;  %v1518_v24 = vshll.u32 %v4111_v14, 16 }
  0xeb   : > { %1337 = vrot.lane.b32.xlu1 %v4088_v26, %s4634_s10  ;;  %v1508_v26 = vrot.slane %v1507_v11, 4 }
  0xec   : > { %1335 = vrot.lane.b32.xlu0 %v4087_v27, %s4634_s10  ;;  %1333 = vrot.lane.b32.xlu2 %v4086_v28, %s4634_s10  ;;  %v1512_v27 = vrot.slane %v1510_v12, 5  ;;  %v1541_v28 = vrot.slane %v1539_v16, 4  ;;  %v1611_v12 = vshrl.u32 %v4123_v62, 16  ;;  %v1596_v16 = vshll.u32 %v4121_v3, 16 }
  0xed   : > { %v1124_v29 = vpop.permute.xlu1 %1123 }
  0xee   : > { %1218 = vst.msk [vmem:[#allocation2 + $0x8] sm:$0xf] %vm1215_vm8, %v1124_v29  ;;  %v1122_v30 = vpop.permute.xlu0 %1121  ;;  %v1138_v31 = vpop.permute.xlu2 %1137  ;;  %v1544_v29 = vrot.slane %v1542_v17, 5  ;;  %v1600_v17 = vshrl.u32 %v4121_v3, 16 }
  0xef   : > { %1217 = vst.msk [vmem:[#allocation2 + $0x4] sm:$0xf] %vm1215_vm8, %v1122_v30  ;;  %v4118_v30 = vld [vmem:[%s4726_s7 + $0x34] sm:$0xf] }
  0xf0   : > { %1225 = vst.msk [vmem:[#allocation2 + $0x24] sm:$0xf] %vm1215_vm8, %v1138_v31  ;;  %v4117_v31 = vld [vmem:[%s4726_s7 + $0x30] sm:$0xf] }
  0xf3   : > { %1343 = vrot.lane.b32.xlu1 %v4091_v32, %s4634_s10 }
  0xf4   : > { %1341 = vrot.lane.b32.xlu0 %v4090_v33, %s4634_s10  ;;  %1339 = vrot.lane.b32.xlu2 %v4089_v34, %s4634_s10  ;;  %v1498_v33 = vrot.slane %v1497_v19, 4  ;;  %v4115_v34 = vld [vmem:[%s4726_s7 + $0x28] sm:$0xf]  ;;  %v4127_v19 = vld [vmem:[%s4726_s7 + $0x58] sm:$0xf] }
  0xf5   : > { %v1130_v35 = vpop.permute.xlu1 %1129 }
  0xf6   : > { %1221 = vst.msk [vmem:[#allocation2 + $0x14] sm:$0xf] %vm1215_vm8, %v1130_v35  ;;  %v1128_v36 = vpop.permute.xlu0 %1127  ;;  %v1144_v37 = vpop.permute.xlu2 %1143  ;;  %v5245_v35 = vrot.slane %v1524_v20, 5  ;;  %v1587_v20 = vshrl.u32 %v4120_v7, 16 }
  0xf7   : > { %1220 = vst.msk [vmem:[#allocation2 + $0x10] sm:$0xf] %vm1215_vm8, %v1128_v36  ;;  %v1530_v36 = vrot.slane %v1528_v21, 4  ;;  %v1590_v21 = vshll.u32 %v4120_v7, 16  ;;  %v4130_v7 = vld [vmem:[%s4726_s7 + $0x64] sm:$0xf] }
  0xf8   : > { %1228 = vst.msk [vmem:[#allocation2 + $0x30] sm:$0xf] %vm1215_vm8, %v1144_v37 }
  0xfb   : > { %1349 = vrot.lane.b32.xlu1 %v4094_v38, %s4634_s10  ;;  %v4113_v38 = vld [vmem:[%s4726_s7 + $0x20] sm:$0x1] }
  0xfc   : > { %1347 = vrot.lane.b32.xlu0 %v4093_v39, %s4634_s10  ;;  %1345 = vrot.lane.b32.xlu2 %v4092_v40, %s4634_s10  ;;  %v1517_v39 = vrot.slane %v1515_v23, 4  ;;  %v1520_v40 = vrot.slane %v1518_v24, 5 }
  0xfd   : > { %v1136_v41 = vpop.permute.xlu1 %1135 }
  0xfe   : > { %1224 = vst.msk [vmem:[#allocation2 + $0x20] sm:$0xf] %vm1215_vm8, %v1136_v41  ;;  %v1134_v42 = vpop.permute.xlu0 %1133  ;;  %v1150_v43 = vpop.permute.xlu2 %1149 }
  0xff   : > { %1223 = vst.msk [vmem:[#allocation2 + $0x1c] sm:$0xf] %vm1215_vm8, %v1134_v42  ;;  %v1572_v42 = vshll.u32 %v4118_v30, 16 }
 0x100   : > { %1231 = vst.msk [vmem:[#allocation2 + $0x3c] sm:$0xf] %vm1215_vm8, %v1150_v43  ;;  %v1576_v43 = vshrl.u32 %v4118_v30, 16  ;;  %v1613_v30 = vrot.slane %v1611_v12, 4 }
 0x102   : > { %v1578_v56 = vrot.slane %v1576_v43, 4 }
 0x103   : > { %1355 = vrot.lane.b32.xlu1 %v4097_v44, %s4634_s10  ;;  %v1563_v44 = vshrl.u32 %v4117_v31, 16 }
 0x104   : > { %1353 = vrot.lane.b32.xlu0 %v4096_v45, %s4634_s10  ;;  %1351 = vrot.lane.b32.xlu2 %v4095_v46, %s4634_s10  ;;  %v1566_v45 = vshll.u32 %v4117_v31, 16  ;;  %v1513_v46 = vsel %vm4737_vm2, %v1508_v26, %v1512_v27 }
 0x105   : > { %v1142_v47 = vpop.permute.xlu1 %1141 }
 0x106   : > { %1227 = vst.msk [vmem:[#allocation2 + $0x2c] sm:$0xf] %vm1215_vm8, %v1142_v47  ;;  %v1140_v48 = vpop.permute.xlu0 %1139  ;;  %v1156_v49 = vpop.permute.xlu2 %1155  ;;  %v1545_v47 = vor.u32 %v1544_v29, %v1541_v28  ;;  %v1568_v58 = vrot.slane %v1566_v45, 5  ;;  %v4124_v29 = vld [vmem:[%s4726_s7 + $0x4c] sm:$0xf] }
 0x107   : > { %1226 = vst.msk [vmem:[#allocation2 + $0x28] sm:$0xf] %vm1215_vm8, %v1140_v48  ;;  %v1548_v48 = vshll.u32 %v4115_v34, 16 }
 0x108   : > { %1234 = vst.msk [vmem:[#allocation2 + $0x48] sm:$0xf] %vm1215_vm8, %v1156_v49  ;;  %v1503_v49 = vsel %vm4737_vm2, %v1498_v33, %v5224_v2  ;;  %v1546_v59 = vrot.slane %v1545_v47, 4  ;;  %v5284_v33 = vrot.slane %v1596_v16, 5 }
 0x10b   : > { %1361 = vrot.lane.b32.xlu1 %v4100_v50, %s4634_s10  ;;  %v1531_v50 = vor.u32 %v1530_v36, %v5245_v35  ;;  %v1644_v36 = vshll.u32 %v4127_v19, 16 }
 0x10c   : > { %1359 = vrot.lane.b32.xlu0 %v4099_v51, %s4634_s10  ;;  %1357 = vrot.lane.b32.xlu2 %v4098_v52, %s4634_s10  ;;  %v1534_v51 = vshll.u32 %v4113_v38, 16  ;;  %v1552_v52 = vshrl.u32 %v4115_v34, 16  ;;  %v1602_v34 = vrot.slane %v1600_v17, 4  ;;  %v4126_v38 = vld [vmem:[%s4726_s7 + $0x54] sm:$0xf]  ;;  %v1668_v17 = vshll.u32 %v4130_v7, 16 }
 0x10d   : > { %v1148_v54 = vpop.permute.xlu1 %1147 }
 0x10e   : > { %1230 = vst.msk [vmem:[#allocation2 + $0x38] sm:$0xf] %vm1215_vm8, %v1148_v54  ;;  %v1146_v55 = vpop.permute.xlu0 %1145  ;;  %v1162_v57 = vpop.permute.xlu2 %1161  ;;  %v1521_v54 = vor.u32 %v1520_v40, %v1517_v39  ;;  %v1536_v2 = vrot.slane %v1534_v51, 5  ;;  %v1554_v6 = vrot.slane %v1552_v52, 4  ;;  %v1589_v39 = vrot.slane %v1587_v20, 4 }
 0x10f   : > { %1229 = vst.msk [vmem:[#allocation2 + $0x34] sm:$0xf] %vm1215_vm8, %v1146_v55  ;;  %v5259_v55 = vrot.slane %v1572_v42, 5  ;;  %v1592_v40 = vrot.slane %v1590_v21, 5  ;;  %v1635_v51 = vshrl.u32 %v4126_v38, 16  ;;  %v5297_v52 = vrot.slane %v1644_v36, 5 }
 0x110   : > { %1237 = vst.msk [vmem:[#allocation2 + $0x54] sm:$0xf] %vm1215_vm8, %v1162_v57  ;;  %v1565_v57 = vrot.slane %v1563_v44, 4 }
 0x111   : > { %v1579_v8 = vor.u32 %v1578_v56, %v5259_v55  ;;  %v1593_v56 = vor.u32 %v1592_v40, %v1589_v39 }
 0x112   : > { %v1569_v10 = vor.u32 %v1568_v58, %v1565_v57  ;;  %v1624_v57 = vshrl.u32 %v4124_v29, 16 }
 0x113   : > { %1367 = vrot.lane.b32.xlu1 %v4103_v60, %s4634_s10  ;;  %v1550_v60 = vrot.slane %v1548_v48, 5  ;;  %v1580_v26 = vrot.slane %v1579_v8, 4 }
 0x114   : > { %1365 = vrot.lane.b32.xlu0 %v4102_v61, %s4634_s10  ;;  %1363 = vrot.lane.b32.xlu2 %v4101_v0, %s4634_s10  ;;  %v4119_v61 = vld [vmem:[%s4726_s7 + $0x38] sm:$0x1]  ;;  %v1532_v0 = vrot.slane %v1531_v50, 4  ;;  %v1570_v28 = vrot.slane %v1569_v10, 4 }
 0x115   : > { %v1154_v5 = vpop.permute.xlu1 %1153  ;;  %v1551_v14 = vsel %vm4737_vm2, %v1546_v59, %v1550_v60  ;;  %v1555_v23 = vor.u32 %v1554_v6, %v1550_v60  ;;  %v4132_v60 = vld [vmem:[%s4726_s7 + $0x6c] sm:$0xf]  ;;  %v1594_v6 = vrot.slane %v1593_v56, 4 }
 0x116   : > { %1233 = vst.msk [vmem:[#allocation2 + $0x44] sm:$0xf] %vm1215_vm8, %v1154_v5  ;;  %v1152_v9 = vpop.permute.xlu0 %1151  ;;  %v1168_v13 = vpop.permute.xlu2 %1167  ;;  %v1522_v5 = vrot.slane %v1521_v54, 4  ;;  %v1575_v45 = vsel %vm4737_vm2, %v1570_v28, %v5259_v55  ;;  %v1638_v54 = vshll.u32 %v4126_v38, 16  ;;  %v4128_v55 = vld [vmem:[%s4726_s7 + $0x5c] sm:$0x1] }
 0x117   : > { %1232 = vst.msk [vmem:[#allocation2 + $0x40] sm:$0xf] %vm1215_vm8, %v1152_v9  ;;  %v1582_v9 = vshll.u32 %v4119_v61, 16  ;;  %v1556_v42 = vrot.slane %v1555_v23, 4  ;;  %v1686_v10 = vshll.u32 %v4132_v60, 16 }
 0x118   : > { %1240 = vst.msk [vmem:[#allocation2 + $0x60] sm:$0xf] %vm1215_vm8, %v1168_v13  ;;  %v4116_v13 = vld [vmem:[%s4726_s7 + $0x2c] sm:$0x1]  ;;  %v4131_v38 = vld [vmem:[%s4726_s7 + $0x68] sm:$0x1] }
 0x119   : > { %v1558_v24 = vshll.u32 %v4116_v13, 16  ;;  %v1584_v27 = vrot.slane %v1582_v9, 5  ;;  %v1683_v9 = vshrl.u32 %v4132_v60, 16  ;;  %v4125_v13 = vld [vmem:[%s4726_s7 + $0x50] sm:$0x1] }
 0x11b   : > { %1373 = vrot.lane.b32.xlu1 %v4106_v15, %s4634_s10  ;;  %v1614_v15 = vshll.u32 %v4123_v62, 16  ;;  %v1560_v43 = vrot.slane %v1558_v24, 5  ;;  %v1585_v44 = vsel %vm4737_vm2, %v1580_v26, %v1584_v27  ;;  %v1630_v24 = vshll.u32 %v4125_v13, 16 }
 0x11c   : > { %1371 = vrot.lane.b32.xlu0 %v4105_v18, %s4634_s10  ;;  %1369 = vrot.lane.b32.xlu2 %v4104_v22, %s4634_s10  ;;  %v1537_v18 = vsel %vm4737_vm2, %v1532_v0, %v1536_v2  ;;  %v1527_v22 = vsel %vm4737_vm2, %v1522_v5, %v5245_v35  ;;  %v1648_v35 = vshrl.u32 %v4127_v19, 16  ;;  %v1637_v0 = vrot.slane %v1635_v51, 4 }
 0x11d   : > { %v1160_v32 = vpop.permute.xlu1 %1159  ;;  %v1616_v31 = vrot.slane %v1614_v15, 5  ;;  %v1561_v58 = vsel %vm4737_vm2, %v1556_v42, %v1560_v43  ;;  %v1640_v5 = vrot.slane %v1638_v54, 5  ;;  %v1685_v28 = vrot.slane %v1683_v9, 4  ;;  %v4138_v9 = vld [vmem:[%s4726_s7 + $0x84] sm:$0xf] }
 0x11e   : > { %1236 = vst.msk [vmem:[#allocation2 + $0x50] sm:$0xf] %vm1215_vm8, %v1160_v32  ;;  %v1158_v37 = vpop.permute.xlu0 %1157  ;;  %v1174_v41 = vpop.permute.xlu2 %1173  ;;  %v4122_v32 = vld [vmem:[%s4726_s7 + $0x44] sm:$0x1] }
 0x11f   : > { %1235 = vst.msk [vmem:[#allocation2 + $0x4c] sm:$0xf] %vm1215_vm8, %v1158_v37  ;;  %v1617_v48 = vor.u32 %v1616_v31, %v1613_v30  ;;  %v1606_v50 = vshll.u32 %v4122_v32, 16  ;;  %v1641_v21 = vor.u32 %v1640_v5, %v1637_v0  ;;  %v5322_v30 = vrot.slane %v1668_v17, 5  ;;  %v4136_v32 = vld [vmem:[%s4726_s7 + $0x7c] sm:$0xf] }
 0x120   : > { %1243 = vst.msk [vmem:[#allocation2 + $0x6c] sm:$0xf] %vm1215_vm8, %v1174_v41  ;;  %v4139_v5 = vld [vmem:[%s4726_s7 + $0x88] sm:$0xf] }
 0x121   : > { %v1618_v61 = vrot.slane %v1617_v48, 4 }
 0x123   : > { %1876 = vrot.lane.b32.xlu1 %v1513_v46, %s4635_s11  ;;  %v1620_v46 = vshll.u32 %v4124_v29, 16  ;;  %v1688_v29 = vrot.slane %v1686_v10, 5 }
 0x124   : > { %1874 = vrot.lane.b32.xlu0 %v1503_v49, %s4635_s11  ;;  %1375 = vrot.lane.b32.xlu2 %v4107_v53, %s4634_s10  ;;  %v1603_v49 = vor.u32 %v1602_v34, %v5284_v33  ;;  %v1650_v53 = vrot.slane %v1648_v35, 4  ;;  %v4135_v34 = vld [vmem:[%s4726_s7 + $0x78] sm:$0xf]  ;;  %v4133_v35 = vld [vmem:[%s4726_s7 + $0x70] sm:$0xf]  ;;  %s4572_s10 = scalar_lea.hbm %s6298_s4, 512 }
 0x125   : > { %v1166_v63 = vpop.permute.xlu1 %1165  ;;  %v1622_v59 = vrot.slane %v1620_v46, 5  ;;  %v1720_v46 = vshrl.u32 %v4136_v32, 16  ;;  %v1710_v48 = vshll.u32 %v4135_v34, 16  ;;  %v1696_v56 = vshrl.u32 %v4133_v35, 16 }
 0x126   : > { %1239 = vst.msk [vmem:[#allocation2 + $0x5c] sm:$0xf] %vm1215_vm8, %v1166_v63  ;;  %v1164_v4 = vpop.permute.xlu0 %1163  ;;  %v1180_v11 = vpop.permute.xlu2 %1179  ;;  %v1604_v62 = vrot.slane %v1603_v49, 4  ;;  %v1608_v63 = vrot.slane %v1606_v50, 5  ;;  %v1651_v3 = vor.u32 %v1650_v53, %v5297_v52  ;;  %v1689_v49 = vor.u32 %v1688_v29, %v1685_v28 }
 0x127   : > { %1238 = vst.msk [vmem:[#allocation2 + $0x58] sm:$0xf] %vm1215_vm8, %v1164_v4  ;;  %v1654_v4 = vshll.u32 %v4128_v55, 16  ;;  %v1623_v15 = vsel %vm4737_vm2, %v1618_v61, %v1622_v59  ;;  %v1692_v50 = vshll.u32 %v4133_v35, 16  ;;  %v1678_v53 = vshll.u32 %v4131_v38, 16 }
 0x128   : > { %1246 = vst.msk [vmem:[#allocation2 + $0x78] sm:$0xf] %vm1215_vm8, %v1180_v11  ;;  %v1626_v11 = vrot.slane %v1624_v57, 4  ;;  %v1609_v16 = vsel %vm4737_vm2, %v1604_v62, %v1608_v63  ;;  %v1652_v19 = vrot.slane %v1651_v3, 4  ;;  %v1712_v61 = vrot.slane %v1710_v48, 5 }
 0x129   : > { %v1656_v20 = vrot.slane %v1654_v4, 5  ;;  %v1690_v62 = vrot.slane %v1689_v49, 4  ;;  %v1694_v63 = vrot.slane %v1692_v50, 5  ;;  %v1680_v0 = vrot.slane %v1678_v53, 5  ;;  %v4141_v4 = vld [vmem:[%s4726_s7 + $0x90] sm:$0xf] }
 0x12a   : > { %v1627_v23 = vor.u32 %v1626_v11, %v1622_v59  ;;  %v1722_v59 = vrot.slane %v1720_v46, 4  ;;  %v1755_v17 = vshrl.u32 %v4141_v4, 16 }
 0x12b   : > { %1882 = vrot.lane.b32.xlu1 %v1551_v14, %s4635_s11  ;;  %v4129_v14 = vld [vmem:[%s4726_s7 + $0x60] sm:$0xf] }
 0x12c   : > { %1880 = vrot.lane.b32.xlu0 %v1537_v18, %s4635_s11  ;;  %1878 = vrot.lane.b32.xlu2 %v1527_v22, %s4635_s11  ;;  %v1672_v18 = vshrl.u32 %v4130_v7, 16  ;;  %v1599_v22 = vsel %vm4737_vm2, %v1594_v6, %v5284_v33  ;;  %v1659_v26 = vshrl.u32 %v4129_v14, 16  ;;  %v1662_v27 = vshll.u32 %v4129_v14, 16  ;;  %v4134_v14 = vld [vmem:[%s4726_s7 + $0x74] sm:$0x1] }
 0x12d   : > { %v1172_v37 = vpop.permute.xlu1 %1171  ;;  %v1657_v33 = vsel %vm4737_vm2, %v1652_v19, %v1656_v20  ;;  %v1628_v40 = vrot.slane %v1627_v23, 4  ;;  %v1740_v19 = vshll.u32 %v4139_v5, 16  ;;  %v1744_v20 = vshrl.u32 %v4139_v5, 16 }
 0x12e   : > { %1242 = vst.msk [vmem:[#allocation2 + $0x68] sm:$0xf] %vm1215_vm8, %v1172_v37  ;;  %v1170_v41 = vpop.permute.xlu0 %1169  ;;  %v1316_v47 = vpop.permute.xlu2 %1315  ;;  %v1674_v31 = vrot.slane %v1672_v18, 4  ;;  %v1642_v37 = vrot.slane %v1641_v21, 4  ;;  %v1661_v42 = vrot.slane %v1659_v26, 4  ;;  %v1664_v43 = vrot.slane %v1662_v27, 5 }
 0x12f   : > { %1241 = vst.msk [vmem:[#allocation2 + $0x64] sm:$0xf] %vm1215_vm8, %v1170_v41  ;;  %v1632_v41 = vrot.slane %v1630_v24, 5  ;;  %v1758_v18 = vshll.u32 %v4141_v4, 16  ;;  %v1731_v21 = vshrl.u32 %v4138_v9, 16  ;;  %v1702_v26 = vshll.u32 %v4134_v14, 16 }
 0x130   : > { %1411 = vst.msk [vmem:[#allocation2 + $0x4] sm:$0xf] %vm1409_vm9, %v1316_v47  ;;  %v1707_v47 = vshrl.u32 %v4135_v34, 16  ;;  %v1675_v51 = vor.u32 %v1674_v31, %v5322_v30  ;;  %v1647_v54 = vsel %vm4737_vm2, %v1642_v37, %v5297_v52  ;;  %v1757_v31 = vrot.slane %v1755_v17, 4  ;;  %v4145_v34 = vld [vmem:[%s4726_s7 + $0xa0] sm:$0xf] }
 0x131   : > { %v1633_v57 = vsel %vm4737_vm2, %v1628_v40, %v1632_v41  ;;  %v4142_v37 = vld [vmem:[%s4726_s7 + $0x94] sm:$0xf]  ;;  %v5367_v35 = vrot.slane %v1740_v19, 5  ;;  %v1733_v38 = vrot.slane %v1731_v21, 4  ;;  %v4140_v41 = vld [vmem:[%s4726_s7 + $0x8c] sm:$0x1] }
 0x132   : > { %v1709_v60 = vrot.slane %v1707_v47, 4  ;;  %v1676_v52 = vrot.slane %v1675_v51, 4  ;;  %v1792_v46 = vshrl.u32 %v4145_v34, 16  ;;  %v1764_v51 = vshll.u32 %v4142_v37, 16  ;;  %v4143_v14 = vld [vmem:[%s4726_s7 + $0x98] sm:$0x1] }
 0x133   : > { %1888 = vrot.lane.b32.xlu1 %v1585_v44, %s4635_s11 }
 0x134   : > { %1886 = vrot.lane.b32.xlu0 %v1575_v45, %s4635_s11  ;;  %1884 = vrot.lane.b32.xlu2 %v1561_v58, %s4635_s11  ;;  %v1716_v45 = vshll.u32 %v4136_v32, 16  ;;  %v1665_v58 = vor.u32 %v1664_v43, %v1661_v42  ;;  %v1760_v32 = vrot.slane %v1758_v18, 5  ;;  %v1704_v43 = vrot.slane %v1702_v26, 5 }
 0x135   : > { %v1178_v2 = vpop.permute.xlu1 %1177 }
 0x136   : > { %1245 = vst.msk [vmem:[#allocation2 + $0x74] sm:$0xf] %vm1215_vm8, %v1178_v2  ;;  %v1176_v8 = vpop.permute.xlu0 %1175  ;;  %v1322_v12 = vpop.permute.xlu2 %1321  ;;  %v5341_v55 = vrot.slane %v1716_v45, 5  ;;  %v4137_v2 = vld [vmem:[%s4726_s7 + $0x80] sm:$0x1]  ;;  %v1666_v7 = vrot.slane %v1665_v58, 4  ;;  %v1761_v50 = vor.u32 %v1760_v32, %v1757_v31 }
 0x137   : > { %1244 = vst.msk [vmem:[#allocation2 + $0x70] sm:$0xf] %vm1215_vm8, %v1176_v8  ;;  %v1698_v8 = vrot.slane %v1696_v56, 4  ;;  %v1726_v11 = vshll.u32 %v4137_v2, 16  ;;  %v1788_v45 = vshll.u32 %v4145_v34, 16  ;;  %v1750_v56 = vshll.u32 %v4140_v41, 16 }
 0x138   : > { %1414 = vst.msk [vmem:[#allocation2 + $0x10] sm:$0xf] %vm1409_vm9, %v1322_v12  ;;  %v1723_v10 = vor.u32 %v1722_v59, %v5341_v55  ;;  %v1713_v12 = vor.u32 %v1712_v61, %v1709_v60  ;;  %v1671_v23 = vsel %vm4737_vm2, %v1666_v7, %v5322_v30  ;;  %v1746_v30 = vrot.slane %v1744_v20, 4  ;;  %v4146_v60 = vld [vmem:[%s4726_s7 + $0xa4] sm:$0x1] }
 0x139   : > { %v1699_v24 = vor.u32 %v1698_v8, %v1694_v63  ;;  %v1728_v28 = vrot.slane %v1726_v11, 5  ;;  %v1768_v58 = vshrl.u32 %v4142_v37, 16  ;;  %v5383_v61 = vrot.slane %v1788_v45, 5  ;;  %v4151_v32 = vld [vmem:[%s4726_s7 + $0xb8] sm:$0xf] }
 0x13a   : > { %v1724_v27 = vrot.slane %v1723_v10, 4  ;;  %v1714_v29 = vrot.slane %v1713_v12, 4  ;;  %v1752_v4 = vrot.slane %v1750_v56, 5  ;;  %v1798_v8 = vshll.u32 %v4146_v60, 16 }
 0x13b   : > { %1894 = vrot.lane.b32.xlu1 %v1623_v15, %s4635_s11  ;;  %v1695_v15 = vsel %vm4737_vm2, %v1690_v62, %v1694_v63  ;;  %v1700_v42 = vrot.slane %v1699_v24, 4  ;;  %v1794_v62 = vrot.slane %v1792_v46, 4  ;;  %v1770_v10 = vrot.slane %v1768_v58, 4 }
 0x13c   : > { %1892 = vrot.lane.b32.xlu0 %v1609_v16, %s4635_s11  ;;  %1890 = vrot.lane.b32.xlu2 %v1599_v22, %s4635_s11  ;;  %v1681_v16 = vsel %vm4737_vm2, %v1676_v52, %v1680_v0  ;;  %v1734_v22 = vshll.u32 %v4138_v9, 16  ;;  %v1729_v49 = vsel %vm4737_vm2, %v1724_v27, %v1728_v28  ;;  %v1719_v53 = vsel %vm4737_vm2, %v1714_v29, %v5341_v55  ;;  %v4148_v9 = vld [vmem:[%s4726_s7 + $0xac] sm:$0xf] }
 0x13d   : > { %v1314_v36 = vpop.permute.xlu1 %1313  ;;  %v1705_v59 = vsel %vm4737_vm2, %v1700_v42, %v1704_v43  ;;  %v1762_v55 = vrot.slane %v1761_v50, 4  ;;  %v1766_v0 = vrot.slane %v1764_v51, 5  ;;  %v1795_v11 = vor.u32 %v1794_v62, %v5383_v61 }
 0x13e   : > { %1410 = vst.msk [vmem:[#allocation2] sm:$0xf] %vm1409_vm9, %v1314_v36  ;;  %v1182_v39 = vpop.permute.xlu0 %1181  ;;  %v1328_v44 = vpop.permute.xlu2 %1327  ;;  %v4144_v36 = vld [vmem:[%s4726_s7 + $0x9c] sm:$0xf]  ;;  %v1812_v21 = vshll.u32 %v4148_v9, 16  ;;  %v1774_v24 = vshll.u32 %v4143_v14, 16 }
 0x13f   : > { %1247 = vst.msk [vmem:[#allocation2 + $0x7c] sm:$0xf] %vm1215_vm8, %v1182_v39  ;;  %v1736_v39 = vrot.slane %v1734_v22, 5  ;;  %v1779_v47 = vshrl.u32 %v4144_v36, 16  ;;  %v1782_v48 = vshll.u32 %v4144_v36, 16  ;;  %v1816_v22 = vshrl.u32 %v4148_v9, 16 }
 0x140   : > { %1417 = vst.msk [vmem:[#allocation2 + $0x1c] sm:$0xf] %vm1409_vm9, %v1328_v44  ;;  %v1796_v28 = vrot.slane %v1795_v11, 4  ;;  %v1800_v29 = vrot.slane %v1798_v8, 5  ;;  %v1776_v42 = vrot.slane %v1774_v24, 5  ;;  %v1840_v58 = vshrl.u32 %v4151_v32, 16 }
 0x141   : > { %v1781_v63 = vrot.slane %v1779_v47, 4  ;;  %v1784_v52 = vrot.slane %v1782_v48, 5  ;;  %v4157_v24 = vld [vmem:[%s4726_s7 + $0x10] sm:$0xf] }
 0x142   : > { %v1801_v45 = vsel %vm4737_vm2, %v1796_v28, %v1800_v29  ;;  %v1842_v8 = vrot.slane %v1840_v58, 4 }
 0x143   : > { %1900 = vrot.lane.b32.xlu1 %v1657_v33, %s4635_s11  ;;  %v1785_v12 = vor.u32 %v1784_v52, %v1781_v63 }
 0x144   : > { %1898 = vrot.lane.b32.xlu0 %v1647_v54, %s4635_s11  ;;  %1896 = vrot.lane.b32.xlu2 %v1633_v57, %s4635_s11  ;;  %v1747_v54 = vor.u32 %v1746_v30, %v5367_v35  ;;  %v1737_v57 = vor.u32 %v1736_v39, %v1733_v38  ;;  %v1818_v30 = vrot.slane %v1816_v22, 4  ;;  %v4154_v38 = vld [vmem:[%s4726_s7 + $0xc4] sm:$0xf]  ;;  %v4153_v39 = vld [vmem:[%s4726_s7 + $0xc0] sm:$0xf] }
 0x145   : > { %v1320_v3 = vpop.permute.xlu1 %1319  ;;  %v1786_v31 = vrot.slane %v1785_v12, 4  ;;  %v1860_v50 = vshll.u32 %v4154_v38, 16  ;;  %v1864_v51 = vshrl.u32 %v4154_v38, 16  ;;  %v1851_v56 = vshrl.u32 %v4153_v39, 16 }
 0x146   : > { %1413 = vst.msk [vmem:[#allocation2 + $0xc] sm:$0xf] %vm1409_vm9, %v1320_v3  ;;  %v1318_v6 = vpop.permute.xlu0 %1317  ;;  %v1334_v13 = vpop.permute.xlu2 %1333  ;;  %v1748_v3 = vrot.slane %v1747_v54, 4  ;;  %v1738_v5 = vrot.slane %v1737_v57, 4  ;;  %v1854_v57 = vshll.u32 %v4153_v39, 16 }
 0x147   : > { %1412 = vst.msk [vmem:[#allocation2 + $0x8] sm:$0xf] %vm1409_vm9, %v1318_v6  ;;  %v4150_v6 = vld [vmem:[%s4726_s7 + $0xb4] sm:$0xf]  ;;  %v1791_v46 = vsel %vm4737_vm2, %v1786_v31, %v5383_v61  ;;  %v1862_v63 = vrot.slane %v1860_v50, 5  ;;  %v1866_v52 = vrot.slane %v1864_v51, 4 }
 0x148   : > { %1420 = vst.msk [vmem:[#allocation2 + $0x28] sm:$0xf] %vm1409_vm9, %v1334_v13  ;;  %v1827_v17 = vshrl.u32 %v4150_v6, 16  ;;  %v1830_v18 = vshll.u32 %v4150_v6, 16  ;;  %v1753_v19 = vsel %vm4737_vm2, %v1748_v3, %v1752_v4  ;;  %v1743_v20 = vsel %vm4737_vm2, %v1738_v5, %v5367_v35  ;;  %v4155_v3 = vld [vmem:[%s4726_s7 + $0xc8] sm:$0x1] }
 0x149   : > { %v1814_v35 = vrot.slane %v1812_v21, 5  ;;  %v1853_v4 = vrot.slane %v1851_v56, 4  ;;  %v1856_v5 = vrot.slane %v1854_v57, 5  ;;  %v1867_v12 = vor.u32 %v1866_v52, %v1862_v63  ;;  %v4162_v50 = vld [vmem:[%s4726_s7 + $0x24] sm:$0xe] }
 0x14a   : > { %v1829_v34 = vrot.slane %v1827_v17, 4  ;;  %v1832_v36 = vrot.slane %v1830_v18, 5  ;;  %v4206_v58 = vrot.slane %v4162_v50, 9 }
 0x14b   : > { %1906 = vrot.lane.b32.xlu1 %v1695_v15, %s4635_s11  ;;  %v4147_v15 = vld [vmem:[%s4726_s7 + $0xa8] sm:$0xf] }
 0x14c   : > { %1904 = vrot.lane.b32.xlu0 %v1681_v16, %s4635_s11  ;;  %1902 = vrot.lane.b32.xlu2 %v1671_v23, %s4635_s11  ;;  %v1767_v16 = vsel %vm4737_vm2, %v1762_v55, %v1766_v0  ;;  %v1771_v23 = vor.u32 %v1770_v10, %v1766_v0  ;;  %v1803_v26 = vshrl.u32 %v4147_v15, 16  ;;  %v1806_v27 = vshll.u32 %v4147_v15, 16  ;;  %v4152_v10 = vld [vmem:[%s4726_s7 + $0xbc] sm:$0x1] }
 0x14d   : > { %v1326_v33 = vpop.permute.xlu1 %1325  ;;  %v1833_v48 = vor.u32 %v1832_v36, %v1829_v34  ;;  %v1857_v15 = vor.u32 %v1856_v5, %v1853_v4  ;;  %v1846_v18 = vshll.u32 %v4152_v10, 16  ;;  %v4160_v34 = vld [vmem:[%s4726_s7 + $0x1c] sm:$0xf]  ;;  %v2101_v36 = vrot.slane %v4157_v24, 5  ;;  %v4167_v4 = vld [vmem:[%s4726_s7 + $0x38] sm:$0x1] }
 0x14e   : > { %1416 = vst.msk [vmem:[#allocation2 + $0x18] sm:$0xf] %vm1409_vm9, %v1326_v33  ;;  %v1324_v40 = vpop.permute.xlu0 %1323  ;;  %v1340_v44 = vpop.permute.xlu2 %1339  ;;  %v4149_v33 = vld [vmem:[%s4726_s7 + $0xb0] sm:$0x1]  ;;  %v1772_v41 = vrot.slane %v1771_v23, 4  ;;  %v1805_v43 = vrot.slane %v1803_v26, 4 }
 0x14f   : > { %1415 = vst.msk [vmem:[#allocation2 + $0x14] sm:$0xf] %vm1409_vm9, %v1324_v40  ;;  %v1822_v54 = vshll.u32 %v4149_v33, 16  ;;  %v1834_v61 = vrot.slane %v1833_v48, 4  ;;  %v1858_v22 = vrot.slane %v1857_v15, 4  ;;  %v2108_v38 = vrot.slane %v4160_v34, 5 }
 0x150   : > { %1423 = vst.msk [vmem:[#allocation2 + $0x34] sm:$0xf] %vm1409_vm9, %v1340_v44  ;;  %v1808_v44 = vrot.slane %v1806_v27, 5  ;;  %v1848_v27 = vrot.slane %v1846_v18, 5  ;;  %v4158_v33 = vld [vmem:[%s4726_s7 + $0x14] sm:$0x1] }
 0x151   : > { %v1863_v31 = vsel %vm4737_vm2, %v1858_v22, %v1862_v63  ;;  %v4170_v22 = vld [vmem:[%s4726_s7 + $0x44] sm:$0x1] }
 0x152   : > { %v1809_v60 = vor.u32 %v1808_v44, %v1805_v43 }
 0x153   : > { %1912 = vrot.lane.b32.xlu1 %v1729_v49, %s4635_s11  ;;  %v1836_v49 = vshll.u32 %v4151_v32, 16  ;;  %v4159_v32 = vld [vmem:[%s4726_s7 + $0x18] sm:$0xe] }
 0x154   : > { %1910 = vrot.lane.b32.xlu0 %v1719_v53, %s4635_s11  ;;  %1908 = vrot.lane.b32.xlu2 %v1705_v59, %s4635_s11  ;;  %v1819_v53 = vor.u32 %v1818_v30, %v1814_v35  ;;  %v1777_v59 = vsel %vm4737_vm2, %v1772_v41, %v1776_v42  ;;  %v4205_v30 = vrot.slane %v4159_v32, 9  ;;  %v2104_v41 = vrot.slane %v4158_v33, 5  ;;  %v4163_v42 = vld [vmem:[%s4726_s7 + $0x28] sm:$0xf] }
 0x155   : > { %v1332_v2 = vpop.permute.xlu1 %1331  ;;  %v1838_v62 = vrot.slane %v1836_v49, 5  ;;  %v4164_v49 = vld [vmem:[%s4726_s7 + $0x2c] sm:$0x1]  ;;  %v2132_v32 = vrot.slane %v4170_v22, 5 }
 0x156   : > { %1419 = vst.msk [vmem:[#allocation2 + $0x24] sm:$0xf] %vm1409_vm9, %v1332_v2  ;;  %v1330_v7 = vpop.permute.xlu0 %1329  ;;  %v1346_v13 = vpop.permute.xlu2 %1345  ;;  %v1820_v0 = vrot.slane %v1819_v53, 4  ;;  %v1824_v2 = vrot.slane %v1822_v54, 5  ;;  %v4161_v53 = vld [vmem:[%s4726_s7 + $0x20] sm:$0x1] }
 0x157   : > { %1418 = vst.msk [vmem:[#allocation2 + $0x20] sm:$0xf] %vm1409_vm9, %v1330_v7  ;;  %v1810_v7 = vrot.slane %v1809_v60, 4  ;;  %v1839_v11 = vsel %vm4737_vm2, %v1834_v61, %v1838_v62  ;;  %v1843_v17 = vor.u32 %v1842_v8, %v1838_v62  ;;  %v2118_v56 = vrot.slane %v4164_v49, 5  ;;  %v4166_v60 = vld [vmem:[%s4726_s7 + $0x34] sm:$0xf] }
 0x158   : > { %1426 = vst.msk [vmem:[#allocation2 + $0x40] sm:$0xf] %vm1409_vm9, %v1346_v13  ;;  %v1870_v13 = vshll.u32 %v4155_v3, 16  ;;  %v1825_v14 = vsel %vm4737_vm2, %v1820_v0, %v1824_v2  ;;  %v2110_v61 = vrot.slane %v2108_v38, 4  ;;  %v2111_v62 = vrot.slane %v4161_v53, 5 }
 0x159   : > { %v1844_v26 = vrot.slane %v1843_v17, 4  ;;  %v4168_v0 = vld [vmem:[%s4726_s7 + $0x3c] sm:$0xe]  ;;  %v4169_v2 = vld [vmem:[%s4726_s7 + $0x40] sm:$0xf]  ;;  %v2122_v3 = vrot.slane %v4166_v60, 5 }
 0x15a   : > { %v2112_v5 = vsel %vm4912_vm6, %v2110_v61, %v2111_v62  ;;  %v2129_v8 = vrot.slane %v4169_v2, 5 }
 0x15b   : > { %1918 = vrot.lane.b32.xlu1 %v1767_v16, %s4635_s11  ;;  %v1815_v16 = vsel %vm4737_vm2, %v1810_v7, %v1814_v35  ;;  %v4156_v35 = vld [vmem:[%s4726_s7 + $0xc] sm:$0xe]  ;;  %v4208_v7 = vrot.slane %v4168_v0, 9  ;;  %v2124_v10 = vrot.slane %v2122_v3, 4 }
 0x15c   : > { %1916 = vrot.lane.b32.xlu0 %v1753_v19, %s4635_s11  ;;  %1914 = vrot.lane.b32.xlu2 %v1743_v20, %s4635_s11  ;;  %v1868_v19 = vrot.slane %v1867_v12, 4  ;;  %v1872_v20 = vrot.slane %v1870_v13, 5  ;;  %v4204_v44 = vrot.slane %v4156_v35, 9  ;;  %v4172_v12 = vld [vmem:[%s4726_s7 + $0x4c] sm:$0xf] }
 0x15d   : > { %v1338_v37 = vpop.permute.xlu1 %1337  ;;  %v2136_v17 = vrot.slane %v4172_v12, 5  ;;  %v4178_v35 = vld [vmem:[%s4726_s7 + $0x64] sm:$0xf] }
 0x15e   : > { %1422 = vst.msk [vmem:[#allocation2 + $0x30] sm:$0xf] %vm1409_vm9, %v1338_v37  ;;  %v1336_v40 = vpop.permute.xlu0 %1335  ;;  %v1352_v47 = vpop.permute.xlu2 %1351  ;;  %v1873_v29 = vsel %vm4737_vm2, %v1868_v19, %v1872_v20  ;;  %v1849_v37 = vsel %vm4737_vm2, %v1844_v26, %v1848_v27  ;;  %v2102_v51 = vsel %vm4912_vm6, %v4204_v44, %v2101_v36  ;;  %v4173_v19 = vld [vmem:[%s4726_s7 + $0x50] sm:$0x1]  ;;  %v4171_v20 = vld [vmem:[%s4726_s7 + $0x48] sm:$0xe] }
 0x15f   : > { %1421 = vst.msk [vmem:[#allocation2 + $0x2c] sm:$0xf] %vm1409_vm9, %v1336_v40  ;;  %v2103_v40 = vrot.slane %v2101_v36, 4  ;;  %v2139_v24 = vrot.slane %v4173_v19, 5  ;;  %v4209_v27 = vrot.slane %v4171_v20, 9 }
 0x160   : > { %1429 = vst.msk [vmem:[#allocation2 + $0x4c] sm:$0xf] %vm1409_vm9, %v1352_v47  ;;  %v2115_v47 = vrot.slane %v4163_v42, 5  ;;  %v2150_v42 = vrot.slane %v4178_v35, 5 }
 0x161   : > { %v2105_v48 = vsel %vm4912_vm6, %v2103_v40, %v2104_v41  ;;  %v2137_v33 = vsel %vm4912_vm6, %v4209_v27, %v2136_v17  ;;  %v4174_v40 = vld [vmem:[%s4726_s7 + $0x54] sm:$0xe]  ;;  %v4188_v27 = vld [vmem:[%s4726_s7 + $0x8c] sm:$0x1] }
 0x162   : > { %v2117_v54 = vrot.slane %v2115_v47, 4 }
 0x163   : > { %1924 = vrot.lane.b32.xlu1 %v1801_v45, %s4635_s11 }
 0x164   : > { %1922 = vrot.lane.b32.xlu0 %v1791_v46, %s4635_s11  ;;  %1920 = vrot.lane.b32.xlu2 %v1777_v59, %s4635_s11  ;;  %v2109_v46 = vsel %vm4912_vm6, %v4205_v30, %v2108_v38  ;;  %v2119_v52 = vsel %vm4912_vm6, %v2117_v54, %v2118_v56  ;;  %v4176_v38 = vld [vmem:[%s4726_s7 + $0x5c] sm:$0x1]  ;;  %v4182_v54 = vld [vmem:[%s4726_s7 + $0x74] sm:$0x1] }
 0x165   : > { %v1344_v55 = vpop.permute.xlu1 %1343  ;;  %v4180_v56 = vld [vmem:[%s4726_s7 + $0x6c] sm:$0xe]  ;;  %v2160_v60 = vrot.slane %v4182_v54, 5 }
 0x166   : > { %1425 = vst.msk [vmem:[#allocation2 + $0x3c] sm:$0xf] %vm1409_vm9, %v1344_v55  ;;  %v1342_v6 = vpop.permute.xlu0 %1341  ;;  %v1358_v9 = vpop.permute.xlu2 %1357  ;;  %v2116_v55 = vsel %vm4912_vm6, %v4206_v58, %v2115_v47  ;;  %v4179_v58 = vld [vmem:[%s4726_s7 + $0x68] sm:$0x1]  ;;  %v4212_v62 = vrot.slane %v4180_v56, 9 }
 0x167   : > { %1424 = vst.msk [vmem:[#allocation2 + $0x38] sm:$0xf] %vm1409_vm9, %v1342_v6  ;;  %v4165_v6 = vld [vmem:[%s4726_s7 + $0x30] sm:$0xe]  ;;  %v2153_v0 = vrot.slane %v4179_v58, 5 }
 0x168   : > { %1432 = vst.msk [vmem:[#allocation2 + $0x58] sm:$0xf] %vm1409_vm9, %v1358_v9 }
 0x16b   : > { %1930 = vrot.lane.b32.xlu1 %v1839_v11, %s4635_s11  ;;  %v2125_v11 = vrot.slane %v4167_v4, 5 }
 0x16c   : > { %1928 = vrot.lane.b32.xlu0 %v1825_v14, %s4635_s11  ;;  %1926 = vrot.lane.b32.xlu2 %v1815_v16, %s4635_s11  ;;  %v4207_v14 = vrot.slane %v4165_v6, 9  ;;  %v2130_v16 = vsel %vm4912_vm6, %v4208_v7, %v2129_v8  ;;  %v4187_v6 = vld [vmem:[%s4726_s7 + $0x88] sm:$0xf] }
 0x16d   : > { %v1350_v21 = vpop.permute.xlu1 %1349  ;;  %v2126_v18 = vsel %vm4912_vm6, %v2124_v10, %v2125_v11  ;;  %v4183_v10 = vld [vmem:[%s4726_s7 + $0x78] sm:$0xe]  ;;  %v2171_v12 = vrot.slane %v4187_v6, 5 }
 0x16e   : > { %1428 = vst.msk [vmem:[#allocation2 + $0x48] sm:$0xf] %vm1409_vm9, %v1350_v21  ;;  %v1348_v23 = vpop.permute.xlu0 %1347  ;;  %v1364_v28 = vpop.permute.xlu2 %1363  ;;  %v2123_v21 = vsel %vm4912_vm6, %v4207_v14, %v2122_v3 }
 0x16f   : > { %1427 = vst.msk [vmem:[#allocation2 + $0x44] sm:$0xf] %vm1409_vm9, %v1348_v23  ;;  %v2138_v23 = vrot.slane %v2136_v17, 4 }
 0x170   : > { %1435 = vst.msk [vmem:[#allocation2 + $0x64] sm:$0xf] %vm1409_vm9, %v1364_v28 }
 0x171   : > { %v2140_v36 = vsel %vm4912_vm6, %v2138_v23, %v2139_v24  ;;  %v4191_v23 = vld [vmem:[%s4726_s7 + $0x98] sm:$0x1]  ;;  %v4189_v24 = vld [vmem:[%s4726_s7 + $0x90] sm:$0xe] }
 0x173   : > { %1936 = vrot.lane.b32.xlu1 %v1873_v29, %s4635_s11  ;;  %v4175_v29 = vld [vmem:[%s4726_s7 + $0x58] sm:$0xf] }
 0x174   : > { %1934 = vrot.lane.b32.xlu0 %v1863_v31, %s4635_s11  ;;  %1932 = vrot.lane.b32.xlu2 %v1849_v37, %s4635_s11  ;;  %v2131_v31 = vrot.slane %v2129_v8, 4  ;;  %v4177_v37 = vld [vmem:[%s4726_s7 + $0x60] sm:$0xe]  ;;  %v2143_v30 = vrot.slane %v4175_v29, 5  ;;  %v4185_v8 = vld [vmem:[%s4726_s7 + $0x80] sm:$0x1] }
 0x175   : > { %v1356_v39 = vpop.permute.xlu1 %1355  ;;  %v4211_v41 = vrot.slane %v4177_v37, 9  ;;  %v2181_v29 = vrot.slane %v4191_v23, 5  ;;  %v2174_v37 = vrot.slane %v4188_v27, 5  ;;  %v4222_v27 = vld [vmem:[%s4726_s7 + $0x24] sm:$0xf] }
 0x176   : > { %1431 = vst.msk [vmem:[#allocation2 + $0x54] sm:$0xf] %vm1409_vm9, %v1356_v39  ;;  %v1354_v43 = vpop.permute.xlu0 %1353  ;;  %v1370_v45 = vpop.permute.xlu2 %1369  ;;  %v2133_v39 = vsel %vm4912_vm6, %v2131_v31, %v2132_v32  ;;  %v2145_v44 = vrot.slane %v2143_v30, 4  ;;  %v4215_v32 = vrot.slane %v4189_v24, 9 }
 0x177   : > { %1430 = vst.msk [vmem:[#allocation2 + $0x50] sm:$0xf] %vm1409_vm9, %v1354_v43  ;;  %v2151_v50 = vsel %vm4912_vm6, %v4211_v41, %v2150_v42 }
 0x178   : > { %1438 = vst.msk [vmem:[#allocation2 + $0x70] sm:$0xf] %vm1409_vm9, %v1370_v45  ;;  %v2146_v45 = vrot.slane %v4176_v38, 5 }
 0x17a   : > { %v2147_v53 = vsel %vm4912_vm6, %v2145_v44, %v2146_v45  ;;  %v4192_v44 = vld [vmem:[%s4726_s7 + $0x9c] sm:$0xe] }
 0x17b   : > { %2215 = vrot.lane.b32.xlu1 %v2109_v46, %s4636_s12  ;;  %v4181_v46 = vld [vmem:[%s4726_s7 + $0x70] sm:$0xf] }
 0x17c   : > { %2213 = vrot.lane.b32.xlu0 %v2105_v48, %s4636_s12  ;;  %2211 = vrot.lane.b32.xlu2 %v2102_v51, %s4636_s12  ;;  %v4210_v48 = vrot.slane %v4174_v40, 9  ;;  %v2157_v51 = vrot.slane %v4181_v46, 5  ;;  %v4196_v40 = vld [vmem:[%s4726_s7 + $0xac] sm:$0xf] }
 0x17d   : > { %v1362_v57 = vpop.permute.xlu1 %1361  ;;  %v2192_v46 = vrot.slane %v4196_v40, 5  ;;  %v4227_v40 = vld [vmem:[%s4726_s7 + $0x40] sm:$0xf] }
 0x17e   : > { %1434 = vst.msk [vmem:[#allocation2 + $0x60] sm:$0xf] %vm1409_vm9, %v1362_v57  ;;  %v1360_v59 = vpop.permute.xlu0 %1359  ;;  %v1376_v63 = vpop.permute.xlu2 %1375  ;;  %v2144_v57 = vsel %vm4912_vm6, %v4210_v48, %v2143_v30  ;;  %v2158_v4 = vsel %vm4912_vm6, %v4212_v62, %v2157_v51  ;;  %v4197_v62 = vld [vmem:[%s4726_s7 + $0xb0] sm:$0x1] }
 0x17f   : > { %1433 = vst.msk [vmem:[#allocation2 + $0x5c] sm:$0xf] %vm1409_vm9, %v1360_v59  ;;  %v2159_v59 = vrot.slane %v2157_v51, 4 }
 0x180   : > { %1441 = vst.msk [vmem:[#allocation2 + $0x7c] sm:$0xf] %vm1409_vm9, %v1376_v63 }
 0x181   : > { %v2161_v3 = vsel %vm4912_vm6, %v2159_v59, %v2160_v60  ;;  %v4200_v59 = vld [vmem:[%s4726_s7 + $0xbc] sm:$0x1]  ;;  %v4198_v60 = vld [vmem:[%s4726_s7 + $0xb4] sm:$0xe] }
 0x183   : > { %2221 = vrot.lane.b32.xlu1 %v2119_v52, %s4636_s12  ;;  %v4184_v52 = vld [vmem:[%s4726_s7 + $0x7c] sm:$0xf] }
 0x184   : > { %2219 = vrot.lane.b32.xlu0 %v2116_v55, %s4636_s12  ;;  %2217 = vrot.lane.b32.xlu2 %v2112_v5, %s4636_s12  ;;  %v2152_v55 = vrot.slane %v2150_v42, 4  ;;  %v4186_v5 = vld [vmem:[%s4726_s7 + $0x84] sm:$0xe]  ;;  %v2164_v7 = vrot.slane %v4184_v52, 5  ;;  %v4194_v42 = vld [vmem:[%s4726_s7 + $0xa4] sm:$0x1] }
 0x185   : > { %v1368_v9 = vpop.permute.xlu1 %1367  ;;  %v4214_v11 = vrot.slane %v4186_v5, 9  ;;  %v2202_v52 = vrot.slane %v4200_v59, 5  ;;  %v2195_v5 = vrot.slane %v4197_v62, 5  ;;  %v4237_v59 = vld [vmem:[%s4726_s7 + $0x7c] sm:$0xf] }
 0x186   : > { %1437 = vst.msk [vmem:[#allocation2 + $0x6c] sm:$0xf] %vm1409_vm9, %v1368_v9  ;;  %v1366_v13 = vpop.permute.xlu0 %1365  ;;  %v1879_v15 = vpop.permute.xlu2 %1878  ;;  %v2154_v9 = vsel %vm4912_vm6, %v2152_v55, %v2153_v0  ;;  %v2166_v14 = vrot.slane %v2164_v7, 4  ;;  %v4218_v0 = vrot.slane %v4198_v60, 9 }
 0x187   : > { %1436 = vst.msk [vmem:[#allocation2 + $0x68] sm:$0xf] %vm1409_vm9, %v1366_v13  ;;  %v2172_v20 = vsel %vm4912_vm6, %v4214_v11, %v2171_v12 }
 0x188   : > { %1973 = vst.msk [vmem:[#allocation2 + $0x8] sm:$0xf] %vm1970_vm10, %v1879_v15  ;;  %v2167_v15 = vrot.slane %v4185_v8, 5 }
 0x18a   : > { %v2168_v22 = vsel %vm4912_vm6, %v2166_v14, %v2167_v15 }
 0x18b   : > { %2227 = vrot.lane.b32.xlu1 %v2130_v16, %s4636_s12  ;;  %v4190_v16 = vld [vmem:[%s4726_s7 + $0x94] sm:$0xf] }
 0x18c   : > { %2225 = vrot.lane.b32.xlu0 %v2126_v18, %s4636_s12  ;;  %2223 = vrot.lane.b32.xlu2 %v2123_v21, %s4636_s12  ;;  %v4213_v18 = vrot.slane %v4183_v10, 9  ;;  %v2178_v21 = vrot.slane %v4190_v16, 5  ;;  %v4203_v10 = vld [vmem:[%s4726_s7 + $0xc8] sm:$0x1] }
 0x18d   : > { %v1374_v26 = vpop.permute.xlu1 %1373  ;;  %v2209_v15 = vrot.slane %v4203_v10, 5  ;;  %v4290_v10 = vld [vmem:[%s4726_s7 + $0xb0] sm:$0x1] }
 0x18e   : > { %1440 = vst.msk [vmem:[#allocation2 + $0x78] sm:$0xf] %vm1409_vm9, %v1374_v26  ;;  %v1372_v28 = vpop.permute.xlu0 %1371  ;;  %v1885_v34 = vpop.permute.xlu2 %1884  ;;  %v2165_v26 = vsel %vm4912_vm6, %v4213_v18, %v2164_v7  ;;  %v2179_v38 = vsel %vm4912_vm6, %v4215_v32, %v2178_v21 }
 0x18f   : > { %1439 = vst.msk [vmem:[#allocation2 + $0x74] sm:$0xf] %vm1409_vm9, %v1372_v28  ;;  %v2180_v28 = vrot.slane %v2178_v21, 4 }
 0x190   : > { %1976 = vst.msk [vmem:[#allocation2 + $0x14] sm:$0xf] %vm1970_vm10, %v1885_v34 }
 0x191   : > { %v2182_v30 = vsel %vm4912_vm6, %v2180_v28, %v2181_v29  ;;  %v4221_v28 = vld [vmem:[%s4726_s7 + $0x1c] sm:$0xf] }
 0x193   : > { %2233 = vrot.lane.b32.xlu1 %v2140_v36, %s4636_s12  ;;  %v4193_v36 = vld [vmem:[%s4726_s7 + $0xa0] sm:$0xf] }
 0x194   : > { %2231 = vrot.lane.b32.xlu0 %v2137_v33, %s4636_s12  ;;  %2229 = vrot.lane.b32.xlu2 %v2133_v39, %s4636_s12  ;;  %v2173_v33 = vrot.slane %v2171_v12, 4  ;;  %v4195_v39 = vld [vmem:[%s4726_s7 + $0xa8] sm:$0xe]  ;;  %v2185_v41 = vrot.slane %v4193_v36, 5  ;;  %v4201_v12 = vld [vmem:[%s4726_s7 + $0xc0] sm:$0xe] }
 0x195   : > { %v1877_v43 = vpop.permute.xlu1 %1876  ;;  %v4217_v45 = vrot.slane %v4195_v39, 9  ;;  %v4225_v36 = vld [vmem:[%s4726_s7 + $0x34] sm:$0xf]  ;;  %v4228_v39 = vld [vmem:[%s4726_s7 + $0x48] sm:$0xf] }
 0x196   : > { %1972 = vst.msk [vmem:[#allocation2 + $0x4] sm:$0xf] %vm1970_vm10, %v1877_v43  ;;  %v1875_v47 = vpop.permute.xlu0 %1874  ;;  %v1891_v49 = vpop.permute.xlu2 %1890  ;;  %v2175_v43 = vsel %vm4912_vm6, %v2173_v33, %v2174_v37  ;;  %v2187_v48 = vrot.slane %v2185_v41, 4  ;;  %v4224_v33 = vld [vmem:[%s4726_s7 + $0x30] sm:$0xf] }
 0x197   : > { %1971 = vst.msk [vmem:[#allocation2] sm:$0xf] %vm1970_vm10, %v1875_v47  ;;  %v2193_v56 = vsel %vm4912_vm6, %v4217_v45, %v2192_v46  ;;  %v4232_v45 = vld [vmem:[%s4726_s7 + $0x60] sm:$0xf] }
 0x198   : > { %1979 = vst.msk [vmem:[#allocation2 + $0x20] sm:$0xf] %vm1970_vm10, %v1891_v49  ;;  %v2188_v49 = vrot.slane %v4194_v42, 5  ;;  %v4276_v42 = vld [vmem:[%s4726_s7 + $0x78] sm:$0xf] }
 0x19a   : > { %v2189_v58 = vsel %vm4912_vm6, %v2187_v48, %v2188_v49  ;;  %v4231_v48 = vld [vmem:[%s4726_s7 + $0x58] sm:$0xf]  ;;  %v4230_v49 = vld [vmem:[%s4726_s7 + $0x54] sm:$0xf] }
 0x19b   : > { %2239 = vrot.lane.b32.xlu1 %v2151_v50, %s4636_s12  ;;  %v4199_v50 = vld [vmem:[%s4726_s7 + $0xb8] sm:$0xf] }
 0x19c   : > { %2237 = vrot.lane.b32.xlu0 %v2147_v53, %s4636_s12  ;;  %2235 = vrot.lane.b32.xlu2 %v2144_v57, %s4636_s12  ;;  %v4216_v53 = vrot.slane %v4192_v44, 9  ;;  %v2199_v57 = vrot.slane %v4199_v50, 5 }
 0x19d   : > { %v1883_v61 = vpop.permute.xlu1 %1882 }
 0x19e   : > { %1975 = vst.msk [vmem:[#allocation2 + $0x10] sm:$0xf] %vm1970_vm10, %v1883_v61  ;;  %v1881_v63 = vpop.permute.xlu0 %1880  ;;  %v1897_v2 = vpop.permute.xlu2 %1896  ;;  %v2186_v61 = vsel %vm4912_vm6, %v4216_v53, %v2185_v41  ;;  %v2200_v8 = vsel %vm4912_vm6, %v4218_v0, %v2199_v57 }
 0x19f   : > { %1974 = vst.msk [vmem:[#allocation2 + $0xc] sm:$0xf] %vm1970_vm10, %v1881_v63  ;;  %v2201_v63 = vrot.slane %v2199_v57, 4 }
 0x1a0   : > { %1982 = vst.msk [vmem:[#allocation2 + $0x2c] sm:$0xf] %vm1970_vm10, %v1897_v2 }
 0x1a1   : > { %v2203_v7 = vsel %vm4912_vm6, %v2201_v63, %v2202_v52 }
 0x1a3   : > { %2245 = vrot.lane.b32.xlu1 %v2161_v3, %s4636_s12  ;;  %v4202_v3 = vld [vmem:[%s4726_s7 + $0xc4] sm:$0xf] }
 0x1a4   : > { %2243 = vrot.lane.b32.xlu0 %v2158_v4, %s4636_s12  ;;  %2241 = vrot.lane.b32.xlu2 %v2154_v9, %s4636_s12  ;;  %v2194_v4 = vrot.slane %v2192_v46, 4  ;;  %v2206_v9 = vrot.slane %v4202_v3, 5  ;;  %v2775_v46 = vshrl.u32 %v4276_v42, 16 }
 0x1a5   : > { %v1889_v13 = vpop.permute.xlu1 %1888 }
 0x1a6   : > { %1978 = vst.msk [vmem:[#allocation2 + $0x1c] sm:$0xf] %vm1970_vm10, %v1889_v13  ;;  %v1887_v17 = vpop.permute.xlu0 %1886  ;;  %v1903_v19 = vpop.permute.xlu2 %1902  ;;  %v2196_v11 = vsel %vm4912_vm6, %v2194_v4, %v2195_v5  ;;  %v2208_v14 = vrot.slane %v2206_v9, 4  ;;  %v2777_v50 = vrot.slane %v2775_v46, 4  ;;  %v4233_v4 = vld [vmem:[%s4726_s7 + $0x64] sm:$0xf] }
 0x1a7   : > { %1977 = vst.msk [vmem:[#allocation2 + $0x18] sm:$0xf] %vm1970_vm10, %v1887_v17  ;;  %v4219_v17 = vrot.slane %v4201_v12, 9  ;;  %v4326_v46 = vld [vmem:[%s4726_s7 + $0x80] sm:$0x1] }
 0x1a8   : > { %1985 = vst.msk [vmem:[#allocation2 + $0x38] sm:$0xf] %vm1970_vm10, %v1903_v19  ;;  %v4220_v19 = vld [vmem:[%s4726_s7 + $0x18] sm:$0xf] }
 0x1a9   : > { %v2207_v21 = vsel %vm4912_vm6, %v4219_v17, %v2206_v9 }
 0x1ab   : > { %2251 = vrot.lane.b32.xlu1 %v2172_v20, %s4636_s12  ;;  %v2210_v20 = vsel %vm4912_vm6, %v2208_v14, %v2209_v15 }
 0x1ac   : > { %2249 = vrot.lane.b32.xlu0 %v2168_v22, %s4636_s12  ;;  %2247 = vrot.lane.b32.xlu2 %v2165_v26, %s4636_s12  ;;  %v4223_v26 = vld [vmem:[%s4726_s7 + $0x28] sm:$0xf] }
 0x1ad   : > { %v1895_v31 = vpop.permute.xlu1 %1894 }
 0x1ae   : > { %1981 = vst.msk [vmem:[#allocation2 + $0x28] sm:$0xf] %vm1970_vm10, %v1895_v31  ;;  %v1893_v34 = vpop.permute.xlu0 %1892  ;;  %v1909_v35 = vpop.permute.xlu2 %1908 }
 0x1af   : > { %1980 = vst.msk [vmem:[#allocation2 + $0x24] sm:$0xf] %vm1970_vm10, %v1893_v34  ;;  %v4226_v34 = vld [vmem:[%s4726_s7 + $0x3c] sm:$0xf] }
 0x1b0   : > { %1988 = vst.msk [vmem:[#allocation2 + $0x44] sm:$0xf] %vm1970_vm10, %v1909_v35 }
 0x1b3   : > { %2257 = vrot.lane.b32.xlu1 %v2182_v30, %s4636_s12 }
 0x1b4   : > { %2255 = vrot.lane.b32.xlu0 %v2179_v38, %s4636_s12  ;;  %2253 = vrot.lane.b32.xlu2 %v2175_v43, %s4636_s12  ;;  %v4229_v38 = vld [vmem:[%s4726_s7 + $0x4c] sm:$0xf] }
 0x1b5   : > { %v1901_v47 = vpop.permute.xlu1 %1900 }
 0x1b6   : > { %1984 = vst.msk [vmem:[#allocation2 + $0x34] sm:$0xf] %vm1970_vm10, %v1901_v47  ;;  %v1899_v51 = vpop.permute.xlu0 %1898  ;;  %v1915_v54 = vpop.permute.xlu2 %1914  ;;  %v2778_v47 = vshll.u32 %v4276_v42, 16  ;;  %v4337_v42 = vld [vmem:[%s4726_s7 + $0xac] sm:$0xf] }
 0x1b7   : > { %1983 = vst.msk [vmem:[#allocation2 + $0x30] sm:$0xf] %vm1970_vm10, %v1899_v51 }
 0x1b8   : > { %1991 = vst.msk [vmem:[#allocation2 + $0x50] sm:$0xf] %vm1970_vm10, %v1915_v54  ;;  %v2780_v51 = vrot.slane %v2778_v47, 5  ;;  %v4277_v54 = vld [vmem:[%s4726_s7 + $0x7c] sm:$0xf] }
 0x1b9   : > { %v2784_v62 = vshll.u32 %v4277_v54, 16  ;;  %v2788_v3 = vshrl.u32 %v4277_v54, 16 }
 0x1bb   : > { %2263 = vrot.lane.b32.xlu1 %v2193_v56, %s4636_s12  ;;  %v4289_v56 = vld [vmem:[%s4726_s7 + $0xac] sm:$0xf]  ;;  %v2790_v14 = vrot.slane %v2788_v3, 4 }
 0x1bc   : > { %2261 = vrot.lane.b32.xlu0 %v2189_v58, %s4636_s12  ;;  %2259 = vrot.lane.b32.xlu2 %v2186_v61, %s4636_s12  ;;  %v4288_v58 = vld [vmem:[%s4726_s7 + $0xa8] sm:$0xf]  ;;  %v2781_v61 = vor.u32 %v2780_v51, %v2777_v50  ;;  %v2880_v63 = vshll.u32 %v4289_v56, 16  ;;  %v2884_v52 = vshrl.u32 %v4289_v56, 16  ;;  %v3277_v50 = vrot.slane %v4337_v42, 5 }
 0x1bd   : > { %v1907_v55 = vpop.permute.xlu1 %1906  ;;  %v2871_v0 = vshrl.u32 %v4288_v58, 16 }
 0x1be   : > { %1987 = vst.msk [vmem:[#allocation2 + $0x40] sm:$0xf] %vm1970_vm10, %v1907_v55  ;;  %v1905_v2 = vpop.permute.xlu0 %1904  ;;  %v1921_v6 = vpop.permute.xlu2 %1920  ;;  %v4236_v55 = vld [vmem:[%s4726_s7 + $0x78] sm:$0xf]  ;;  %v2782_v5 = vrot.slane %v2781_v61, 4 }
 0x1bf   : > { %1986 = vst.msk [vmem:[#allocation2 + $0x3c] sm:$0xf] %vm1970_vm10, %v1905_v2  ;;  %v2874_v2 = vshll.u32 %v4288_v58, 16  ;;  %v4254_v58 = vld [vmem:[%s4726_s7 + $0x20] sm:$0x1] }
 0x1c0   : > { %1994 = vst.msk [vmem:[#allocation2 + $0x5c] sm:$0xf] %vm1970_vm10, %v1921_v6  ;;  %v2786_v6 = vrot.slane %v2784_v62, 5  ;;  %v2602_v3 = vshll.u32 %v4254_v58, 16 }
 0x1c1   : > { %v2876_v12 = vrot.slane %v2874_v2, 5 }
 0x1c2   : > { %v2787_v17 = vsel %vm4737_vm2, %v2782_v5, %v2786_v6 }
 0x1c3   : > { %2269 = vrot.lane.b32.xlu1 %v2203_v7, %s4636_s12  ;;  %v2882_v7 = vrot.slane %v2880_v63, 5  ;;  %v4265_v63 = vld [vmem:[%s4726_s7 + $0x4c] sm:$0xf] }
 0x1c4   : > { %2267 = vrot.lane.b32.xlu0 %v2200_v8, %s4636_s12  ;;  %2265 = vrot.lane.b32.xlu2 %v2196_v11, %s4636_s12  ;;  %v2886_v8 = vrot.slane %v2884_v52, 4  ;;  %v2873_v11 = vrot.slane %v2871_v0, 4 }
 0x1c5   : > { %v1913_v13 = vpop.permute.xlu1 %1912 }
 0x1c6   : > { %1990 = vst.msk [vmem:[#allocation2 + $0x4c] sm:$0xf] %vm1970_vm10, %v1913_v13  ;;  %v1911_v16 = vpop.permute.xlu0 %1910  ;;  %v1927_v18 = vpop.permute.xlu2 %1926 }
 0x1c7   : > { %1989 = vst.msk [vmem:[#allocation2 + $0x48] sm:$0xf] %vm1970_vm10, %v1911_v16  ;;  %v4278_v16 = vld [vmem:[%s4726_s7 + $0x80] sm:$0x1] }
 0x1c8   : > { %1997 = vst.msk [vmem:[#allocation2 + $0x68] sm:$0xf] %vm1970_vm10, %v1927_v18  ;;  %v2887_v18 = vor.u32 %v2886_v8, %v2882_v7 }
 0x1cb   : > { %2405 = vrot.lane.b32.xlu1 %v4220_v19, %s4637_s13  ;;  %v2890_v19 = vshll.u32 %v4290_v10, 16 }
 0x1cc   : > { %2273 = vrot.lane.b32.xlu0 %v2210_v20, %s4636_s12  ;;  %2271 = vrot.lane.b32.xlu2 %v2207_v21, %s4636_s12  ;;  %v4245_v20 = vld [vmem:[%s4726_s7 + $0xac] sm:$0xf]  ;;  %v2877_v21 = vor.u32 %v2876_v12, %v2873_v11  ;;  %v4338_v11 = vld [vmem:[%s4726_s7 + $0xb0] sm:$0x1]  ;;  %s4058_s12 = sshll.u32 %s256_s8, 8 }
 0x1cd   : > { %v1919_v22 = vpop.permute.xlu1 %1918 }
 0x1ce   : > { %1993 = vst.msk [vmem:[#allocation2 + $0x58] sm:$0xf] %vm1970_vm10, %v1919_v22  ;;  %v1917_v23 = vpop.permute.xlu0 %1916  ;;  %v1933_v24 = vpop.permute.xlu2 %1932  ;;  %v4244_v22 = vld [vmem:[%s4726_s7 + $0xa8] sm:$0xf] }
 0x1cf   : > { %1992 = vst.msk [vmem:[#allocation2 + $0x54] sm:$0xf] %vm1970_vm10, %v1917_v23  ;;  %v2791_v23 = vor.u32 %v2790_v14, %v2786_v6  ;;  %v2688_v6 = vshll.u32 %v4265_v63, 16 }
 0x1d0   : > { %2000 = vst.msk [vmem:[#allocation2 + $0x74] sm:$0xf] %vm1970_vm10, %v1933_v24  ;;  %v2794_v24 = vshll.u32 %v4278_v16, 16  ;;  %v4266_v16 = vld [vmem:[%s4726_s7 + $0x50] sm:$0x1] }
 0x1d3   : > { %2411 = vrot.lane.b32.xlu1 %v4223_v26, %s4637_s13  ;;  %v2888_v26 = vrot.slane %v2887_v18, 4 }
 0x1d4   : > { %2409 = vrot.lane.b32.xlu0 %v4222_v27, %s4637_s13  ;;  %2407 = vrot.lane.b32.xlu2 %v4221_v28, %s4637_s13  ;;  %v2892_v27 = vrot.slane %v2890_v19, 5 }
 0x1d5   : > { %v1925_v29 = vpop.permute.xlu1 %1924 }
 0x1d6   : > { %1996 = vst.msk [vmem:[#allocation2 + $0x64] sm:$0xf] %vm1970_vm10, %v1925_v29  ;;  %v1923_v31 = vpop.permute.xlu0 %1922  ;;  %v2212_v32 = vpop.permute.xlu2 %2211  ;;  %v2878_v29 = vrot.slane %v2877_v21, 4  ;;  %v3280_v21 = vrot.slane %v4338_v11, 5  ;;  %v4292_v11 = vld [vmem:[%s4726_s7 + $0xb8] sm:$0xf] }
 0x1d7   : > { %1995 = vst.msk [vmem:[#allocation2 + $0x60] sm:$0xf] %vm1970_vm10, %v1923_v31  ;;  %v4325_v31 = vld [vmem:[%s4726_s7 + $0x7c] sm:$0xf] }
 0x1d8   : > { %2308 = vst.msk [vmem:[#allocation2] sm:$0xf] %vm2307_vm11, %v2212_v32  ;;  %v4253_v32 = vld [vmem:[%s4726_s7 + $0x1c] sm:$0xf] }
 0x1db   : > { %2417 = vrot.lane.b32.xlu1 %v4226_v34, %s4637_s13 }
 0x1dc   : > { %2415 = vrot.lane.b32.xlu0 %v4225_v36, %s4637_s13  ;;  %2413 = vrot.lane.b32.xlu2 %v4224_v33, %s4637_s13  ;;  %v2792_v36 = vrot.slane %v2791_v23, 4  ;;  %v2796_v33 = vrot.slane %v2794_v24, 5 }
 0x1dd   : > { %v1931_v37 = vpop.permute.xlu1 %1930 }
 0x1de   : > { %1999 = vst.msk [vmem:[#allocation2 + $0x70] sm:$0xf] %vm1970_vm10, %v1931_v37  ;;  %v1929_v35 = vpop.permute.xlu0 %1928  ;;  %v2218_v30 = vpop.permute.xlu2 %2217  ;;  %v4252_v37 = vld [vmem:[%s4726_s7 + $0x18] sm:$0xf]  ;;  %v2797_v47 = vsel %vm4737_vm2, %v2792_v36, %v2796_v33 }
 0x1df   : > { %1998 = vst.msk [vmem:[#allocation2 + $0x6c] sm:$0xf] %vm1970_vm10, %v1929_v35 }
 0x1e0   : > { %2311 = vst.msk [vmem:[#allocation2 + $0xc] sm:$0xf] %vm2307_vm11, %v2218_v30  ;;  %v2893_v30 = vsel %vm4737_vm2, %v2888_v26, %v2892_v27 }
 0x1e3   : > { %2423 = vrot.lane.b32.xlu1 %v4229_v38, %s4637_s13  ;;  %v4336_v38 = vld [vmem:[%s4726_s7 + $0xa8] sm:$0xe] }
 0x1e4   : > { %2421 = vrot.lane.b32.xlu0 %v4228_v39, %s4637_s13  ;;  %2419 = vrot.lane.b32.xlu2 %v4227_v40, %s4637_s13  ;;  %v2592_v39 = vshll.u32 %v4253_v32, 16  ;;  %v2596_v40 = vshrl.u32 %v4253_v32, 16  ;;  %v2698_v32 = vshll.u32 %v4266_v16, 16 }
 0x1e5   : > { %v1937_v41 = vpop.permute.xlu1 %1936 }
 0x1e6   : > { %2002 = vst.msk [vmem:[#allocation2 + $0x7c] sm:$0xf] %vm1970_vm10, %v1937_v41  ;;  %v1935_v43 = vpop.permute.xlu0 %1934  ;;  %v2224_v44 = vpop.permute.xlu2 %2223  ;;  %v2883_v41 = vsel %vm4737_vm2, %v2878_v29, %v2882_v7  ;;  %v2594_v51 = vrot.slane %v2592_v39, 5  ;;  %v2692_v7 = vshrl.u32 %v4265_v63, 16  ;;  %v4301_v29 = vld [vmem:[%s4726_s7 + $0x1c] sm:$0xf] }
 0x1e7   : > { %2001 = vst.msk [vmem:[#allocation2 + $0x78] sm:$0xf] %vm1970_vm10, %v1935_v43  ;;  %v3249_v43 = vrot.slane %v4325_v31, 5  ;;  %v4313_v39 = vld [vmem:[%s4726_s7 + $0x4c] sm:$0xf] }
 0x1e8   : > { %2314 = vst.msk [vmem:[#allocation2 + $0x18] sm:$0xf] %vm2307_vm11, %v2224_v44  ;;  %v2583_v44 = vshrl.u32 %v4252_v37, 16  ;;  %v2694_v18 = vrot.slane %v2692_v7, 4  ;;  %v4281_v7 = vld [vmem:[%s4726_s7 + $0x8c] sm:$0x1] }
 0x1e9   : > { %v3251_v56 = vrot.slane %v3249_v43, 4  ;;  %v2818_v16 = vshll.u32 %v4281_v7, 16 }
 0x1eb   : > { %2429 = vrot.lane.b32.xlu1 %v4232_v45, %s4637_s13  ;;  %v2586_v45 = vshll.u32 %v4252_v37, 16  ;;  %v3193_v37 = vrot.slane %v4301_v29, 5 }
 0x1ec   : > { %2427 = vrot.lane.b32.xlu0 %v4231_v48, %s4637_s13  ;;  %2425 = vrot.lane.b32.xlu2 %v4230_v49, %s4637_s13  ;;  %v4324_v48 = vld [vmem:[%s4726_s7 + $0x78] sm:$0xe]  ;;  %v4360_v49 = vrot.slane %v4336_v38, 9  ;;  %v2700_v38 = vrot.slane %v2698_v32, 5 }
 0x1ed   : > { %v2216_v53 = vpop.permute.xlu1 %2215  ;;  %v4356_v62 = vrot.slane %v4324_v48, 9  ;;  %v3195_v58 = vrot.slane %v3193_v37, 4 }
 0x1ee   : > { %2310 = vst.msk [vmem:[#allocation2 + $0x8] sm:$0xf] %vm2307_vm11, %v2216_v53  ;;  %v2214_v57 = vpop.permute.xlu0 %2213  ;;  %v2230_v60 = vpop.permute.xlu2 %2229  ;;  %v2598_v53 = vrot.slane %v2596_v40, 4  ;;  %v3278_v0 = vsel %vm4912_vm6, %v4360_v49, %v3277_v50  ;;  %v4302_v49 = vld [vmem:[%s4726_s7 + $0x20] sm:$0x1] }
 0x1ef   : > { %2309 = vst.msk [vmem:[#allocation2 + $0x4] sm:$0xf] %vm2307_vm11, %v2214_v57  ;;  %v3252_v57 = vrot.slane %v4326_v46, 5  ;;  %v3250_v8 = vsel %vm4912_vm6, %v4356_v62, %v3249_v43  ;;  %v4314_v46 = vld [vmem:[%s4726_s7 + $0x50] sm:$0x1] }
 0x1f0   : > { %2317 = vst.msk [vmem:[#allocation2 + $0x24] sm:$0xf] %vm2307_vm11, %v2230_v60  ;;  %v2588_v60 = vrot.slane %v2586_v45, 5  ;;  %v2599_v2 = vor.u32 %v2598_v53, %v2594_v51 }
 0x1f2   : > { %v2600_v12 = vrot.slane %v2599_v2, 4 }
 0x1f3   : > { %2439 = vrot.lane.b32.xlu1 %v4237_v59, %s4637_s13  ;;  %v2585_v59 = vrot.slane %v2583_v44, 4  ;;  %v3221_v44 = vrot.slane %v4313_v39, 5  ;;  %v4328_v39 = vld [vmem:[%s4726_s7 + $0x88] sm:$0xf] }
 0x1f4   : > { %2437 = vrot.lane.b32.xlu0 %v4236_v55, %s4637_s13  ;;  %2431 = vrot.lane.b32.xlu2 %v4233_v4, %s4637_s13  ;;  %v4264_v55 = vld [vmem:[%s4726_s7 + $0x48] sm:$0xf]  ;;  %v3253_v4 = vsel %vm4912_vm6, %v3251_v56, %v3252_v57 }
 0x1f5   : > { %v2222_v9 = vpop.permute.xlu1 %2221  ;;  %v2589_v5 = vor.u32 %v2588_v60, %v2585_v59  ;;  %v2682_v10 = vshll.u32 %v4264_v55, 16  ;;  %v4280_v56 = vld [vmem:[%s4726_s7 + $0x88] sm:$0xf]  ;;  %v3196_v59 = vrot.slane %v4302_v49, 5  ;;  %v4279_v60 = vld [vmem:[%s4726_s7 + $0x84] sm:$0xf] }
 0x1f6   : > { %2313 = vst.msk [vmem:[#allocation2 + $0x14] sm:$0xf] %vm2307_vm11, %v2222_v9  ;;  %v2220_v13 = vpop.permute.xlu0 %2219  ;;  %v2236_v15 = vpop.permute.xlu2 %2235  ;;  %v2679_v9 = vshrl.u32 %v4264_v55, 16  ;;  %v2808_v63 = vshll.u32 %v4280_v56, 16  ;;  %v2802_v2 = vshll.u32 %v4279_v60, 16 }
 0x1f7   : > { %2312 = vst.msk [vmem:[#allocation2 + $0x10] sm:$0xf] %vm2307_vm11, %v2220_v13  ;;  %v2604_v13 = vrot.slane %v2602_v3, 5  ;;  %v2684_v23 = vrot.slane %v2682_v10, 5  ;;  %v3197_v3 = vsel %vm4912_vm6, %v3195_v58, %v3196_v59  ;;  %v4340_v49 = vld [vmem:[%s4726_s7 + $0xb8] sm:$0xf] }
 0x1f8   : > { %2320 = vst.msk [vmem:[#allocation2 + $0x30] sm:$0xf] %vm2307_vm11, %v2236_v15  ;;  %v2590_v15 = vrot.slane %v2589_v5, 4  ;;  %v4255_v58 = vld [vmem:[%s4726_s7 + $0x24] sm:$0xf] }
 0x1f9   : > { %v2605_v26 = vsel %vm4737_vm2, %v2600_v12, %v2604_v13  ;;  %v4291_v13 = vld [vmem:[%s4726_s7 + $0xb4] sm:$0xf] }
 0x1fa   : > { %v2595_v27 = vsel %vm4737_vm2, %v2590_v15, %v2594_v51  ;;  %v3224_v51 = vrot.slane %v4314_v46, 5 }
 0x1fb   : > { %2998 = vrot.lane.b32.xlu1 %v2787_v17, %s4638_s14  ;;  %v2690_v17 = vrot.slane %v2688_v6, 5 }
 0x1fc   : > { %2455 = vrot.lane.b32.xlu0 %v4245_v20, %s4637_s13  ;;  %2453 = vrot.lane.b32.xlu2 %v4244_v22, %s4637_s13  ;;  %v3279_v20 = vrot.slane %v3277_v50, 4  ;;  %v2681_v22 = vrot.slane %v2679_v9, 4  ;;  %v3223_v50 = vrot.slane %v3221_v44, 4  ;;  %v2804_v9 = vrot.slane %v2802_v2, 5 }
 0x1fd   : > { %v2228_v28 = vpop.permute.xlu1 %2227  ;;  %v2695_v31 = vor.u32 %v2694_v18, %v2690_v17 }
 0x1fe   : > { %2316 = vst.msk [vmem:[#allocation2 + $0x20] sm:$0xf] %vm2307_vm11, %v2228_v28  ;;  %v2226_v34 = vpop.permute.xlu0 %2225  ;;  %v2242_v35 = vpop.permute.xlu2 %2241  ;;  %v4300_v28 = vld [vmem:[%s4726_s7 + $0x18] sm:$0xe]  ;;  %v2685_v36 = vor.u32 %v2684_v23, %v2681_v22  ;;  %v3225_v62 = vsel %vm4912_vm6, %v3223_v50, %v3224_v51  ;;  %v2895_v22 = vshrl.u32 %v4291_v13, 16  ;;  %v2898_v23 = vshll.u32 %v4291_v13, 16 }
 0x1ff   : > { %2315 = vst.msk [vmem:[#allocation2 + $0x1c] sm:$0xf] %vm2307_vm11, %v2226_v34  ;;  %v3281_v34 = vsel %vm4912_vm6, %v3279_v20, %v3280_v21  ;;  %v4348_v33 = vrot.slane %v4300_v28, 9  ;;  %v2908_v20 = vshrl.u32 %v4292_v11, 16  ;;  %v4238_v21 = vld [vmem:[%s4726_s7 + $0x84] sm:$0xf] }
 0x200   : > { %2323 = vst.msk [vmem:[#allocation2 + $0x3c] sm:$0xf] %vm2307_vm11, %v2242_v35  ;;  %v4267_v50 = vld [vmem:[%s4726_s7 + $0x54] sm:$0xf]  ;;  %v4257_v13 = vld [vmem:[%s4726_s7 + $0x2c] sm:$0x1] }
 0x201   : > { %v3194_v43 = vsel %vm4912_vm6, %v4348_v33, %v3193_v37  ;;  %v2900_v33 = vrot.slane %v2898_v23, 5 }
 0x203   : > { %3016 = vrot.lane.b32.xlu1 %v2893_v30, %s4638_s14  ;;  %v2696_v30 = vrot.slane %v2695_v31, 4  ;;  %v2910_v31 = vrot.slane %v2908_v20, 4 }
 0x204   : > { %3014 = vrot.lane.b32.xlu0 %v2883_v41, %s4638_s14  ;;  %3000 = vrot.lane.b32.xlu2 %v2797_v47, %s4638_s14  ;;  %v2686_v41 = vrot.slane %v2685_v36, 4  ;;  %v4312_v47 = vld [vmem:[%s4726_s7 + $0x48] sm:$0xe]  ;;  %v2897_v36 = vrot.slane %v2895_v22, 4 }
 0x205   : > { %v2234_v54 = vpop.permute.xlu1 %2233  ;;  %v2701_v45 = vsel %vm4737_vm2, %v2696_v30, %v2700_v38  ;;  %v4327_v38 = vld [vmem:[%s4726_s7 + $0x84] sm:$0xe] }
 0x206   : > { %2319 = vst.msk [vmem:[#allocation2 + $0x2c] sm:$0xf] %vm2307_vm11, %v2234_v54  ;;  %v2232_v61 = vpop.permute.xlu0 %2231  ;;  %v2248_v52 = vpop.permute.xlu2 %2247  ;;  %v2691_v48 = vsel %vm4737_vm2, %v2686_v41, %v2690_v17  ;;  %v4352_v54 = vrot.slane %v4312_v47, 9  ;;  %v4239_v17 = vld [vmem:[%s4726_s7 + $0x88] sm:$0xf] }
 0x207   : > { %2318 = vst.msk [vmem:[#allocation2 + $0x28] sm:$0xf] %vm2307_vm11, %v2232_v61 }
 0x208   : > { %2326 = vst.msk [vmem:[#allocation2 + $0x48] sm:$0xf] %vm2307_vm11, %v2248_v52  ;;  %v2812_v52 = vshrl.u32 %v4280_v56, 16  ;;  %v3222_v55 = vsel %vm4912_vm6, %v4352_v54, %v3221_v44  ;;  %v4357_v44 = vrot.slane %v4327_v38, 9  ;;  %v4256_v54 = vld [vmem:[%s4726_s7 + $0x28] sm:$0xf] }
 0x209   : > { %v4341_v56 = vld [vmem:[%s4726_s7 + $0xbc] sm:$0x1] }
 0x20a   : > { %v2814_v5 = vrot.slane %v2812_v52, 4  ;;  %v4339_v52 = vld [vmem:[%s4726_s7 + $0xb4] sm:$0xe] }
 0x20b   : > { %3351 = vrot.lane.b32.xlu1 %v3278_v0, %s4639_s21  ;;  %v2799_v0 = vshrl.u32 %v4279_v60, 16  ;;  %v3284_v60 = vrot.slane %v4340_v49, 5 }
 0x20c   : > { %3337 = vrot.lane.b32.xlu0 %v3253_v4, %s4639_s21  ;;  %3335 = vrot.lane.b32.xlu2 %v3250_v8, %s4639_s21  ;;  %v2810_v4 = vrot.slane %v2808_v63, 5 }
 0x20d   : > { %v2240_v14 = vpop.permute.xlu1 %2239  ;;  %v2801_v8 = vrot.slane %v2799_v0, 4  ;;  %v2620_v0 = vshrl.u32 %v4256_v54, 16  ;;  %v3286_v7 = vrot.slane %v3284_v60, 4 }
 0x20e   : > { %2322 = vst.msk [vmem:[#allocation2 + $0x38] sm:$0xf] %vm2307_vm11, %v2240_v14  ;;  %v2238_v19 = vpop.permute.xlu0 %2237  ;;  %v2254_v24 = vpop.permute.xlu2 %2253  ;;  %v4246_v14 = vld [vmem:[%s4726_s7 + $0xb4] sm:$0xf]  ;;  %v2815_v15 = vor.u32 %v2814_v5, %v2810_v4  ;;  %v3287_v5 = vrot.slane %v4341_v56, 5 }
 0x20f   : > { %2321 = vst.msk [vmem:[#allocation2 + $0x34] sm:$0xf] %vm2307_vm11, %v2238_v19  ;;  %v2805_v18 = vor.u32 %v2804_v9, %v2801_v8  ;;  %v2904_v19 = vshll.u32 %v4292_v11, 16  ;;  %v4361_v8 = vrot.slane %v4339_v52, 9 }
 0x210   : > { %2329 = vst.msk [vmem:[#allocation2 + $0x54] sm:$0xf] %vm2307_vm11, %v2254_v24  ;;  %v2816_v24 = vrot.slane %v2815_v15, 4  ;;  %v2622_v15 = vrot.slane %v2620_v0, 4  ;;  %v3288_v22 = vsel %vm4912_vm6, %v3286_v7, %v3287_v5 }
 0x211   : > { %v2806_v28 = vrot.slane %v2805_v18, 4  ;;  %v2906_v29 = vrot.slane %v2904_v19, 5 }
 0x213   : > { %2968 = vrot.lane.b32.xlu1 %v2605_v26, %s4638_s14  ;;  %v2820_v26 = vrot.slane %v2818_v16, 5  ;;  %v2811_v30 = vsel %vm4737_vm2, %v2806_v28, %v2810_v4  ;;  %v2610_v4 = vshll.u32 %v4255_v58, 16  ;;  %v2626_v28 = vshll.u32 %v4257_v13, 16 }
 0x214   : > { %2966 = vrot.lane.b32.xlu0 %v2595_v27, %s4638_s14  ;;  %3353 = vrot.lane.b32.xlu2 %v3281_v34, %s4639_s21  ;;  %v4293_v34 = vld [vmem:[%s4726_s7 + $0xbc] sm:$0x1] }
 0x215   : > { %v2246_v35 = vpop.permute.xlu1 %2245  ;;  %v2914_v41 = vshll.u32 %v4293_v34, 16  ;;  %v2612_v20 = vrot.slane %v2610_v4, 5 }
 0x216   : > { %2325 = vst.msk [vmem:[#allocation2 + $0x44] sm:$0xf] %vm2307_vm11, %v2246_v35  ;;  %v2244_v40 = vpop.permute.xlu0 %2243  ;;  %v2260_v42 = vpop.permute.xlu2 %2259  ;;  %v2821_v35 = vsel %vm4737_vm2, %v2816_v24, %v2820_v26  ;;  %v3285_v26 = vsel %vm4912_vm6, %v4361_v8, %v3284_v60 }
 0x217   : > { %2324 = vst.msk [vmem:[#allocation2 + $0x40] sm:$0xf] %vm2307_vm11, %v2244_v40  ;;  %v2911_v40 = vor.u32 %v2910_v31, %v2906_v29 }
 0x218   : > { %2332 = vst.msk [vmem:[#allocation2 + $0x60] sm:$0xf] %vm2307_vm11, %v2260_v42  ;;  %v4247_v42 = vld [vmem:[%s4726_s7 + $0xb8] sm:$0xf] }
 0x219   : > { %v2912_v47 = vrot.slane %v2911_v40, 4 }
 0x21b   : > { %3303 = vrot.lane.b32.xlu1 %v3194_v43, %s4639_s21  ;;  %v2901_v43 = vor.u32 %v2900_v33, %v2897_v36 }
 0x21c   : > { %2984 = vrot.lane.b32.xlu0 %v2701_v45, %s4638_s14  ;;  %2982 = vrot.lane.b32.xlu2 %v2691_v48, %s4638_s14  ;;  %v3256_v45 = vrot.slane %v4328_v39, 5  ;;  %v2916_v48 = vrot.slane %v2914_v41, 5 }
 0x21d   : > { %v2252_v53 = vpop.permute.xlu1 %2251 }
 0x21e   : > { %2328 = vst.msk [vmem:[#allocation2 + $0x50] sm:$0xf] %vm2307_vm11, %v2252_v53  ;;  %v2250_v57 = vpop.permute.xlu0 %2249  ;;  %v2266_v61 = vpop.permute.xlu2 %2265  ;;  %v2902_v53 = vrot.slane %v2901_v43, 4  ;;  %v3257_v59 = vsel %vm4912_vm6, %v4357_v44, %v3256_v45  ;;  %v2917_v63 = vsel %vm4737_vm2, %v2912_v47, %v2916_v48  ;;  %v4303_v47 = vld [vmem:[%s4726_s7 + $0x24] sm:$0xe] }
 0x21f   : > { %2327 = vst.msk [vmem:[#allocation2 + $0x4c] sm:$0xf] %vm2307_vm11, %v2250_v57  ;;  %v4349_v56 = vrot.slane %v4303_v47, 9  ;;  %v4473_v47 = vld [vmem:[%s6295_s1] sm:$0xff] }
 0x220   : > { %2335 = vst.msk [vmem:[#allocation2 + $0x6c] sm:$0xf] %vm2307_vm11, %v2266_v61  ;;  %v2703_v61 = vshrl.u32 %v4267_v50, 16  ;;  %v2907_v2 = vsel %vm4737_vm2, %v2902_v53, %v2906_v29 }
 0x222   : > { %v2705_v9 = vrot.slane %v2703_v61, 4 }
 0x223   : > { %3321 = vrot.lane.b32.xlu1 %v3225_v62, %s4639_s21  ;;  %v2706_v62 = vshll.u32 %v4267_v50, 16 }
 0x224   : > { %3319 = vrot.lane.b32.xlu0 %v3222_v55, %s4639_s21  ;;  %3305 = vrot.lane.b32.xlu2 %v3197_v3, %s4639_s21  ;;  %v2616_v55 = vshll.u32 %v4256_v54, 16  ;;  %v2607_v3 = vshrl.u32 %v4255_v58, 16  ;;  %v4316_v58 = vld [vmem:[%s4726_s7 + $0x58] sm:$0xf] }
 0x225   : > { %v2258_v6 = vpop.permute.xlu1 %2257  ;;  %v3228_v52 = vrot.slane %v4316_v58, 5 }
 0x226   : > { %2331 = vst.msk [vmem:[#allocation2 + $0x5c] sm:$0xf] %vm2307_vm11, %v2258_v6  ;;  %v2256_v10 = vpop.permute.xlu0 %2255  ;;  %v2272_v12 = vpop.permute.xlu2 %2271  ;;  %v4329_v6 = vld [vmem:[%s4726_s7 + $0x8c] sm:$0x1]  ;;  %v2609_v19 = vrot.slane %v2607_v3, 4 }
 0x227   : > { %2330 = vst.msk [vmem:[#allocation2 + $0x58] sm:$0xf] %vm2307_vm11, %v2256_v10  ;;  %v2708_v10 = vrot.slane %v2706_v62, 5  ;;  %v3259_v18 = vrot.slane %v4329_v6, 5  ;;  %v3230_v4 = vrot.slane %v3228_v52, 4 }
 0x228   : > { %2338 = vst.msk [vmem:[#allocation2 + $0x78] sm:$0xf] %vm2307_vm11, %v2272_v12  ;;  %v4268_v12 = vld [vmem:[%s4726_s7 + $0x58] sm:$0xf]  ;;  %v4294_v6 = vld [vmem:[%s4726_s7 + $0xc0] sm:$0xf] }
 0x229   : > { %v2709_v23 = vor.u32 %v2708_v10, %v2705_v9  ;;  %v2712_v24 = vshll.u32 %v4268_v12, 16  ;;  %v2716_v29 = vshrl.u32 %v4268_v12, 16  ;;  %v4283_v9 = vld [vmem:[%s4726_s7 + $0x94] sm:$0xf]  ;;  %v4240_v12 = vld [vmem:[%s4726_s7 + $0x90] sm:$0xf] }
 0x22a   : > { %v2919_v13 = vshrl.u32 %v4294_v6, 16 }
 0x22b   : > { %2457 = vrot.lane.b32.xlu1 %v4246_v14, %s4637_s13  ;;  %v2618_v14 = vrot.slane %v2616_v55, 5  ;;  %v2710_v34 = vrot.slane %v2709_v23, 4  ;;  %v2714_v36 = vrot.slane %v2712_v24, 5  ;;  %v2718_v40 = vrot.slane %v2716_v29, 4  ;;  %v4317_v55 = vld [vmem:[%s4726_s7 + $0x5c] sm:$0x1] }
 0x22c   : > { %2443 = vrot.lane.b32.xlu0 %v4239_v17, %s4637_s13  ;;  %2441 = vrot.lane.b32.xlu2 %v4238_v21, %s4637_s13  ;;  %v3258_v17 = vrot.slane %v3256_v45, 4  ;;  %v3231_v5 = vrot.slane %v4317_v55, 5  ;;  %v2921_v23 = vrot.slane %v2919_v13, 4  ;;  %v4284_v29 = vld [vmem:[%s4726_s7 + $0x98] sm:$0x1] }
 0x22d   : > { %v2264_v27 = vpop.permute.xlu1 %2263  ;;  %v2715_v43 = vsel %vm4737_vm2, %v2710_v34, %v2714_v36  ;;  %v2719_v49 = vor.u32 %v2718_v40, %v2714_v36  ;;  %v4259_v13 = vld [vmem:[%s4726_s7 + $0x34] sm:$0xf] }
 0x22e   : > { %2334 = vst.msk [vmem:[#allocation2 + $0x68] sm:$0xf] %vm2307_vm11, %v2264_v27  ;;  %v2262_v32 = vpop.permute.xlu0 %2261  ;;  %v2408_v37 = vpop.permute.xlu2 %2407  ;;  %v2623_v27 = vor.u32 %v2622_v15, %v2618_v14  ;;  %v3260_v31 = vsel %vm4912_vm6, %v3258_v17, %v3259_v18  ;;  %v3232_v15 = vsel %vm4912_vm6, %v3230_v4, %v3231_v5  ;;  %v2836_v17 = vshrl.u32 %v4283_v9, 16  ;;  %v3468_v18 = vld [vmem:[%s6295_s1 + $0x10] sm:$0x3] }
 0x22f   : > { %2333 = vst.msk [vmem:[#allocation2 + $0x64] sm:$0xf] %vm2307_vm11, %v2262_v32  ;;  %v2613_v32 = vor.u32 %v2612_v20, %v2609_v19 }
 0x230   : > { %2503 = vst.msk [vmem:[#allocation2 + $0x4] sm:$0xf] %vm2501_vm12, %v2408_v37  ;;  %v2624_v37 = vrot.slane %v2623_v27, 4 }
 0x231   : > { %v2614_v39 = vrot.slane %v2613_v32, 4  ;;  %v2838_v32 = vrot.slane %v2836_v17, 4 }
 0x233   : > { %3004 = vrot.lane.b32.xlu1 %v2821_v35, %s4638_s14  ;;  %v2628_v35 = vrot.slane %v2626_v28, 5  ;;  %v2619_v48 = vsel %vm4737_vm2, %v2614_v39, %v2618_v14  ;;  %v2922_v14 = vshll.u32 %v4294_v6, 16  ;;  %v4295_v28 = vld [vmem:[%s4726_s7 + $0xc4] sm:$0xf] }
 0x234   : > { %3002 = vrot.lane.b32.xlu0 %v2811_v30, %s4638_s14  ;;  %2459 = vrot.lane.b32.xlu2 %v4247_v42, %s4637_s13  ;;  %v4304_v30 = vld [vmem:[%s4726_s7 + $0x28] sm:$0xf]  ;;  %v4269_v42 = vld [vmem:[%s4726_s7 + $0x5c] sm:$0x1]  ;;  %v2928_v40 = vshll.u32 %v4295_v28, 16 }
 0x235   : > { %v2270_v46 = vpop.permute.xlu1 %2269  ;;  %v3200_v44 = vrot.slane %v4304_v30, 5  ;;  %v2629_v45 = vsel %vm4737_vm2, %v2624_v37, %v2628_v35  ;;  %v2722_v50 = vshll.u32 %v4269_v42, 16  ;;  %v2924_v24 = vrot.slane %v2922_v14, 5  ;;  %v4474_v30 = vld [vmem:[%s6295_s1 + $0x8] sm:$0xff]  ;;  %v4343_v14 = vld [vmem:[%s4726_s7 + $0xc4] sm:$0xf] }
 0x236   : > { %2337 = vst.msk [vmem:[#allocation2 + $0x74] sm:$0xf] %vm2307_vm11, %v2270_v46  ;;  %v2268_v51 = vpop.permute.xlu0 %2267  ;;  %v2414_v57 = vpop.permute.xlu2 %2413  ;;  %v4305_v46 = vld [vmem:[%s4726_s7 + $0x2c] sm:$0x1] }
 0x237   : > { %2336 = vst.msk [vmem:[#allocation2 + $0x70] sm:$0xf] %vm2307_vm11, %v2268_v51  ;;  %v3202_v51 = vrot.slane %v3200_v44, 4  ;;  %v3203_v53 = vrot.slane %v4305_v46, 5  ;;  %v2724_v60 = vrot.slane %v2722_v50, 5  ;;  %v2925_v39 = vor.u32 %v2924_v24, %v2921_v23 }
 0x238   : > { %2506 = vst.msk [vmem:[#allocation2 + $0x10] sm:$0xf] %vm2501_vm12, %v2414_v57  ;;  %v4331_v50 = vld [vmem:[%s4726_s7 + $0x94] sm:$0xf]  ;;  %v2640_v23 = vshll.u32 %v4259_v13, 16 }
 0x239   : > { %v3204_v62 = vsel %vm4912_vm6, %v3202_v51, %v3203_v53 }
 0x23b   : > { %3339 = vrot.lane.b32.xlu1 %v3257_v59, %s4639_s21  ;;  %v2720_v59 = vrot.slane %v2719_v49, 4  ;;  %v2930_v49 = vrot.slane %v2928_v40, 5 }
 0x23c   : > { %3020 = vrot.lane.b32.xlu0 %v2917_v63, %s4638_s14  ;;  %3018 = vrot.lane.b32.xlu2 %v2907_v2, %s4638_s14  ;;  %v3201_v63 = vsel %vm4912_vm6, %v4349_v56, %v3200_v44  ;;  %v4315_v2 = vld [vmem:[%s4726_s7 + $0x54] sm:$0xe]  ;;  %v2932_v44 = vshrl.u32 %v4295_v28, 16  ;;  %v4258_v56 = vld [vmem:[%s4726_s7 + $0x30] sm:$0xf]  ;;  %v3291_v28 = vrot.slane %v4343_v14, 5 }
 0x23d   : > { %v2406_v11 = vpop.permute.xlu1 %2405  ;;  %v2725_v0 = vsel %vm4737_vm2, %v2720_v59, %v2724_v60  ;;  %v4353_v8 = vrot.slane %v4315_v2, 9  ;;  %v3263_v60 = vrot.slane %v4331_v50, 5  ;;  %v2631_v55 = vshrl.u32 %v4258_v56, 16 }
 0x23e   : > { %2502 = vst.msk [vmem:[#allocation2] sm:$0xf] %vm2501_vm12, %v2406_v11  ;;  %v2274_v16 = vpop.permute.xlu0 %2273  ;;  %v2420_v21 = vpop.permute.xlu2 %2419  ;;  %v4282_v11 = vld [vmem:[%s4726_s7 + $0x90] sm:$0xf]  ;;  %v2934_v59 = vrot.slane %v2932_v44, 4  ;;  %v3293_v40 = vrot.slane %v3291_v28, 4 }
 0x23f   : > { %2339 = vst.msk [vmem:[#allocation2 + $0x7c] sm:$0xf] %vm2307_vm11, %v2274_v16  ;;  %v2832_v16 = vshll.u32 %v4283_v9, 16  ;;  %v3229_v19 = vsel %vm4912_vm6, %v4353_v8, %v3228_v52  ;;  %v2823_v20 = vshrl.u32 %v4282_v11, 16  ;;  %v4332_v52 = vld [vmem:[%s4726_s7 + $0x98] sm:$0x1] }
 0x240   : > { %2509 = vst.msk [vmem:[#allocation2 + $0x1c] sm:$0xf] %vm2501_vm12, %v2420_v21  ;;  %v2826_v21 = vshll.u32 %v4282_v11, 16  ;;  %v2935_v5 = vor.u32 %v2934_v59, %v2930_v49  ;;  %v3266_v8 = vrot.slane %v4332_v52, 5 }
 0x241   : > { %v2825_v36 = vrot.slane %v2823_v20, 4 }
 0x242   : > { %v2936_v17 = vrot.slane %v2935_v5, 4 }
 0x243   : > { %3357 = vrot.lane.b32.xlu1 %v3288_v22, %s4639_s21  ;;  %v3558_v22 = vunpack.c.l.b16 %v3468_v18 }
 0x244   : > { %3355 = vrot.lane.b32.xlu0 %v3285_v26, %s4639_s21  ;;  %3341 = vrot.lane.b32.xlu2 %v3260_v31, %s4639_s21  ;;  %v5877_v31 = vrot.slane %v2832_v16, 5 }
 0x245   : > { %v2412_v33 = vpop.permute.xlu1 %2411  ;;  %v3561_v26 = vpack.c.b16 %v3558_v22, %v3558_v22 }
 0x246   : > { %2505 = vst.msk [vmem:[#allocation2 + $0xc] sm:$0xf] %vm2501_vm12, %v2412_v33  ;;  %v2410_v38 = vpop.permute.xlu0 %2409  ;;  %v2426_v41 = vpop.permute.xlu2 %2425  ;;  %v2828_v33 = vrot.slane %v2826_v21, 5  ;;  %v2839_v42 = vor.u32 %v2838_v32, %v5877_v31  ;;  %v2644_v32 = vshrl.u32 %v4259_v13, 16 }
 0x247   : > { %2504 = vst.msk [vmem:[#allocation2 + $0x8] sm:$0xf] %vm2501_vm12, %v2410_v38  ;;  %v3615_v37 = vsel %vm3613_vm13, %v3561_v26, 0  ;;  %v4249_v38 = vld [vmem:[%s4726_s7 + $0xc4] sm:$0xf] }
 0x248   : > { %2512 = vst.msk [vmem:[#allocation2 + $0x28] sm:$0xf] %vm2501_vm12, %v2426_v41  ;;  %4477 = vmatpush.bf16.msra.mxu2 %v3615_v37  ;;  %4478 = vmatpush.bf16.msra.mxu3 %v3615_v37  ;;  %v4248_v41 = vld [vmem:[%s4726_s7 + $0xc0] sm:$0xf]  ;;  %v2829_v46 = vor.u32 %v2828_v33, %v2825_v36  ;;  %v2840_v53 = vrot.slane %v2839_v42, 4 }
 0x249   : > { %3622 = vmatpush.bf16.msra.mxu0 %v3615_v37  ;;  %4476 = vmatpush.bf16.msra.mxu1 %v3615_v37  ;;  %v4342_v33 = vld [vmem:[%s4726_s7 + $0xc0] sm:$0xe]  ;;  %v4272_v42 = vld [vmem:[%s4726_s7 + $0x68] sm:$0x1] }
 0x24a   : > { %v2830_v58 = vrot.slane %v2829_v46, 4  ;;  %v4362_v46 = vrot.slane %v4342_v33, 9  ;;  %v4298_v33 = vld [vmem:[%s4726_s7 + $0xd0] sm:$0xf] }
 0x24b   : > { %2986 = vrot.lane.b32.xlu1 %v2715_v43, %s4638_s14  ;;  %v2842_v43 = vshll.u32 %v4284_v29, 16 }
 0x24c   : > { %2972 = vrot.lane.b32.xlu0 %v2629_v45, %s4638_s14  ;;  %2970 = vrot.lane.b32.xlu2 %v2619_v48, %s4638_s14  ;;  %v4241_v45 = vld [vmem:[%s4726_s7 + $0x94] sm:$0xf]  ;;  %v2926_v48 = vrot.slane %v2925_v39, 4  ;;  %v2835_v4 = vsel %vm4737_vm2, %v2830_v58, %v5877_v31 }
 0x24d   : > { %v2418_v54 = vpop.permute.xlu1 %2417  ;;  %4480 = vmatpush.bf16.msra.mxu2 %v4474_v30  ;;  %4481 = vmatpush.bf16.msra.mxu3 %v4474_v30 }
 0x24e   : > { %2508 = vst.msk [vmem:[#allocation2 + $0x18] sm:$0xf] %vm2501_vm12, %v2418_v54  ;;  %v2416_v57 = vpop.permute.xlu0 %2415  ;;  %v2432_v61 = vpop.permute.xlu2 %2431  ;;  %v2844_v54 = vrot.slane %v2842_v43, 5  ;;  %3623 = vmatpush.bf16.msra.mxu0 %v4474_v30  ;;  %4479 = vmatpush.bf16.msra.mxu1 %v4474_v30 }
 0x24f   : > { %2507 = vst.msk [vmem:[#allocation2 + $0x14] sm:$0xf] %vm2501_vm12, %v2416_v57 }
 0x250   : > { %2515 = vst.msk [vmem:[#allocation2 + $0x34] sm:$0xf] %vm2501_vm12, %v2432_v61  ;;  %v2845_v2 = vsel %vm4737_vm2, %v2840_v53, %v2844_v54  ;;  %v2746_v53 = vshll.u32 %v4272_v42, 16 }
 0x251   : > { %4483 = vmatpush.bf16.msra.mxu2 %v4473_v47  ;;  %4484 = vmatpush.bf16.msra.mxu3 %v4473_v47 }
 0x252   : > { %3624 = vmatpush.bf16.msra.mxu0 %v4473_v47  ;;  %4482 = vmatpush.bf16.msra.mxu1 %v4473_v47  ;;  %v2646_v47 = vrot.slane %v2644_v32, 4 }
 0x253   : > { %3309 = vrot.lane.b32.xlu1 %v3204_v62, %s4639_s21  ;;  %v4296_v62 = vld [vmem:[%s4726_s7 + $0xc8] sm:$0x1] }
 0x254   : > { %3307 = vrot.lane.b32.xlu0 %v3201_v63, %s4639_s21  ;;  %2988 = vrot.lane.b32.xlu2 %v2725_v0, %s4638_s14  ;;  %v2931_v63 = vsel %vm4737_vm2, %v2926_v48, %v2930_v49  ;;  %v2634_v0 = vshll.u32 %v4258_v56, 16  ;;  %v2938_v6 = vshll.u32 %v4296_v62, 16  ;;  %v4260_v49 = vld [vmem:[%s4726_s7 + $0x38] sm:$0x1] }
 0x255   : > { %v2424_v3 = vpop.permute.xlu1 %2423  ;;  %v2650_v59 = vshll.u32 %v4260_v49, 16 }
 0x256   : > { %2511 = vst.msk [vmem:[#allocation2 + $0x24] sm:$0xf] %vm2501_vm12, %v2424_v3  ;;  %v2422_v7 = vpop.permute.xlu0 %2421  ;;  %v2454_v10 = vpop.permute.xlu2 %2453  ;;  %v4330_v3 = vld [vmem:[%s4726_s7 + $0x90] sm:$0xe]  ;;  %v2636_v11 = vrot.slane %v2634_v0, 5  ;;  %v2940_v18 = vrot.slane %v2938_v6, 5 }
 0x257   : > { %2510 = vst.msk [vmem:[#allocation2 + $0x20] sm:$0xf] %vm2501_vm12, %v2422_v7  ;;  %v3265_v7 = vrot.slane %v3263_v60, 4  ;;  %v4358_v9 = vrot.slane %v4330_v3, 9  ;;  %v4318_v6 = vld [vmem:[%s4726_s7 + $0x60] sm:$0xe] }
 0x258   : > { %2526 = vst.msk [vmem:[#allocation2 + $0x60] sm:$0xf] %vm2501_vm12, %v2454_v10  ;;  %v2633_v10 = vrot.slane %v2631_v55, 4  ;;  %v2941_v36 = vsel %vm4737_vm2, %v2936_v17, %v2940_v18  ;;  %v4307_v55 = vld [vmem:[%s4726_s7 + $0x34] sm:$0xf] }
 0x259   : > { %v3267_v20 = vsel %vm4912_vm6, %v3265_v7, %v3266_v8  ;;  %v4319_v7 = vld [vmem:[%s4726_s7 + $0x64] sm:$0xf]  ;;  %v3207_v8 = vrot.slane %v4307_v55, 5  ;;  %v4285_v18 = vld [vmem:[%s4726_s7 + $0x9c] sm:$0xf] }
 0x25a   : > { %v2637_v22 = vor.u32 %v2636_v11, %v2633_v10  ;;  %v4306_v11 = vld [vmem:[%s4726_s7 + $0x30] sm:$0xe]  ;;  %v3235_v13 = vrot.slane %v4319_v7, 5 }
 0x25b   : > { %2445 = vrot.lane.b32.xlu1 %v4240_v12, %s4637_s13 }
 0x25c   : > { %3325 = vrot.lane.b32.xlu0 %v3232_v15, %s4639_s21  ;;  %3323 = vrot.lane.b32.xlu2 %v3229_v19, %s4639_s21  ;;  %v4271_v15 = vld [vmem:[%s4726_s7 + $0x64] sm:$0xf]  ;;  %v4270_v19 = vld [vmem:[%s4726_s7 + $0x60] sm:$0xf]  ;;  %v2638_v37 = vrot.slane %v2637_v22, 4 }
 0x25d   : > { %v2430_v27 = vpop.permute.xlu1 %2429  ;;  %v2736_v24 = vshll.u32 %v4271_v15, 16  ;;  %v2740_v26 = vshrl.u32 %v4271_v15, 16  ;;  %v2727_v29 = vshrl.u32 %v4270_v19, 16  ;;  %v2730_v31 = vshll.u32 %v4270_v19, 16 }
 0x25e   : > { %2514 = vst.msk [vmem:[#allocation2 + $0x30] sm:$0xf] %vm2501_vm12, %v2430_v27  ;;  %v2428_v34 = vpop.permute.xlu0 %2427  ;;  %v3001_v35 = vpop.permute.xlu2 %3000  ;;  %v3264_v27 = vsel %vm4912_vm6, %v4358_v9, %v3263_v60  ;;  %v4308_v9 = vld [vmem:[%s4726_s7 + $0x38] sm:$0x1] }
 0x25f   : > { %2513 = vst.msk [vmem:[#allocation2 + $0x2c] sm:$0xf] %vm2501_vm12, %v2428_v34  ;;  %v4344_v34 = vld [vmem:[%s4726_s7 + $0xc8] sm:$0x1]  ;;  %v2738_v30 = vrot.slane %v2736_v24, 5  ;;  %v2729_v43 = vrot.slane %v2727_v29, 4 }
 0x260   : > { %v2732_v44 = vrot.slane %v2730_v31, 5  ;;  %v3210_v17 = vrot.slane %v4308_v9, 5  ;;  %v2847_v24 = vshrl.u32 %v4285_v18, 16  ;;  %v4320_v29 = vld [vmem:[%s4726_s7 + $0x68] sm:$0x1] }
 0x262   : > { %v2733_v56 = vor.u32 %v2732_v44, %v2729_v43  ;;  %v2849_v31 = vrot.slane %v2847_v24, 4  ;;  %v2952_v43 = vshll.u32 %v4298_v33, 16  ;;  %v2956_v44 = vshrl.u32 %v4298_v33, 16 }
 0x263   : > { %2463 = vrot.lane.b32.xlu1 %v4249_v38, %s4637_s13  ;;  %v2742_v38 = vrot.slane %v2740_v26, 4  ;;  %v2850_v26 = vshll.u32 %v4285_v18, 16 }
 0x264   : > { %2461 = vrot.lane.b32.xlu0 %v4248_v41, %s4637_s13  ;;  %2447 = vrot.lane.b32.xlu2 %v4241_v45, %s4637_s13  ;;  %v3294_v41 = vrot.slane %v4344_v34, 5 }
 0x265   : > { %v2440_v51 = vpop.permute.xlu1 %2439  ;;  %v2852_v32 = vrot.slane %v2850_v26, 5  ;;  %v4333_v26 = vld [vmem:[%s4726_s7 + $0x9c] sm:$0xe] }
 0x266   : > { %2519 = vst.msk [vmem:[#allocation2 + $0x44] sm:$0xf] %vm2501_vm12, %v2440_v51  ;;  %v2438_v57 = vpop.permute.xlu0 %2437  ;;  %v3336_v61 = vpop.permute.xlu2 %3335  ;;  %v2743_v51 = vor.u32 %v2742_v38, %v2738_v30  ;;  %v3295_v54 = vsel %vm4912_vm6, %v3293_v40, %v3294_v41  ;;  %v4297_v38 = vld [vmem:[%s4726_s7 + $0xcc] sm:$0xf]  ;;  %v4359_v33 = vrot.slane %v4333_v26, 9 }
 0x267   : > { %2518 = vst.msk [vmem:[#allocation2 + $0x40] sm:$0xf] %vm2501_vm12, %v2438_v57  ;;  %v3292_v57 = vsel %vm4912_vm6, %v4362_v46, %v3291_v28  ;;  %v2853_v41 = vor.u32 %v2852_v32, %v2849_v31  ;;  %v2943_v46 = vshrl.u32 %v4297_v38, 16 }
 0x268   : > { %3080 = vst.msk [vmem:[#allocation2 + $0x44] sm:$0xf] %vm3062_vm14, %v3001_v35  ;;  %v2642_v35 = vrot.slane %v2640_v23, 5  ;;  %v2744_v60 = vrot.slane %v2743_v51, 4 }
 0x26a   : > { %v2643_v50 = vsel %vm4737_vm2, %v2638_v37, %v2642_v35  ;;  %v2647_v58 = vor.u32 %v2646_v47, %v2642_v35  ;;  %v3237_v35 = vrot.slane %v3235_v13, 4  ;;  %v2946_v47 = vshll.u32 %v4297_v38, 16 }
 0x26b   : > { %3022 = vrot.lane.b32.xlu1 %v2931_v63, %s4638_s14  ;;  %v2734_v63 = vrot.slane %v2733_v56, 4 }
 0x26c   : > { %3008 = vrot.lane.b32.xlu0 %v2845_v2, %s4638_s14  ;;  %3006 = vrot.lane.b32.xlu2 %v2835_v4, %s4638_s14  ;;  %v2648_v0 = vrot.slane %v2647_v58, 4  ;;  %v2652_v2 = vrot.slane %v2650_v59, 5  ;;  %v4299_v58 = vld [vmem:[%s4726_s7 + $0xd4] sm:$0x1]  ;;  %v2945_v59 = vrot.slane %v2943_v46, 4 }
 0x26d   : > { %v2999_v12 = vpop.permute.xlu1 %2998  ;;  %v2739_v5 = vsel %vm4737_vm2, %v2734_v63, %v2738_v30  ;;  %v3238_v30 = vrot.slane %v4320_v29, 5 }
 0x26e   : > { %3079 = vst.msk [vmem:[#allocation2 + $0x40] sm:$0xf] %vm3062_vm14, %v2999_v12  ;;  %v2456_v16 = vpop.permute.xlu0 %2455  ;;  %v3354_v21 = vpop.permute.xlu2 %3353  ;;  %v2653_v10 = vsel %vm4737_vm2, %v2648_v0, %v2652_v2  ;;  %v4354_v12 = vrot.slane %v4318_v6, 9  ;;  %v2962_v2 = vshll.u32 %v4299_v58, 16 }
 0x26f   : > { %2527 = vst.msk [vmem:[#allocation2 + $0x64] sm:$0xf] %vm2501_vm12, %v2456_v16  ;;  %v3209_v16 = vrot.slane %v3207_v8, 4  ;;  %v3239_v49 = vsel %vm4912_vm6, %v3237_v35, %v3238_v30 }
 0x270   : > { %3416 = vst.msk [vmem:[#allocation2 + $0x40] sm:$0xf] %vm3399_vm15, %v3336_v61  ;;  %v2748_v61 = vrot.slane %v2746_v53, 5  ;;  %v3236_v23 = vsel %vm4912_vm6, %v4354_v12, %v3235_v13  ;;  %v2954_v53 = vrot.slane %v2952_v43, 5  ;;  %v2964_v9 = vrot.slane %v2962_v2, 5 }
 0x271   : > { %v4334_v12 = vld [vmem:[%s4726_s7 + $0xa0] sm:$0xf] }
 0x272   : > { %v2749_v4 = vsel %vm4737_vm2, %v2744_v60, %v2748_v61  ;;  %v2948_v60 = vrot.slane %v2946_v47, 5 }
 0x273   : > { %3345 = vrot.lane.b32.xlu1 %v3267_v20, %s4639_s21 }
 0x274   : > { %3343 = vrot.lane.b32.xlu0 %v3264_v27, %s4639_s21  ;;  %3024 = vrot.lane.b32.xlu2 %v2941_v36, %s4638_s14  ;;  %v3211_v27 = vsel %vm4912_vm6, %v3209_v16, %v3210_v17  ;;  %v4286_v36 = vld [vmem:[%s4726_s7 + $0xa0] sm:$0xf] }
 0x275   : > { %v3017_v39 = vpop.permute.xlu1 %3016  ;;  %v2856_v42 = vshll.u32 %v4286_v36, 16 }
 0x276   : > { %3088 = vst.msk [vmem:[#allocation2 + $0x64] sm:$0xf] %vm3062_vm14, %v3017_v39  ;;  %v3015_v45 = vpop.permute.xlu0 %3014  ;;  %v2983_v48 = vpop.permute.xlu2 %2982  ;;  %v4243_v39 = vld [vmem:[%s4726_s7 + $0xa0] sm:$0xf] }
 0x277   : > { %3087 = vst.msk [vmem:[#allocation2 + $0x60] sm:$0xf] %vm3062_vm14, %v3015_v45  ;;  %v4242_v45 = vld [vmem:[%s4726_s7 + $0x9c] sm:$0xf]  ;;  %v2858_v51 = vrot.slane %v2856_v42, 5 }
 0x278   : > { %3425 = vst.msk [vmem:[#allocation2 + $0x64] sm:$0xf] %vm3399_vm15, %v3354_v21  ;;  %v4350_v21 = vrot.slane %v4306_v11, 9 }
 0x279   : > { %3071 = vst.msk [vmem:[#allocation2 + $0x20] sm:$0xf] %vm3062_vm14, %v2983_v48  ;;  %v2860_v48 = vshrl.u32 %v4286_v36, 16 }
 0x27a   : > { %v3208_v28 = vsel %vm4912_vm6, %v4350_v21, %v3207_v8  ;;  %v4346_v21 = vld [vmem:[%s4726_s7 + $0xd0] sm:$0xf] }
 0x27b   : > { %2974 = vrot.lane.b32.xlu1 %v2643_v50, %s4638_s14  ;;  %v2854_v50 = vrot.slane %v2853_v41, 4 }
 0x27c   : > { %3361 = vrot.lane.b32.xlu0 %v3295_v54, %s4639_s21  ;;  %3359 = vrot.lane.b32.xlu2 %v3292_v57, %s4639_s21  ;;  %v2958_v54 = vrot.slane %v2956_v44, 4  ;;  %v4261_v44 = vld [vmem:[%s4726_s7 + $0x3c] sm:$0xf] }
 0x27d   : > { %v3352_v62 = vpop.permute.xlu1 %3351  ;;  %v2859_v55 = vsel %vm4737_vm2, %v2854_v50, %v2858_v51  ;;  %v2655_v46 = vshrl.u32 %v4261_v44, 16  ;;  %v2658_v47 = vshll.u32 %v4261_v44, 16 }
 0x27e   : > { %3424 = vst.msk [vmem:[#allocation2 + $0x60] sm:$0xf] %vm3399_vm15, %v3352_v62  ;;  %v3338_v52 = vpop.permute.xlu0 %3337  ;;  %v3306_v3 = vpop.permute.xlu2 %3305  ;;  %v2862_v62 = vrot.slane %v2860_v48, 4  ;;  %v2959_v0 = vor.u32 %v2958_v54, %v2954_v53 }
 0x27f   : > { %3417 = vst.msk [vmem:[#allocation2 + $0x44] sm:$0xf] %vm3399_vm15, %v3338_v52  ;;  %v4287_v52 = vld [vmem:[%s4726_s7 + $0xa4] sm:$0x1] }
 0x280   : > { %v2863_v6 = vor.u32 %v2862_v62, %v2858_v51  ;;  %v2866_v7 = vshll.u32 %v4287_v52, 16  ;;  %v2960_v8 = vrot.slane %v2959_v0, 4  ;;  %v4274_v51 = vld [vmem:[%s4726_s7 + $0x70] sm:$0xf]  ;;  %v4234_v0 = vld [vmem:[%s4726_s7 + $0x6c] sm:$0xf] }
 0x282   : > { %v2868_v16 = vrot.slane %v2866_v7, 5  ;;  %v2965_v18 = vsel %vm4737_vm2, %v2960_v8, %v2964_v9 }
 0x283   : > { %2992 = vrot.lane.b32.xlu1 %v2749_v4, %s4638_s14  ;;  %v2949_v4 = vor.u32 %v2948_v60, %v2945_v59  ;;  %v2657_v60 = vrot.slane %v2655_v46, 4 }
 0x284   : > { %2990 = vrot.lane.b32.xlu0 %v2739_v5, %s4638_s14  ;;  %2976 = vrot.lane.b32.xlu2 %v2653_v10, %s4638_s14  ;;  %v4250_v5 = vld [vmem:[%s4726_s7 + $0xcc] sm:$0xf] }
 0x285   : > { %v2969_v14 = vpop.permute.xlu1 %2968  ;;  %v4469_v15 = vld [vmem:[#allocation2 + $0x60] sm:$0xff]  ;;  %v2950_v11 = vrot.slane %v2949_v4, 4  ;;  %v2764_v4 = vshrl.u32 %v4274_v51, 16 }
 0x286   : > { %3064 = vst.msk [vmem:[#allocation2 + $0x4] sm:$0xf] %vm3062_vm14, %v2969_v14  ;;  %v2967_v19 = vpop.permute.xlu0 %2966  ;;  %v4465_v20 = vld [vmem:[#allocation2 + $0x40] sm:$0xff]  ;;  %4448 = vmatmul.msk.bf16.vlgmr.msra.gmra.mxu3 %vm3564_vm0, %v4469_v15  ;;  %v2442_v22 = vpop.permute.xlu2 %2441  ;;  %v2864_v15 = vrot.slane %v2863_v6, 4 }
 0x287   : > { %3063 = vst.msk [vmem:[#allocation2] sm:$0xf] %vm3062_vm14, %v2967_v19  ;;  %4444 = vmatmul.msk.bf16.vlgmr.msra.gmra.mxu2 %vm3564_vm0, %v4465_v20  ;;  %v2955_v19 = vsel %vm4737_vm2, %v2950_v11, %v2954_v53  ;;  %v4345_v20 = vld [vmem:[%s4726_s7 + $0xcc] sm:$0xe]  ;;  %v4263_v53 = vld [vmem:[%s4726_s7 + $0x44] sm:$0x1] }
 0x288   : > { %3401 = vst.msk [vmem:[#allocation2 + $0x4] sm:$0xf] %vm3399_vm15, %v3306_v3  ;;  %v4251_v3 = vld [vmem:[%s4726_s7 + $0xd0] sm:$0xf]  ;;  %v2869_v24 = vsel %vm4737_vm2, %v2864_v15, %v2868_v16  ;;  %v2766_v16 = vrot.slane %v2764_v4, 4 }
 0x289   : > { %2520 = vst.msk [vmem:[#allocation2 + $0x48] sm:$0xf] %vm2501_vm12, %v2442_v22  ;;  %v3270_v22 = vrot.slane %v4334_v12, 5 }
 0x28b   : > { %3327 = vrot.lane.b32.xlu1 %v3236_v23, %s4639_s21  ;;  %v4335_v23 = vld [vmem:[%s4726_s7 + $0xa4] sm:$0x1]  ;;  %v3272_v31 = vrot.slane %v3270_v22, 4  ;;  %v3271_v43 = vsel %vm4912_vm6, %v4359_v33, %v3270_v22 }
 0x28c   : > { %3313 = vrot.lane.b32.xlu0 %v3211_v27, %s4639_s21  ;;  %3311 = vrot.lane.b32.xlu2 %v3208_v28, %s4639_s21  ;;  %v4363_v27 = vrot.slane %v4345_v20, 9  ;;  %v3298_v28 = vrot.slane %v4346_v21, 5  ;;  %v3273_v32 = vrot.slane %v4335_v23, 5  ;;  %v4311_v22 = vld [vmem:[%s4726_s7 + $0x44] sm:$0x1] }
 0x28d   : > { %v3304_v34 = vpop.permute.xlu1 %3303  ;;  %v4309_v23 = vld [vmem:[%s4726_s7 + $0x3c] sm:$0xe] }
 0x28e   : > { %3400 = vst.msk [vmem:[#allocation2] sm:$0xf] %vm3399_vm15, %v3304_v34  ;;  %v2985_v37 = vpop.permute.xlu0 %2984  ;;  %v2460_v40 = vpop.permute.xlu2 %2459  ;;  %v4273_v34 = vld [vmem:[%s4726_s7 + $0x6c] sm:$0xf]  ;;  %v3299_v30 = vsel %vm4912_vm6, %v4363_v27, %v3298_v28  ;;  %v3300_v58 = vrot.slane %v3298_v28, 4 }
 0x28f   : > { %3072 = vst.msk [vmem:[#allocation2 + $0x24] sm:$0xf] %vm3062_vm14, %v2985_v37  ;;  %v4262_v37 = vld [vmem:[%s4726_s7 + $0x40] sm:$0xf]  ;;  %v2751_v38 = vshrl.u32 %v4273_v34, 16 }
 0x290   : > { %2529 = vst.msk [vmem:[#allocation2 + $0x6c] sm:$0xf] %vm2501_vm12, %v2460_v40  ;;  %v3274_v40 = vsel %vm4912_vm6, %v3272_v31, %v3273_v32  ;;  %v2664_v41 = vshll.u32 %v4262_v37, 16  ;;  %v2668_v42 = vshrl.u32 %v4262_v37, 16  ;;  %v4351_v32 = vrot.slane %v4309_v23, 9 }
 0x291   : > { %v2753_v48 = vrot.slane %v2751_v38, 4 }
 0x292   : > { %v2666_v54 = vrot.slane %v2664_v41, 5  ;;  %v4323_v41 = vld [vmem:[%s4726_s7 + $0x74] sm:$0x1] }
 0x293   : > { %2451 = vrot.lane.b32.xlu1 %v4243_v39, %s4637_s13  ;;  %v2754_v39 = vshll.u32 %v4273_v34, 16  ;;  %v4322_v34 = vld [vmem:[%s4726_s7 + $0x70] sm:$0xf]  ;;  %v3245_v46 = vrot.slane %v4323_v41, 5 }
 0x294   : > { %2449 = vrot.lane.b32.xlu0 %v4242_v45, %s4637_s13  ;;  %3329 = vrot.lane.b32.xlu2 %v3239_v49, %s4639_s21  ;;  %v4347_v45 = vld [vmem:[%s4726_s7 + $0xd4] sm:$0x1] }
 0x295   : > { %v3322_v56 = vpop.permute.xlu1 %3321  ;;  %v4457_v57 = vld [vmem:[#allocation2] sm:$0xff]  ;;  %v2756_v49 = vrot.slane %v2754_v39, 5  ;;  %v3301_v59 = vrot.slane %v4347_v45, 5 }
 0x296   : > { %3409 = vst.msk [vmem:[#allocation2 + $0x24] sm:$0xf] %vm3399_vm15, %v3322_v56  ;;  %v3320_v61 = vpop.permute.xlu0 %3319  ;;  %4436 = vmatmul.msk.bf16.vlgmr.msra.gmra.mxu0 %vm3564_vm0, %v4457_v57  ;;  %v3019_v63 = vpop.permute.xlu2 %3018  ;;  %v2670_v56 = vrot.slane %v2668_v42, 4 }
 0x297   : > { %3408 = vst.msk [vmem:[#allocation2 + $0x20] sm:$0xf] %vm3399_vm15, %v3320_v61  ;;  %v2660_v61 = vrot.slane %v2658_v47, 5  ;;  %v2757_v52 = vor.u32 %v2756_v49, %v2753_v48 }
 0x298   : > { %v2671_v2 = vor.u32 %v2670_v56, %v2666_v54 }
 0x299   : > { %v2661_v6 = vor.u32 %v2660_v61, %v2657_v60  ;;  %v2758_v7 = vrot.slane %v2757_v52, 4 }
 0x29a   : > { %v2672_v11 = vrot.slane %v2671_v2, 4 }
 0x29b   : > { %3010 = vrot.lane.b32.xlu1 %v2859_v55, %s4638_s14  ;;  %v2760_v55 = vshll.u32 %v4274_v51, 16  ;;  %v2662_v15 = vrot.slane %v2661_v6, 4 }
 0x29c   : > { %2467 = vrot.lane.b32.xlu0 %v4251_v3, %s4637_s13  ;;  %2465 = vrot.lane.b32.xlu2 %v4250_v5, %s4637_s13  ;;  %v2674_v3 = vshll.u32 %v4263_v53, 16  ;;  %v3302_v5 = vsel %vm4912_vm6, %v3300_v58, %v3301_v59 }
 0x29d   : > { %v2458_v10 = vpop.permute.xlu1 %2457  ;;  %v2762_v8 = vrot.slane %v2760_v55, 5 }
 0x29e   : > { %2528 = vst.msk [vmem:[#allocation2 + $0x68] sm:$0xf] %vm2501_vm12, %v2458_v10  ;;  %v2444_v13 = vpop.permute.xlu0 %2443  ;;  %v4461_v14 = vld [vmem:[#allocation2 + $0x20] sm:$0xff]  ;;  %v3342_v17 = vpop.permute.xlu2 %3341  ;;  %v2676_v12 = vrot.slane %v2674_v3, 5 }
 0x29f   : > { %2521 = vst.msk [vmem:[#allocation2 + $0x4c] sm:$0xf] %vm2501_vm12, %v2444_v13  ;;  %4440 = vmatmul.msk.bf16.vlgmr.msra.gmra.mxu1 %vm3564_vm0, %v4461_v14  ;;  %v4310_v13 = vld [vmem:[%s4726_s7 + $0x40] sm:$0xf]  ;;  %v2767_v26 = vor.u32 %v2766_v16, %v2762_v8 }
 0x2a0   : > { %3089 = vst.msk [vmem:[#allocation2 + $0x68] sm:$0xf] %vm3062_vm14, %v3019_v63  ;;  %v4235_v63 = vld [vmem:[%s4726_s7 + $0x70] sm:$0xf]  ;;  %v3214_v20 = vrot.slane %v4310_v13, 5  ;;  %v2677_v21 = vsel %vm4737_vm2, %v2672_v11, %v2676_v12 }
 0x2a1   : > { %v2768_v37 = vrot.slane %v2767_v26, 4 }
 0x2a2   : > { %v3216_v28 = vrot.slane %v3214_v20, 4  ;;  %v3215_v39 = vsel %vm4912_vm6, %v4351_v32, %v3214_v20 }
 0x2a3   : > { %3028 = vrot.lane.b32.xlu1 %v2965_v18, %s4638_s14  ;;  %v4275_v18 = vld [vmem:[%s4726_s7 + $0x74] sm:$0x1] }
 0x2a4   : > { %3026 = vrot.lane.b32.xlu0 %v2955_v19, %s4638_s14  ;;  %3012 = vrot.lane.b32.xlu2 %v2869_v24, %s4638_s14  ;;  %v2763_v19 = vsel %vm4737_vm2, %v2758_v7, %v2762_v8  ;;  %v2667_v24 = vsel %vm4737_vm2, %v2662_v15, %v2666_v54  ;;  %v2770_v27 = vshll.u32 %v4275_v18, 16  ;;  %v6130_v18 = vld [vmem:[%s6297_s3] ss:$0 sm:$0xff] }
 0x2a5   : > { %v3005_v29 = vpop.permute.xlu1 %3004 }
 0x2a6   : > { %3082 = vst.msk [vmem:[#allocation2 + $0x4c] sm:$0xf] %vm3062_vm14, %v3005_v29  ;;  %v3003_v36 = vpop.permute.xlu0 %3002  ;;  %v2971_v35 = vpop.permute.xlu2 %2970  ;;  %v3217_v29 = vrot.slane %v4311_v22, 5 }
 0x2a7   : > { %3081 = vst.msk [vmem:[#allocation2 + $0x48] sm:$0xf] %vm3062_vm14, %v3003_v36 }
 0x2a8   : > { %3419 = vst.msk [vmem:[#allocation2 + $0x4c] sm:$0xf] %vm3399_vm15, %v3342_v17  ;;  %v3218_v38 = vsel %vm4912_vm6, %v3216_v28, %v3217_v29 }
 0x2a9   : > { %3065 = vst.msk [vmem:[#allocation2 + $0x8] sm:$0xf] %vm3062_vm14, %v2971_v35  ;;  %v2772_v35 = vrot.slane %v2770_v27, 5 }
 0x2ab   : > { %3363 = vrot.lane.b32.xlu1 %v3299_v30, %s4639_s21  ;;  %v2773_v42 = vsel %vm4737_vm2, %v2768_v37, %v2772_v35 }
 0x2ac   : > { %3349 = vrot.lane.b32.xlu0 %v3274_v40, %s4639_s21  ;;  %3347 = vrot.lane.b32.xlu2 %v3271_v43, %s4639_s21  ;;  %v3242_v40 = vrot.slane %v4322_v34, 5  ;;  %v4321_v43 = vld [vmem:[%s4726_s7 + $0x6c] sm:$0xe] }
 0x2ad   : > { %v3340_v50 = vpop.permute.xlu1 %3339  ;;  %v4355_v48 = vrot.slane %v4321_v43, 9 }
 0x2ae   : > { %3418 = vst.msk [vmem:[#allocation2 + $0x48] sm:$0xf] %vm3399_vm15, %v3340_v50  ;;  %v3021_v57 = vpop.permute.xlu0 %3020  ;;  %v2989_v62 = vpop.permute.xlu2 %2988  ;;  %v3244_v45 = vrot.slane %v3242_v40, 4 }
 0x2af   : > { %3090 = vst.msk [vmem:[#allocation2 + $0x6c] sm:$0xf] %vm3062_vm14, %v3021_v57  ;;  %v3243_v50 = vsel %vm4912_vm6, %v4355_v48, %v3242_v40 }
 0x2b0   : > { %3074 = vst.msk [vmem:[#allocation2 + $0x2c] sm:$0xf] %vm3062_vm14, %v2989_v62  ;;  %v3246_v25 = vsel %vm4912_vm6, %v3244_v45, %v3245_v46 }
 0x2b3   : > { %2435 = vrot.lane.b32.xlu1 %v4235_v63, %s4637_s13 }
 0x2b4   : > { %2433 = vrot.lane.b32.xlu0 %v4234_v0, %s4637_s13  ;;  %3365 = vrot.lane.b32.xlu2 %v3302_v5, %s4639_s21  ;;  %s6141_s13 = scalar_lea.vmem [#allocation3], %s4058_s12 }
 0x2b5   : > { %v3358_v9 = vpop.permute.xlu1 %3357  ;;  %v4466_v10 = vld [vmem:[#allocation2 + $0x48] sm:$0xff]  ;;  %s3922_s26 = sshll.u32 %s6141_s13, 4  ;;  %s3923_s26 = int_to_ptr.vmem [resolvable:$true] %s3922_s26 }
 0x2b6   : > { %3427 = vst.msk [vmem:[#allocation2 + $0x6c] sm:$0xf] %vm3399_vm15, %v3358_v9  ;;  %v3356_v14 = vpop.permute.xlu0 %3355  ;;  %4445 = vmatmul.msk.bf16.gmra.mxu2 %vm3564_vm0, %v4466_v10  ;;  %v3324_v17 = vpop.permute.xlu2 %3323 }
 0x2b7   : > { %3426 = vst.msk [vmem:[#allocation2 + $0x68] sm:$0xf] %vm3399_vm15, %v3356_v14 }
 0x2bb   : > { %2994 = vrot.lane.b32.xlu1 %v2763_v19, %s4638_s14 }
 0x2bc   : > { %2980 = vrot.lane.b32.xlu0 %v2677_v21, %s4638_s14  ;;  %2978 = vrot.lane.b32.xlu2 %v2667_v24, %s4638_s14 }
 0x2bd   : > { %v2987_v31 = vpop.permute.xlu1 %2986 }
 0x2be   : > { %3073 = vst.msk [vmem:[#allocation2 + $0x28] sm:$0xf] %vm3062_vm14, %v2987_v31  ;;  %v2973_v36 = vpop.permute.xlu0 %2972  ;;  %v4470_v33 = vld [vmem:[#allocation2 + $0x68] sm:$0xff]  ;;  %v2448_v30 = vpop.permute.xlu2 %2447 }
 0x2bf   : > { %3066 = vst.msk [vmem:[#allocation2 + $0xc] sm:$0xf] %vm3062_vm14, %v2973_v36  ;;  %4449 = vmatmul.msk.bf16.gmra.mxu3 %vm3564_vm0, %v4470_v33 }
 0x2c0   : > { %3410 = vst.msk [vmem:[#allocation2 + $0x28] sm:$0xf] %vm3399_vm15, %v3324_v17  ;;  %v6123_v17 = vld [vmem:[%s6296_s2] ss:$0 sm:$0xff] }
 0x2c1   : > { %2523 = vst.msk [vmem:[#allocation2 + $0x54] sm:$0xf] %vm2501_vm12, %v2448_v30 }
 0x2c3   : > { %3317 = vrot.lane.b32.xlu1 %v3218_v38, %s4639_s21 }
 0x2c4   : > { %3315 = vrot.lane.b32.xlu0 %v3215_v39, %s4639_s21  ;;  %2996 = vrot.lane.b32.xlu2 %v2773_v42, %s4638_s14  ;;  %s4475_s14 = sshll.u32 %s4622_s18, 8 }
 0x2c5   : > { %v3310_v44 = vpop.permute.xlu1 %3309  ;;  %s3921_s24 = scalar_lea.hbm %s6298_s4, %s4475_s14 }
 0x2c6   : > { %3403 = vst.msk [vmem:[#allocation2 + $0xc] sm:$0xf] %vm3399_vm15, %v3310_v44  ;;  %v3308_v47 = vpop.permute.xlu0 %3307  ;;  %v3007_v49 = vpop.permute.xlu2 %3006  ;;  %s3924_s18 = sshll.u32 %s3921_s24, 4  ;;  %s3925_s18 = int_to_ptr.hbm [resolvable:$true] %s3924_s18 }
 0x2c7   : > { %3402 = vst.msk [vmem:[#allocation2 + $0x8] sm:$0xf] %vm3399_vm15, %v3308_v47  ;;  %s4566_s30 = sshra.s32 %s3925_s18, 4  ;;  %s4567_s30 = int_to_ptr.hbm [resolvable:$true] %s4566_s30 }
 0x2c8   : > { %s4568_s5 = scalar_lea.hbm %s4567_s30, 256  ;;  %p4573_p1 = scmp.lt.s32.totalorder %s4567_s30, %s6298_s4 }
 0x2c9   : > { %p4569_p12 = scmp.ne.s32.totalorder %s4567_s30, %s4568_s5  ;;  %p4574_p2 = scmp.lt.s32.totalorder %s4572_s10, %s4568_s5 }
 0x2cb   : > { %p4570_p13 = pnand %p4569_p12, %p4706_p4  ;;  %p4575_p3 = por %p4574_p2, %p4573_p1 }
 0x2cc   : > { %3333 = vrot.lane.b32.xlu0 %v3246_v25, %s4639_s21  ;;  %3331 = vrot.lane.b32.xlu2 %v3243_v50, %s4639_s21 }
 0x2cd   : > { %v2446_v51 = vpop.permute.xlu1 %2445  ;;  %p4571_p0 = pneg %p4570_p13 }
 0x2ce   : > { %2522 = vst.msk [vmem:[#allocation2 + $0x50] sm:$0xf] %vm2501_vm12, %v2446_v51  ;;  %v3326_v53 = vpop.permute.xlu0 %3325  ;;  %v4458_v54 = vld [vmem:[#allocation2 + $0x8] sm:$0xff]  ;;  %v3025_v56 = vpop.permute.xlu2 %3024 }
 0x2cf   : > { %3411 = vst.msk [vmem:[#allocation2 + $0x2c] sm:$0xf] %vm3399_vm15, %v3326_v53  ;;  %4437 = vmatmul.msk.bf16.gmra.mxu0 %vm3564_vm0, %v4458_v54  ;;  %p4576_p5 = pnand %p4575_p3, %p4571_p0 }
 0x2d0   : > { %3083 = vst.msk [vmem:[#allocation2 + $0x50] sm:$0xf] %vm3062_vm14, %v3007_v49 }
 0x2d5   : > { %v2464_v57 = vpop.permute.xlu1 %2463 }
 0x2d6   : > { %2531 = vst.msk [vmem:[#allocation2 + $0x74] sm:$0xf] %vm2501_vm12, %v2464_v57  ;;  %v2462_v1 = vpop.permute.xlu0 %2461  ;;  %v4462_v58 = vld [vmem:[#allocation2 + $0x28] sm:$0xff]  ;;  %v3360_v59 = vpop.permute.xlu2 %3359 }
 0x2d7   : > { %2530 = vst.msk [vmem:[#allocation2 + $0x70] sm:$0xf] %vm2501_vm12, %v2462_v1  ;;  %4441 = vmatmul.msk.bf16.gmra.mxu1 %vm3564_vm0, %v4462_v58 }
 0x2d8   : > { %3092 = vst.msk [vmem:[#allocation2 + $0x74] sm:$0xf] %vm3062_vm14, %v3025_v56 }
 0x2dd   : > { %v3023_v60 = vpop.permute.xlu1 %3022 }
 0x2de   : > { %3091 = vst.msk [vmem:[#allocation2 + $0x70] sm:$0xf] %vm3062_vm14, %v3023_v60  ;;  %v3009_v61 = vpop.permute.xlu0 %3008  ;;  %v2977_v62 = vpop.permute.xlu2 %2976 }
 0x2df   : > { %3084 = vst.msk [vmem:[#allocation2 + $0x54] sm:$0xf] %vm3062_vm14, %v3009_v61 }
 0x2e0   : > { %3428 = vst.msk [vmem:[#allocation2 + $0x70] sm:$0xf] %vm3399_vm15, %v3360_v59 }
 0x2e1   : > { %3068 = vst.msk [vmem:[#allocation2 + $0x14] sm:$0xf] %vm3062_vm14, %v2977_v62 }
 0x2e5   : > { %v3346_v63 = vpop.permute.xlu1 %3345 }
 0x2e6   : > { %3421 = vst.msk [vmem:[#allocation2 + $0x54] sm:$0xf] %vm3399_vm15, %v3346_v63  ;;  %v3344_v52 = vpop.permute.xlu0 %3343  ;;  %v3312_v55 = vpop.permute.xlu2 %3311 }
 0x2e7   : > { %3420 = vst.msk [vmem:[#allocation2 + $0x50] sm:$0xf] %vm3399_vm15, %v3344_v52 }
 0x2ed   : > { %v2975_v0 = vpop.permute.xlu1 %2974 }
 0x2ee   : > { %3067 = vst.msk [vmem:[#allocation2 + $0x10] sm:$0xf] %vm3062_vm14, %v2975_v0  ;;  %v3362_v2 = vpop.permute.xlu0 %3361  ;;  %v4467_v3 = vld [vmem:[#allocation2 + $0x50] sm:$0xff]  ;;  %v3330_v4 = vpop.permute.xlu2 %3329 }
 0x2ef   : > { %3429 = vst.msk [vmem:[#allocation2 + $0x74] sm:$0xf] %vm3399_vm15, %v3362_v2  ;;  %4446 = vmatmul.msk.bf16.gmra.mxu2 %vm3564_vm0, %v4467_v3 }
 0x2f0   : > { %3404 = vst.msk [vmem:[#allocation2 + $0x10] sm:$0xf] %vm3399_vm15, %v3312_v55 }
 0x2f5   : > { %v2993_v5 = vpop.permute.xlu1 %2992 }
 0x2f6   : > { %3076 = vst.msk [vmem:[#allocation2 + $0x34] sm:$0xf] %vm3062_vm14, %v2993_v5  ;;  %v2991_v6 = vpop.permute.xlu0 %2990  ;;  %v4471_v7 = vld [vmem:[#allocation2 + $0x70] sm:$0xff]  ;;  %v2466_v8 = vpop.permute.xlu2 %2465 }
 0x2f7   : > { %3075 = vst.msk [vmem:[#allocation2 + $0x30] sm:$0xf] %vm3062_vm14, %v2991_v6  ;;  %4450 = vmatmul.msk.bf16.gmra.mxu3 %vm3564_vm0, %v4471_v7 }
 0x2f8   : > { %3413 = vst.msk [vmem:[#allocation2 + $0x34] sm:$0xf] %vm3399_vm15, %v3330_v4 }
 0x2f9   : > { %2532 = vst.msk [vmem:[#allocation2 + $0x78] sm:$0xf] %vm2501_vm12, %v2466_v8 }
 0x2fd   : > { %v3328_v9 = vpop.permute.xlu1 %3327 }
 0x2fe   : > { %3412 = vst.msk [vmem:[#allocation2 + $0x30] sm:$0xf] %vm3399_vm15, %v3328_v9  ;;  %v3314_v10 = vpop.permute.xlu0 %3313  ;;  %v3013_v11 = vpop.permute.xlu2 %3012 }
 0x2ff   : > { %3405 = vst.msk [vmem:[#allocation2 + $0x14] sm:$0xf] %vm3399_vm15, %v3314_v10 }
 0x305   : > { %v2452_v12 = vpop.permute.xlu1 %2451  ;;  %v4463_v13 = vld [vmem:[#allocation2 + $0x30] sm:$0xff] }
 0x306   : > { %2525 = vst.msk [vmem:[#allocation2 + $0x5c] sm:$0xf] %vm2501_vm12, %v2452_v12  ;;  %v2450_v14 = vpop.permute.xlu0 %2449  ;;  %v4459_v15 = vld [vmem:[#allocation2 + $0x10] sm:$0xff]  ;;  %4442 = vmatmul.msk.bf16.gmra.mxu1 %vm3564_vm0, %v4463_v13  ;;  %v3348_v16 = vpop.permute.xlu2 %3347 }
 0x307   : > { %2524 = vst.msk [vmem:[#allocation2 + $0x58] sm:$0xf] %vm2501_vm12, %v2450_v14  ;;  %4438 = vmatmul.msk.bf16.gmra.mxu0 %vm3564_vm0, %v4459_v15 }
 0x308   : > { %3086 = vst.msk [vmem:[#allocation2 + $0x5c] sm:$0xf] %vm3062_vm14, %v3013_v11 }
 0x309   : > { %v3686_v19 = vpop.f32.mrf.mxu3 }
 0x30a   : > { %v3666_v20 = vpop.f32.mrf.mxu2  ;;  %v3734_v21 = vmul.f32 %v6123_v17, %v3686_v19 }
 0x30b   : > { %v3726_v22 = vmul.f32 %v6123_v17, %v3666_v20 }
 0x30c   : > { %v3770_v23 = vadd.f32 %v6130_v18, %v3734_v21 }
 0x30d   : > { %v3011_v24 = vpop.permute.xlu1 %3010  ;;  %v3762_v26 = vadd.f32 %v6130_v18, %v3726_v22 }
 0x30e   : > { %3085 = vst.msk [vmem:[#allocation2 + $0x58] sm:$0xf] %vm3062_vm14, %v3011_v24  ;;  %v2468_v27 = vpop.permute.xlu0 %2467  ;;  %vm3802_vm1 = vcmp.gt.f32.partialorder %v3770_v23, 0.0  ;;  %v3834_v28 = vmul.f32 0.1, %v3770_v23  ;;  %v3366_v29 = vpop.permute.xlu2 %3365 }
 0x30f   : > { %2533 = vst.msk [vmem:[#allocation2 + $0x7c] sm:$0xf] %vm2501_vm12, %v2468_v27  ;;  %vm3794_vm2 = vcmp.gt.f32.partialorder %v3762_v26, 0.0  ;;  %v3826_v31 = vmul.f32 0.1, %v3762_v26 }
 0x310   : > { %3422 = vst.msk [vmem:[#allocation2 + $0x58] sm:$0xf] %vm3399_vm15, %v3348_v16  ;;  %v3866_v32 = vsel %vm3802_vm1, %v3770_v23, %v3834_v28 }
 0x311   : > { %v3858_v34 = vsel %vm3794_vm2, %v3762_v26, %v3826_v31  ;;  %3898 = vst [vmem:[%s6141_s13 + $0xc0] sm:$0xff] %v3866_v32  ;;  %v3688_v36 = vpop.f32.mrf.mxu3 }
 0x312   : > { %3890 = vst [vmem:[%s6141_s13 + $0x80] sm:$0xff] %v3858_v34  ;;  %v3668_v33 = vpop.f32.mrf.mxu2  ;;  %v3735_v37 = vmul.f32 %v6123_v17, %v3688_v36 }
 0x313   : > { %v3727_v35 = vmul.f32 %v6123_v17, %v3668_v33  ;;  %v3626_v30 = vpop.f32.mrf.mxu0 }
 0x314   : > { %v3771_v38 = vadd.f32 %v6130_v18, %v3735_v37  ;;  %v3710_v40 = vmul.f32 %v6123_v17, %v3626_v30 }
 0x315   : > { %v3029_v39 = vpop.permute.xlu1 %3028  ;;  %v3763_v41 = vadd.f32 %v6130_v18, %v3727_v35 }
 0x316   : > { %3094 = vst.msk [vmem:[#allocation2 + $0x7c] sm:$0xf] %vm3062_vm14, %v3029_v39  ;;  %v3027_v42 = vpop.permute.xlu0 %3026  ;;  %vm3803_vm3 = vcmp.gt.f32.partialorder %v3771_v38, 0.0  ;;  %v3835_v43 = vmul.f32 0.1, %v3771_v38  ;;  %v3746_v44 = vadd.f32 %v6130_v18, %v3710_v40  ;;  %v2979_v45 = vpop.permute.xlu2 %2978 }
 0x317   : > { %3093 = vst.msk [vmem:[#allocation2 + $0x78] sm:$0xf] %vm3062_vm14, %v3027_v42  ;;  %vm3795_vm4 = vcmp.gt.f32.partialorder %v3763_v41, 0.0  ;;  %v3827_v46 = vmul.f32 0.1, %v3763_v41 }
 0x318   : > { %3431 = vst.msk [vmem:[#allocation2 + $0x7c] sm:$0xf] %vm3399_vm15, %v3366_v29  ;;  %v3867_v47 = vsel %vm3803_vm3, %v3771_v38, %v3835_v43  ;;  %vm3778_vm5 = vcmp.gt.f32.partialorder %v3746_v44, 0.0  ;;  %v3810_v48 = vmul.f32 0.1, %v3746_v44 }
 0x319   : > { %3069 = vst.msk [vmem:[#allocation2 + $0x18] sm:$0xf] %vm3062_vm14, %v2979_v45  ;;  %v3859_v49 = vsel %vm3795_vm4, %v3763_v41, %v3827_v46 }
 0x31a   : > { %3899 = vst [vmem:[%s6141_s13 + $0xc8] sm:$0xff] %v3867_v47  ;;  %v3842_v25 = vsel %vm3778_vm5, %v3746_v44, %v3810_v48 }
 0x31b   : > { %3891 = vst [vmem:[%s6141_s13 + $0x88] sm:$0xff] %v3859_v49  ;;  %v3628_v50 = vpop.f32.mrf.mxu0 }
 0x31c   : > { %3874 = vst [vmem:[%s6141_s13] sm:$0xff] %v3842_v25  ;;  %v3711_v53 = vmul.f32 %v6123_v17, %v3628_v50  ;;  %v3646_v54 = vpop.f32.mrf.mxu1 }
 0x31d   : > { %v3364_v51 = vpop.permute.xlu1 %3363  ;;  %v3718_v57 = vmul.f32 %v6123_v17, %v3646_v54 }
 0x31e   : > { %3430 = vst.msk [vmem:[#allocation2 + $0x78] sm:$0xf] %vm3399_vm15, %v3364_v51  ;;  %v3350_v56 = vpop.permute.xlu0 %3349  ;;  %v3747_v1 = vadd.f32 %v6130_v18, %v3711_v53  ;;  %v2997_v62 = vpop.permute.xlu2 %2996 }
 0x31f   : > { %3423 = vst.msk [vmem:[#allocation2 + $0x5c] sm:$0xf] %vm3399_vm15, %v3350_v56  ;;  %v3754_v58 = vadd.f32 %v6130_v18, %v3718_v57 }
 0x320   : > { %vm3779_vm6 = vcmp.gt.f32.partialorder %v3747_v1, 0.0  ;;  %v3811_v59 = vmul.f32 0.1, %v3747_v1 }
 0x321   : > { %vm3786_vm7 = vcmp.gt.f32.partialorder %v3754_v58, 0.0  ;;  %v3818_v60 = vmul.f32 0.1, %v3754_v58 }
 0x322   : > { %v3843_v61 = vsel %vm3779_vm6, %v3747_v1, %v3811_v59 }
 0x323   : > { %3875 = vst [vmem:[%s6141_s13 + $0x8] sm:$0xff] %v3843_v61  ;;  %v3850_v63 = vsel %vm3786_vm7, %v3754_v58, %v3818_v60 }
 0x324   : > { %3882 = vst [vmem:[%s6141_s13 + $0x40] sm:$0xff] %v3850_v63  ;;  %v3648_v55 = vpop.f32.mrf.mxu1 }
 0x325   : > { %v2436_v52 = vpop.permute.xlu1 %2435  ;;  %v4472_v0 = vld [vmem:[#allocation2 + $0x78] sm:$0xff]  ;;  %v3719_v3 = vmul.f32 %v6123_v17, %v3648_v55 }
 0x326   : > { %2517 = vst.msk [vmem:[#allocation2 + $0x3c] sm:$0xf] %vm2501_vm12, %v2436_v52  ;;  %v2434_v2 = vpop.permute.xlu0 %2433  ;;  %v4468_v4 = vld [vmem:[#allocation2 + $0x58] sm:$0xff]  ;;  %4451 = vmatmul.msk.bf16.gmra.mxu3 %vm3564_vm0, %v4472_v0  ;;  %v3332_v9 = vpop.permute.xlu2 %3331 }
 0x327   : > { %2516 = vst.msk [vmem:[#allocation2 + $0x38] sm:$0xf] %vm2501_vm12, %v2434_v2  ;;  %v3755_v5 = vadd.f32 %v6130_v18, %v3719_v3  ;;  %4447 = vmatmul.msk.bf16.gmra.mxu2 %vm3564_vm0, %v4468_v4 }
 0x328   : > { %3078 = vst.msk [vmem:[#allocation2 + $0x3c] sm:$0xf] %vm3062_vm14, %v2997_v62 }
 0x329   : > { %vm3787_vm8 = vcmp.gt.f32.partialorder %v3755_v5, 0.0  ;;  %v3819_v6 = vmul.f32 0.1, %v3755_v5 }
 0x32b   : > { %v3851_v7 = vsel %vm3787_vm8, %v3755_v5, %v3819_v6 }
 0x32c   : > { %3883 = vst [vmem:[%s6141_s13 + $0x48] sm:$0xff] %v3851_v7 }
 0x32d   : > { %v2995_v8 = vpop.permute.xlu1 %2994 }
 0x32e   : > { %3077 = vst.msk [vmem:[#allocation2 + $0x38] sm:$0xf] %vm3062_vm14, %v2995_v8  ;;  %v2981_v10 = vpop.permute.xlu0 %2980 }
 0x32f   : > { %3070 = vst.msk [vmem:[#allocation2 + $0x1c] sm:$0xf] %vm3062_vm14, %v2981_v10 }
 0x330   : > { %3414 = vst.msk [vmem:[#allocation2 + $0x38] sm:$0xf] %vm3399_vm15, %v3332_v9 }
 0x335   : > { %v3318_v11 = vpop.permute.xlu1 %3317 }
 0x336   : > { %3407 = vst.msk [vmem:[#allocation2 + $0x1c] sm:$0xf] %vm3399_vm15, %v3318_v11  ;;  %v3316_v12 = vpop.permute.xlu0 %3315 }
 0x337   : > { %3406 = vst.msk [vmem:[#allocation2 + $0x18] sm:$0xf] %vm3399_vm15, %v3316_v12 }
 0x339   : > { %v3671_v13 = vpop.f32.mrf.mxu2 }
 0x33a   : > { %v3728_v14 = vmul.f32 %v6123_v17, %v3671_v13 }
 0x33c   : > { %v3764_v15 = vadd.f32 %v6130_v18, %v3728_v14 }
 0x33e   : > { %v3334_v16 = vpop.permute.xlu0 %3333  ;;  %v4460_v19 = vld [vmem:[#allocation2 + $0x18] sm:$0xff]  ;;  %vm3796_vm9 = vcmp.gt.f32.partialorder %v3764_v15, 0.0  ;;  %v3828_v20 = vmul.f32 0.1, %v3764_v15 }
 0x33f   : > { %3415 = vst.msk [vmem:[#allocation2 + $0x3c] sm:$0xf] %vm3399_vm15, %v3334_v16  ;;  %4439 = vmatmul.msk.bf16.gmra.mxu0 %vm3564_vm0, %v4460_v19 }
 0x340   : > { %v3860_v21 = vsel %vm3796_vm9, %v3764_v15, %v3828_v20 }
 0x341   : > { %3892 = vst [vmem:[%s6141_s13 + $0x90] sm:$0xff] %v3860_v21  ;;  %v3673_v22 = vpop.f32.mrf.mxu2 }
 0x342   : > { %v3729_v23 = vmul.f32 %v6123_v17, %v3673_v22  ;;  %v3691_v24 = vpop.f32.mrf.mxu3 }
 0x343   : > { %v3736_v26 = vmul.f32 %v6123_v17, %v3691_v24 }
 0x344   : > { %v3765_v27 = vadd.f32 %v6130_v18, %v3729_v23 }
 0x345   : > { %v3772_v28 = vadd.f32 %v6130_v18, %v3736_v26 }
 0x346   : > { %v4464_v29 = vld [vmem:[#allocation2 + $0x38] sm:$0xff]  ;;  %vm3797_vm10 = vcmp.gt.f32.partialorder %v3765_v27, 0.0  ;;  %v3829_v31 = vmul.f32 0.1, %v3765_v27 }
 0x347   : > { %vm3804_vm11 = vcmp.gt.f32.partialorder %v3772_v28, 0.0  ;;  %v3836_v32 = vmul.f32 0.1, %v3772_v28  ;;  %4443 = vmatmul.msk.bf16.gmra.mxu1 %vm3564_vm0, %v4464_v29 }
 0x348   : > { %v3861_v34 = vsel %vm3797_vm10, %v3765_v27, %v3829_v31 }
 0x349   : > { %3893 = vst [vmem:[%s6141_s13 + $0x98] sm:$0xff] %v3861_v34  ;;  %v3868_v36 = vsel %vm3804_vm11, %v3772_v28, %v3836_v32 }
 0x34a   : > { %3900 = vst [vmem:[%s6141_s13 + $0xd0] sm:$0xff] %v3868_v36  ;;  %v3693_v33 = vpop.f32.mrf.mxu3 }
 0x34b   : > { %v3737_v37 = vmul.f32 %v6123_v17, %v3693_v33 }
 0x34c   : > { %v3631_v35 = vpop.f32.mrf.mxu0 }
 0x34d   : > { %v3773_v30 = vadd.f32 %v6130_v18, %v3737_v37  ;;  %v3712_v38 = vmul.f32 %v6123_v17, %v3631_v35 }
 0x34f   : > { %vm3805_vm12 = vcmp.gt.f32.partialorder %v3773_v30, 0.0  ;;  %v3837_v39 = vmul.f32 0.1, %v3773_v30  ;;  %v3748_v40 = vadd.f32 %v6130_v18, %v3712_v38 }
 0x351   : > { %v3869_v41 = vsel %vm3805_vm12, %v3773_v30, %v3837_v39  ;;  %vm3780_vm13 = vcmp.gt.f32.partialorder %v3748_v40, 0.0  ;;  %v3812_v42 = vmul.f32 0.1, %v3748_v40 }
 0x352   : > { %3901 = vst [vmem:[%s6141_s13 + $0xd8] sm:$0xff] %v3869_v41 }
 0x353   : > { %v3844_v43 = vsel %vm3780_vm13, %v3748_v40, %v3812_v42 }
 0x354   : > { %3876 = vst [vmem:[%s6141_s13 + $0x10] sm:$0xff] %v3844_v43  ;;  %v3633_v44 = vpop.f32.mrf.mxu0  ;;  %v3651_v45 = vpop.f32.mrf.mxu1 }
 0x355   : > { %v3713_v46 = vmul.f32 %v6123_v17, %v3633_v44  ;;  %v3720_v47 = vmul.f32 %v6123_v17, %v3651_v45 }
 0x357   : > { %v3749_v48 = vadd.f32 %v6130_v18, %v3713_v46  ;;  %v3756_v49 = vadd.f32 %v6130_v18, %v3720_v47 }
 0x359   : > { %vm3781_vm14 = vcmp.gt.f32.partialorder %v3749_v48, 0.0  ;;  %v3813_v25 = vmul.f32 0.1, %v3749_v48  ;;  %vm3788_vm15 = vcmp.gt.f32.partialorder %v3756_v49, 0.0  ;;  %v3820_v50 = vmul.f32 0.1, %v3756_v49 }
 0x35b   : > { %v3845_v51 = vsel %vm3781_vm14, %v3749_v48, %v3813_v25  ;;  %v3852_v53 = vsel %vm3788_vm15, %v3756_v49, %v3820_v50 }
 0x35c   : > { %3877 = vst [vmem:[%s6141_s13 + $0x18] sm:$0xff] %v3845_v51  ;;  %v3653_v54 = vpop.f32.mrf.mxu1 }
 0x35d   : > { %3884 = vst [vmem:[%s6141_s13 + $0x50] sm:$0xff] %v3852_v53  ;;  %v3721_v56 = vmul.f32 %v6123_v17, %v3653_v54 }
 0x35f   : > { %v3757_v57 = vadd.f32 %v6130_v18, %v3721_v56 }
 0x361   : > { %vm3789_vm0 = vcmp.gt.f32.partialorder %v3757_v57, 0.0  ;;  %v3821_v1 = vmul.f32 0.1, %v3757_v57 }
 0x363   : > { %v3853_v58 = vsel %vm3789_vm0, %v3757_v57, %v3821_v1 }
 0x364   : > { %3885 = vst [vmem:[%s6141_s13 + $0x58] sm:$0xff] %v3853_v58 }
 0x372   : > { %v3676_v59 = vpop.f32.mrf.mxu2 }
 0x373   : > { %v3730_v60 = vmul.f32 %v6123_v17, %v3676_v59 }
 0x375   : > { %v3766_v61 = vadd.f32 %v6130_v18, %v3730_v60 }
 0x377   : > { %vm3798_vm1 = vcmp.gt.f32.partialorder %v3766_v61, 0.0  ;;  %v3830_v62 = vmul.f32 0.1, %v3766_v61 }
 0x379   : > { %v3862_v63 = vsel %vm3798_vm1, %v3766_v61, %v3830_v62 }
 0x37a   : > { %3894 = vst [vmem:[%s6141_s13 + $0xa0] sm:$0xff] %v3862_v63  ;;  %v3678_v52 = vpop.f32.mrf.mxu2  ;;  %v3696_v55 = vpop.f32.mrf.mxu3 }
 0x37b   : > { %v3731_v0 = vmul.f32 %v6123_v17, %v3678_v52  ;;  %v3738_v2 = vmul.f32 %v6123_v17, %v3696_v55 }
 0x37d   : > { %v3767_v3 = vadd.f32 %v6130_v18, %v3731_v0  ;;  %v3774_v4 = vadd.f32 %v6130_v18, %v3738_v2 }
 0x37f   : > { %vm3799_vm2 = vcmp.gt.f32.partialorder %v3767_v3, 0.0  ;;  %v3831_v5 = vmul.f32 0.1, %v3767_v3  ;;  %vm3806_vm3 = vcmp.gt.f32.partialorder %v3774_v4, 0.0  ;;  %v3838_v6 = vmul.f32 0.1, %v3774_v4 }
 0x381   : > { %v3863_v7 = vsel %vm3799_vm2, %v3767_v3, %v3831_v5  ;;  %v3870_v8 = vsel %vm3806_vm3, %v3774_v4, %v3838_v6 }
 0x382   : > { %3895 = vst [vmem:[%s6141_s13 + $0xa8] sm:$0xff] %v3863_v7  ;;  %v3698_v9 = vpop.f32.mrf.mxu3 }
 0x383   : > { %3902 = vst [vmem:[%s6141_s13 + $0xe0] sm:$0xff] %v3870_v8  ;;  %v3739_v10 = vmul.f32 %v6123_v17, %v3698_v9  ;;  %v3656_v11 = vpop.f32.mrf.mxu1 }
 0x384   : > { %v3636_v12 = vpop.f32.mrf.mxu0  ;;  %v3722_v13 = vmul.f32 %v6123_v17, %v3656_v11 }
 0x385   : > { %v3775_v14 = vadd.f32 %v6130_v18, %v3739_v10  ;;  %v3714_v15 = vmul.f32 %v6123_v17, %v3636_v12 }
 0x386   : > { %v3758_v16 = vadd.f32 %v6130_v18, %v3722_v13 }
 0x387   : > { %vm3807_vm4 = vcmp.gt.f32.partialorder %v3775_v14, 0.0  ;;  %v3839_v19 = vmul.f32 0.1, %v3775_v14  ;;  %v3750_v20 = vadd.f32 %v6130_v18, %v3714_v15 }
 0x388   : > { %vm3790_vm5 = vcmp.gt.f32.partialorder %v3758_v16, 0.0  ;;  %v3822_v21 = vmul.f32 0.1, %v3758_v16 }
 0x389   : > { %v3871_v22 = vsel %vm3807_vm4, %v3775_v14, %v3839_v19  ;;  %vm3782_vm6 = vcmp.gt.f32.partialorder %v3750_v20, 0.0  ;;  %v3814_v23 = vmul.f32 0.1, %v3750_v20 }
 0x38a   : > { %3903 = vst [vmem:[%s6141_s13 + $0xe8] sm:$0xff] %v3871_v22  ;;  %v3854_v24 = vsel %vm3790_vm5, %v3758_v16, %v3822_v21 }
 0x38b   : > { %v3846_v26 = vsel %vm3782_vm6, %v3750_v20, %v3814_v23  ;;  %3886 = vst [vmem:[%s6141_s13 + $0x60] sm:$0xff] %v3854_v24  ;;  %v3658_v27 = vpop.f32.mrf.mxu1 }
 0x38c   : > { %3878 = vst [vmem:[%s6141_s13 + $0x20] sm:$0xff] %v3846_v26  ;;  %v3638_v28 = vpop.f32.mrf.mxu0  ;;  %v3723_v29 = vmul.f32 %v6123_v17, %v3658_v27 }
 0x38d   : > { %v3715_v31 = vmul.f32 %v6123_v17, %v3638_v28 }
 0x38e   : > { %v3759_v32 = vadd.f32 %v6130_v18, %v3723_v29 }
 0x38f   : > { %v3751_v34 = vadd.f32 %v6130_v18, %v3715_v31 }
 0x390   : > { %vm3791_vm7 = vcmp.gt.f32.partialorder %v3759_v32, 0.0  ;;  %v3823_v36 = vmul.f32 0.1, %v3759_v32 }
 0x391   : > { %vm3783_vm8 = vcmp.gt.f32.partialorder %v3751_v34, 0.0  ;;  %v3815_v33 = vmul.f32 0.1, %v3751_v34 }
 0x392   : > { %v3855_v37 = vsel %vm3791_vm7, %v3759_v32, %v3823_v36 }
 0x393   : > { %v3847_v35 = vsel %vm3783_vm8, %v3751_v34, %v3815_v33  ;;  %3887 = vst [vmem:[%s6141_s13 + $0x68] sm:$0xff] %v3855_v37 }
 0x394   : > { %3879 = vst [vmem:[%s6141_s13 + $0x28] sm:$0xff] %v3847_v35 }
 0x3a9   : > { %v3701_v30 = vpop.f32.mrf.mxu3 }
 0x3aa   : > { %v3681_v38 = vpop.f32.mrf.mxu2  ;;  %v3740_v39 = vmul.f32 %v6123_v17, %v3701_v30 }
 0x3ab   : > { %v3732_v40 = vmul.f32 %v6123_v17, %v3681_v38 }
 0x3ac   : > { %v3776_v41 = vadd.f32 %v6130_v18, %v3740_v39 }
 0x3ad   : > { %v3768_v42 = vadd.f32 %v6130_v18, %v3732_v40 }
 0x3ae   : > { %vm3808_vm9 = vcmp.gt.f32.partialorder %v3776_v41, 0.0  ;;  %v3840_v43 = vmul.f32 0.1, %v3776_v41 }
 0x3af   : > { %vm3800_vm10 = vcmp.gt.f32.partialorder %v3768_v42, 0.0  ;;  %v3832_v44 = vmul.f32 0.1, %v3768_v42 }
 0x3b0   : > { %v3872_v45 = vsel %vm3808_vm9, %v3776_v41, %v3840_v43 }
 0x3b1   : > { %v3864_v46 = vsel %vm3800_vm10, %v3768_v42, %v3832_v44  ;;  %3904 = vst [vmem:[%s6141_s13 + $0xf0] sm:$0xff] %v3872_v45  ;;  %v3703_v47 = vpop.f32.mrf.mxu3 }
 0x3b2   : > { %3896 = vst [vmem:[%s6141_s13 + $0xb0] sm:$0xff] %v3864_v46  ;;  %v3683_v48 = vpop.f32.mrf.mxu2  ;;  %v3741_v49 = vmul.f32 %v6123_v17, %v3703_v47 }
 0x3b3   : > { %v3733_v25 = vmul.f32 %v6123_v17, %v3683_v48 }
 0x3b4   : > { %v3777_v50 = vadd.f32 %v6130_v18, %v3741_v49 }
 0x3b5   : > { %v3769_v51 = vadd.f32 %v6130_v18, %v3733_v25 }
 0x3b6   : > { %vm3809_vm11 = vcmp.gt.f32.partialorder %v3777_v50, 0.0  ;;  %v3841_v53 = vmul.f32 0.1, %v3777_v50 }
 0x3b7   : > { %vm3801_vm12 = vcmp.gt.f32.partialorder %v3769_v51, 0.0  ;;  %v3833_v54 = vmul.f32 0.1, %v3769_v51 }
 0x3b8   : > { %v3873_v56 = vsel %vm3809_vm11, %v3777_v50, %v3841_v53 }
 0x3b9   : > { %v3865_v57 = vsel %vm3801_vm12, %v3769_v51, %v3833_v54  ;;  %3905 = vst [vmem:[%s6141_s13 + $0xf8] sm:$0xff] %v3873_v56 }
 0x3ba   : > { %3897 = vst [vmem:[%s6141_s13 + $0xb8] sm:$0xff] %v3865_v57 }
 0x3bc   : > { %v3641_v1 = vpop.f32.mrf.mxu0 }
 0x3bd   : > { %v3716_v58 = vmul.f32 %v6123_v17, %v3641_v1 }
 0x3bf   : > { %v3752_v59 = vadd.f32 %v6130_v18, %v3716_v58 }
 0x3c1   : > { %vm3784_vm13 = vcmp.gt.f32.partialorder %v3752_v59, 0.0  ;;  %v3816_v60 = vmul.f32 0.1, %v3752_v59 }
 0x3c3   : > { %v3848_v61 = vsel %vm3784_vm13, %v3752_v59, %v3816_v60 }
 0x3c4   : > { %3880 = vst [vmem:[%s6141_s13 + $0x30] sm:$0xff] %v3848_v61  ;;  %v3643_v62 = vpop.f32.mrf.mxu0  ;;  %v3661_v63 = vpop.f32.mrf.mxu1 }
 0x3c5   : > { %v3717_v52 = vmul.f32 %v6123_v17, %v3643_v62  ;;  %v3724_v55 = vmul.f32 %v6123_v17, %v3661_v63 }
 0x3c7   : > { %v3753_v0 = vadd.f32 %v6130_v18, %v3717_v52  ;;  %v3760_v2 = vadd.f32 %v6130_v18, %v3724_v55 }
 0x3c9   : > { %vm3785_vm14 = vcmp.gt.f32.partialorder %v3753_v0, 0.0  ;;  %v3817_v3 = vmul.f32 0.1, %v3753_v0  ;;  %vm3792_vm15 = vcmp.gt.f32.partialorder %v3760_v2, 0.0  ;;  %v3824_v4 = vmul.f32 0.1, %v3760_v2 }
 0x3cb   : > { %v3849_v5 = vsel %vm3785_vm14, %v3753_v0, %v3817_v3  ;;  %v3856_v6 = vsel %vm3792_vm15, %v3760_v2, %v3824_v4 }
 0x3cc   : > { %3881 = vst [vmem:[%s6141_s13 + $0x38] sm:$0xff] %v3849_v5  ;;  %v3663_v7 = vpop.f32.mrf.mxu1 }
 0x3cd   : > { %3888 = vst [vmem:[%s6141_s13 + $0x70] sm:$0xff] %v3856_v6  ;;  %v3725_v8 = vmul.f32 %v6123_v17, %v3663_v7 }
 0x3cf   : > { %v3761_v9 = vadd.f32 %v6130_v18, %v3725_v8 }
 0x3d1   : > { %vm3793_vm0 = vcmp.gt.f32.partialorder %v3761_v9, 0.0  ;;  %v3825_v10 = vmul.f32 0.1, %v3761_v9 }
 0x3d3   : > { %v3857_v11 = vsel %vm3793_vm0, %v3761_v9, %v3825_v10 }
 0x3d4   : > { %3889 = vst [vmem:[%s6141_s13 + $0x78] sm:$0xff] %v3857_v11 }
 0x3d5   : > { %4579 = shalt.err (!%p4576_p5)
}
 0x3d6   : > { %s4640_s8 = smov 128  }
 0x3d7   : > { %4486 = dma.vmem_to_hbm [thread:$0]  (%p4706_p4), %s3923_s26, 4096, %s3925_s18, %s3907_s29, %s4640_s8, %s4640_s8, %s4633_s9  }
 0x3d8 PF: > { %p4492_p6 = scmp.ge.s32.totalorder %s4630_s20, 2  ;;  %s3939_s13 = sand.u32 1, %s4610_s15  }
 0x3d9   : > { %s3940_s14 = scalar_lea.sflag [#allocation4], %s3939_s13 }
 0x3da   : > { %p4489_p7 = pnand %p4492_p6, %p4713_p8 }
 0x3dc   : > { %p4490_p9 = pneg %p4489_p7 }
 0x3de   : > { %4605 = dma.done.wait (%p4490_p9), %s3940_s14, 4096  }
 0x3df   : > { %4607 = vsyncadd (%p4490_p9), %s3940_s14, 4294963200  ;;  %s17_s20 = sadd.s32 1, %s4630_s20   ;;  %s6305_s15 = smov %s4614_s16 }
 0x3e0   : > { %p14_p10 = scmp.ge.s32.totalorder %s17_s20, 4   ;;  %s6306_s16 = smov %s4618_s17 }
 0x3e1   : > { %s6307_s17 = smov %s4719_s28  ;;  %s6308_s18 = smov %s4626_s19 }
 0x3e2   : > { %s6309_s19 = smov %s6311_s23  ;;  %16 = sbr.rel (!%p14_p10) target bundleno = 4 (0x4), region = 82 }
 0x3e7   :  { %3946 = vsyncpa [#allocation4], 1 }
 0x3e8   :  { %3948 = vsyncpa [#allocation4 + $0x1], 1 }

</bundles_post_ra>
